<compile_context>
chip_gen: v7x
topology: tpu7x:2x2x1
jax: 0.10.0
libtpu: 0.0.40
codegen_flags: <defaults>
</compile_context>

<pallas_src>
import jax
import jax.numpy as jnp
from jax import lax
from jax.experimental import pallas as pl
from jax.experimental.pallas import tpu as pltpu

VMEM = pl.BlockSpec(memory_space=pltpu.MemorySpace.VMEM)


# ======================= fused bidirectional LSTM stack ========================
def _make_lstm_kernel(num_layers):
    def kernel(*args):
        x_ref = args[0]                                  # (T, B, E) time-major
        n_w = 6 * num_layers
        w_refs = args[1:1 + n_w]                         # per layer, per dir: wih, whh, b
        hN_ref = args[1 + n_w]                           # (B, H)  == hn[-1]
        xg_scr, yf_scr, yb_scr = args[2 + n_w:5 + n_w]

        T, B, E = x_ref.shape
        H = hN_ref.shape[1]
        f32 = jnp.float32

        def wget(l, d):
            base = 6 * l + 3 * d
            return w_refs[base], w_refs[base + 1], w_refs[base + 2]

        x2d = x_ref[...].reshape(T * B, E)               # layer-0 input, loaded once

        for l in range(num_layers):
            last = (l == num_layers - 1)
            dirs = (1,) if last else (0, 1)              # only backward dir feeds hn[-1]

            # ---- hoisted input projection: one big matmul per direction ----
            if l > 0:
                yf2d = yf_scr[...].reshape(T * B, H)
                yb2d = yb_scr[...].reshape(T * B, H)
            for d in dirs:
                wih_ref, _, b_ref = wget(l, d)
                if l == 0:
                    xg = jnp.dot(x2d, wih_ref[...], preferred_element_type=f32)
                else:
                    # input = concat([y_fwd, y_bwd]) -> two dots on split W_ih halves
                    xg = (jnp.dot(yf2d, wih_ref[0:H, :], preferred_element_type=f32)
                          + jnp.dot(yb2d, wih_ref[H:2 * H, :], preferred_element_type=f32))
                xg_scr[d] = (xg + b_ref[...]).reshape(T, B, 4 * H)

            # ---- serial recurrences (fully unrolled; only h @ W_hh per step) ----
            for d in dirs:
                _, whh_ref, _ = wget(l, d)
                whh = whh_ref[...]                       # hoist weight load
                y_scr = None if last else (yf_scr if d == 0 else yb_scr)
                h = jnp.zeros((B, H), f32)
                c = jnp.zeros((B, H), f32)
                for t in range(T):
                    tt = (T - 1 - t) if d == 1 else t    # in-kernel time reversal
                    gates = xg_scr[d, tt] + jnp.dot(h, whh, preferred_element_type=f32)
                    sig = jax.nn.sigmoid(gates)          # one full-width (B, 4H) EUP pass
                    i_g = sig[:, 0:H]
                    f_g = sig[:, H:2 * H]
                    o_g = sig[:, 3 * H:4 * H]
                    g_g = jnp.tanh(gates[:, 2 * H:3 * H])
                    c = f_g * c + i_g * g_g
                    h = o_g * jnp.tanh(c)
                    if y_scr is not None:
                        y_scr[tt] = h
                if last:
                    hN_ref[...] = h                      # hn[-1]: last layer, backward dir
    return kernel


def lstm_stack(x_tm, lstm_flat, num_layers, hidden_dim):
    T, B, _ = x_tm.shape
    return pl.pallas_call(
        _make_lstm_kernel(num_layers),
        out_shape=jax.ShapeDtypeStruct((B, hidden_dim), jnp.float32),
        in_specs=[VMEM] * (1 + len(lstm_flat)),
        out_specs=VMEM,
        scratch_shapes=[
            pltpu.VMEM((2, T, B, 4 * hidden_dim), jnp.float32),  # hoisted x-projections
            pltpu.VMEM((T, B, hidden_dim), jnp.float32),         # forward layer output
            pltpu.VMEM((T, B, hidden_dim), jnp.float32),         # backward layer output
        ],
    )(x_tm, *lstm_flat)


# ===================== fused CNN branch + dense heads ==========================
def _make_cnn_head_kernel(kernels):
    K = len(kernels)
    maxw = max(kernels)

    def kernel(*args):
        x_ref, h_ref = args[0], args[1]                  # (T,B,E) emb, (B,H) lstm feat
        conv_refs = args[2:2 + 2 * K]                    # (w_flat (win*E,F), bias (1,F)) per window
        (w1, b1, w2, b2, w3, b3, w4, b4, w5, b5) = args[2 + 2 * K:12 + 2 * K]
        out_ref = args[12 + 2 * K]
        xpad_scr = args[13 + 2 * K]

        T, B, E = x_ref.shape
        F = conv_refs[1].shape[1]
        f32 = jnp.float32

        # ---- lstm_fc branch (BatchNorms pre-folded into the Linears) ----
        a = jnp.maximum(jnp.dot(h_ref[...], w1[...], preferred_element_type=f32) + b1[...], 0.0)
        a = jnp.maximum(jnp.dot(a, w2[...], preferred_element_type=f32) + b2[...], 0.0)

        # ---- CNN branch: one shared zero-padded time-major copy, im2col per window ----
        # (padding=(win-1, 0) in the PyTorch conv => "full" conv positions are included)
        xpad_scr[...] = jnp.zeros_like(xpad_scr)
        xpad_scr[maxw - 1:maxw - 1 + T] = x_ref[...]

        n3 = w3.shape[1]
        acc = jnp.zeros((B, n3), f32) + b3[...]
        for j, win in enumerate(kernels):
            wflat = conv_refs[2 * j][...]                # (win*E, F)
            bconv = conv_refs[2 * j + 1][...]            # (1, F)
            tout = T + win - 1
            off = maxw - win
            cols = [xpad_scr[off + k:off + k + tout].reshape(tout * B, E)
                    for k in range(win)]
            patch = jnp.concatenate(cols, axis=-1)       # im2col: (tout*B, win*E)
            z = jnp.dot(patch, wflat, preferred_element_type=f32).reshape(tout, B, F)
            z = jnp.tanh(z + bconv)
            feat = jnp.max(z, axis=0)                    # max-pool over time -> (B, F)
            # convs_fc Linear applied per-window block: no (B, F*K) concat materialized
            acc = acc + jnp.dot(feat, w3[j * F:(j + 1) * F, :], preferred_element_type=f32)
        cfeat = jnp.maximum(acc, 0.0)

        # ---- final_fc: concat([a, cfeat]) @ W4 as two dots on split halves of W4 ----
        n1 = a.shape[1]
        nc = cfeat.shape[1]
        zf = jnp.maximum(jnp.dot(a, w4[0:n1, :], preferred_element_type=f32)
                         + jnp.dot(cfeat, w4[n1:n1 + nc, :], preferred_element_type=f32)
                         + b4[...], 0.0)
        out_ref[...] = jax.nn.sigmoid(jnp.dot(zf, w5[...], preferred_element_type=f32) + b5[...])
    return kernel


def cnn_head(x_tm, lstm_feat, conv_flat, head_flat, kernels, output_size):
    T, B, E = x_tm.shape
    maxw = max(kernels)
    return pl.pallas_call(
        _make_cnn_head_kernel(tuple(kernels)),
        out_shape=jax.ShapeDtypeStruct((B, output_size), jnp.float32),
        in_specs=[VMEM] * (2 + len(conv_flat) + len(head_flat)),
        out_specs=VMEM,
        scratch_shapes=[pltpu.VMEM((T + 2 * (maxw - 1), B, E), jnp.float32)],
    )(x_tm, lstm_feat, *conv_flat, *head_flat)


# --------------------------------- forward -------------------------------------
def forward(token_ids, prep):
    # embedding gather (plain-JAX glue), gathered directly into time-major layout
    emb_tm = prep["embedding"][token_ids.T]              # (T, B, E)
    lstm_feat = lstm_stack(emb_tm, prep["lstm_flat"],
                           prep["num_layers"], prep["hidden_dim"])
    return cnn_head(emb_tm, lstm_feat, prep["conv_flat"], prep["head_flat"],
                    prep["kernels"], prep["output_size"])


# --------------------- deterministic parameters + BN folding -------------------
def init_params(key, vocab_size, embedding_dim, hidden_dim, num_layers,
                kernels, num_filters, output_size):
    keys = iter(jax.random.split(key, 128))

    def nrm(shape, scale=0.1):
        return scale * jax.random.normal(next(keys), shape, dtype=jnp.float32)

    params = {"embedding": nrm((vocab_size, embedding_dim), 1.0)}

    lstm = []
    for l in range(num_layers):
        in_dim = embedding_dim if l == 0 else 2 * hidden_dim
        dirs = []
        for _ in range(2):                               # forward, backward
            w_ih = nrm((in_dim, 4 * hidden_dim))
            w_hh = nrm((hidden_dim, 4 * hidden_dim))
            b_ih = nrm((1, 4 * hidden_dim))
            b_hh = nrm((1, 4 * hidden_dim))
            dirs.append((w_ih, w_hh, b_ih + b_hh))
        lstm.append(dirs)
    params["lstm"] = lstm

    convs = []
    for win in kernels:
        convs.append((nrm((win, embedding_dim, num_filters)), nrm((1, num_filters)), win))
    params["convs"] = convs

    def bn_params(dim):
        gamma = 1.0 + nrm((1, dim))
        beta = nrm((1, dim))
        mean = nrm((1, dim))
        var = 1.0 + 0.1 * jnp.abs(nrm((1, dim)))
        return jnp.concatenate([gamma, beta, mean, var], axis=0)   # (4, dim)

    fk = num_filters * len(kernels)
    params["head"] = {
        # NOTE: w3 rows are laid out per conv-window block (win0 filters, win1, ...).
        "w1": nrm((hidden_dim, 128)), "b1": nrm((1, 128)), "bn1": bn_params(128),
        "w2": nrm((128, 64)),         "b2": nrm((1, 64)),  "bn2": bn_params(64),
        "w3": nrm((fk, 64)),          "b3": nrm((1, 64)),  "bn3": bn_params(64),
        "w4": nrm((128, 32)),         "b4": nrm((1, 32)),  "bn4": bn_params(32),
        "w5": nrm((32, output_size)), "b5": nrm((1, output_size)),
    }
    params["output_size"] = output_size
    params["kernels"] = tuple(kernels)
    return params


def _fold_bn(w, b, bn, eps=1e-5):
    """Fold eval-mode BatchNorm1d (rows: gamma, beta, mean, var) into Linear (w, b)."""
    gamma, beta, mean, var = bn[0], bn[1], bn[2], bn[3]
    scale = gamma * lax.rsqrt(var + eps)
    return w * scale[None, :], (b - mean[None, :]) * scale[None, :] + beta[None, :]


def prepare_params(params):
    lstm_flat = [t for layer in params["lstm"] for (wih, whh, b) in layer
                 for t in (wih, whh, b)]
    conv_flat = []
    for (w, b, win) in params["convs"]:
        conv_flat += [w.reshape(win * w.shape[1], w.shape[2]), b]   # im2col weight layout
    h = params["head"]
    w1, b1 = _fold_bn(h["w1"], h["b1"], h["bn1"])
    w2, b2 = _fold_bn(h["w2"], h["b2"], h["bn2"])
    w3, b3 = _fold_bn(h["w3"], h["b3"], h["bn3"])
    w4, b4 = _fold_bn(h["w4"], h["b4"], h["bn4"])
    head_flat = [w1, b1, w2, b2, w3, b3, w4, b4, h["w5"], h["b5"]]
    return {
        "embedding": params["embedding"],
        "lstm_flat": lstm_flat,
        "num_layers": len(params["lstm"]),
        "hidden_dim": params["lstm"][0][0][1].shape[0],
        "conv_flat": conv_flat,
        "head_flat": head_flat,
        "kernels": params["kernels"],
        "output_size": params["output_size"],
    }


if __name__ == "__main__":
    B, T = 8, 12
    vocab_size, embedding_dim = 50, 32
    hidden_dim, num_layers = 32, 2
    kernels, num_filters = (3, 4, 5), 16
    output_size = 1

    key = jax.random.PRNGKey(0)
    pkey, xkey = jax.random.split(key)
    params = init_params(pkey, vocab_size, embedding_dim, hidden_dim, num_layers,
                         kernels, num_filters, output_size)
    prep = prepare_params(params)
    token_ids = jax.random.randint(xkey, (B, T), 0, vocab_size)

    out = forward(token_ids, prep)
    out = jax.block_until_ready(out)

    assert out.shape == (B, output_size)
    assert bool(jnp.all(jnp.isfinite(out)))
    assert bool(jnp.all((out > 0.0) & (out < 1.0)))   # sigmoid output range
    print("KERNEL_OK")
</pallas_src>

<mosaic_0001>
module attributes {stable_mosaic.version = 11 : i64} {
  func.func @kernel(%arg0: memref<12x8x32xf32, #tpu.memory_space<vmem>>, %arg1: memref<32x128xf32, #tpu.memory_space<vmem>>, %arg2: memref<32x128xf32, #tpu.memory_space<vmem>>, %arg3: memref<1x128xf32, #tpu.memory_space<vmem>>, %arg4: memref<32x128xf32, #tpu.memory_space<vmem>>, %arg5: memref<32x128xf32, #tpu.memory_space<vmem>>, %arg6: memref<1x128xf32, #tpu.memory_space<vmem>>, %arg7: memref<64x128xf32, #tpu.memory_space<vmem>>, %arg8: memref<32x128xf32, #tpu.memory_space<vmem>>, %arg9: memref<1x128xf32, #tpu.memory_space<vmem>>, %arg10: memref<64x128xf32, #tpu.memory_space<vmem>>, %arg11: memref<32x128xf32, #tpu.memory_space<vmem>>, %arg12: memref<1x128xf32, #tpu.memory_space<vmem>>, %arg13: memref<8x32xf32, #tpu.memory_space<vmem>>, %arg14: memref<2x12x8x128xf32, #tpu.memory_space<vmem>>, %arg15: memref<12x8x32xf32, #tpu.memory_space<vmem>>, %arg16: memref<12x8x32xf32, #tpu.memory_space<vmem>>) attributes {dimension_semantics = [], scalar_prefetch = 0 : i64, scratch_operands = 3 : i64, tpu.core_type = #tpu.core_type<tc>} {
    %c0 = arith.constant 0 : index
    %c0_0 = arith.constant 0 : index
    %c0_1 = arith.constant 0 : index
    %0 = vector.load %arg0[%c0, %c0_0, %c0_1] : memref<12x8x32xf32, #tpu.memory_space<vmem>>, vector<12x8x32xf32>
    %1 = vector.shape_cast %0 : vector<12x8x32xf32> to vector<96x32xf32>
    %c0_2 = arith.constant 0 : index
    %c0_3 = arith.constant 0 : index
    %2 = vector.load %arg1[%c0_2, %c0_3] : memref<32x128xf32, #tpu.memory_space<vmem>>, vector<32x128xf32>
    %cst = arith.constant dense<0.000000e+00> : vector<96x128xf32>
    %3 = tpu.matmul %1, %2, %cst {dimension_numbers = #tpu.dot_dimension_numbers<[1], [0], [0], [1], [0, 0, 1, 1], [], []>} : vector<96x32xf32>, vector<32x128xf32>, vector<96x128xf32> -> vector<96x128xf32>
    %c0_4 = arith.constant 0 : index
    %c0_5 = arith.constant 0 : index
    %4 = vector.load %arg3[%c0_4, %c0_5] : memref<1x128xf32, #tpu.memory_space<vmem>>, vector<1x128xf32>
    %5 = vector.broadcast %4 : vector<1x128xf32> to vector<96x128xf32>
    %6 = arith.addf %3, %5 : vector<96x128xf32>
    %7 = vector.shape_cast %6 : vector<96x128xf32> to vector<12x8x128xf32>
    %c0_6 = arith.constant 0 : index
    %c0_7 = arith.constant 0 : index
    %c0_8 = arith.constant 0 : index
    %c0_9 = arith.constant 0 : index
    %8 = vector.load %arg14[%c0_6, %c0_7, %c0_8, %c0_9] : memref<2x12x8x128xf32, #tpu.memory_space<vmem>>, vector<1x12x8x128xf32>
    %9 = vector.shape_cast %8 : vector<1x12x8x128xf32> to vector<12x8x128xf32>
    %10 = vector.shape_cast %7 : vector<12x8x128xf32> to vector<1x12x8x128xf32>
    tpu.vector_store %arg14[%c0_6, %c0_7, %c0_8, %c0_9], %10 {strides = array<i32>} : memref<2x12x8x128xf32, #tpu.memory_space<vmem>>, vector<1x12x8x128xf32>,
    %c0_10 = arith.constant 0 : index
    %c0_11 = arith.constant 0 : index
    %11 = vector.load %arg4[%c0_10, %c0_11] : memref<32x128xf32, #tpu.memory_space<vmem>>, vector<32x128xf32>
    %cst_12 = arith.constant dense<0.000000e+00> : vector<96x128xf32>
    %12 = tpu.matmul %1, %11, %cst_12 {dimension_numbers = #tpu.dot_dimension_numbers<[1], [0], [0], [1], [0, 0, 1, 1], [], []>} : vector<96x32xf32>, vector<32x128xf32>, vector<96x128xf32> -> vector<96x128xf32>
    %c0_13 = arith.constant 0 : index
    %c0_14 = arith.constant 0 : index
    %13 = vector.load %arg6[%c0_13, %c0_14] : memref<1x128xf32, #tpu.memory_space<vmem>>, vector<1x128xf32>
    %14 = vector.broadcast %13 : vector<1x128xf32> to vector<96x128xf32>
    %15 = arith.addf %12, %14 : vector<96x128xf32>
    %16 = vector.shape_cast %15 : vector<96x128xf32> to vector<12x8x128xf32>
    %c1 = arith.constant 1 : index
    %c0_15 = arith.constant 0 : index
    %c0_16 = arith.constant 0 : index
    %c0_17 = arith.constant 0 : index
    %17 = vector.load %arg14[%c1, %c0_15, %c0_16, %c0_17] : memref<2x12x8x128xf32, #tpu.memory_space<vmem>>, vector<1x12x8x128xf32>
    %18 = vector.shape_cast %17 : vector<1x12x8x128xf32> to vector<12x8x128xf32>
    %19 = vector.shape_cast %16 : vector<12x8x128xf32> to vector<1x12x8x128xf32>
    tpu.vector_store %arg14[%c1, %c0_15, %c0_16, %c0_17], %19 {strides = array<i32>} : memref<2x12x8x128xf32, #tpu.memory_space<vmem>>, vector<1x12x8x128xf32>,
    %c0_18 = arith.constant 0 : index
    %c0_19 = arith.constant 0 : index
    %20 = vector.load %arg2[%c0_18, %c0_19] : memref<32x128xf32, #tpu.memory_space<vmem>>, vector<32x128xf32>
    %cst_20 = arith.constant 0.000000e+00 : f32
    %21 = vector.broadcast %cst_20 : f32 to vector<8x32xf32>
    %cst_21 = arith.constant 0.000000e+00 : f32
    %22 = vector.broadcast %cst_21 : f32 to vector<8x32xf32>
    %c0_22 = arith.constant 0 : index
    %c0_23 = arith.constant 0 : index
    %c0_24 = arith.constant 0 : index
    %c0_25 = arith.constant 0 : index
    %23 = vector.load %arg14[%c0_22, %c0_23, %c0_24, %c0_25] : memref<2x12x8x128xf32, #tpu.memory_space<vmem>>, vector<1x1x8x128xf32>
    %24 = vector.shape_cast %23 : vector<1x1x8x128xf32> to vector<8x128xf32>
    %cst_26 = arith.constant dense<0.000000e+00> : vector<8x128xf32>
    %25 = tpu.matmul %21, %20, %cst_26 {dimension_numbers = #tpu.dot_dimension_numbers<[1], [0], [0], [1], [0, 0, 1, 1], [], []>} : vector<8x32xf32>, vector<32x128xf32>, vector<8x128xf32> -> vector<8x128xf32>
    %26 = arith.addf %24, %25 : vector<8x128xf32>
    %27 = arith.negf %26 : vector<8x128xf32>
    %28 = math.exp %27 : vector<8x128xf32>
    %cst_27 = arith.constant 1.000000e+00 : f32
    %29 = vector.broadcast %cst_27 : f32 to vector<8x128xf32>
    %30 = arith.addf %29, %28 : vector<8x128xf32>
    %31 = arith.divf %29, %30 : vector<8x128xf32>
    %32 = vector.extract_strided_slice %31 {offsets = [0, 0], sizes = [8, 32], strides = [1, 1]} : vector<8x128xf32> to vector<8x32xf32>
    %33 = vector.extract_strided_slice %31 {offsets = [0, 32], sizes = [8, 32], strides = [1, 1]} : vector<8x128xf32> to vector<8x32xf32>
    %34 = vector.extract_strided_slice %31 {offsets = [0, 96], sizes = [8, 32], strides = [1, 1]} : vector<8x128xf32> to vector<8x32xf32>
    %35 = vector.extract_strided_slice %26 {offsets = [0, 64], sizes = [8, 32], strides = [1, 1]} : vector<8x128xf32> to vector<8x32xf32>
    %36 = math.tanh %35 : vector<8x32xf32>
    %37 = arith.mulf %33, %22 : vector<8x32xf32>
    %38 = arith.mulf %32, %36 : vector<8x32xf32>
    %39 = arith.addf %37, %38 : vector<8x32xf32>
    %40 = math.tanh %39 : vector<8x32xf32>
    %41 = arith.mulf %34, %40 : vector<8x32xf32>
    %c0_28 = arith.constant 0 : index
    %c0_29 = arith.constant 0 : index
    %c0_30 = arith.constant 0 : index
    %42 = vector.load %arg15[%c0_28, %c0_29, %c0_30] : memref<12x8x32xf32, #tpu.memory_space<vmem>>, vector<1x8x32xf32>
    %43 = vector.shape_cast %42 : vector<1x8x32xf32> to vector<8x32xf32>
    %44 = vector.shape_cast %41 : vector<8x32xf32> to vector<1x8x32xf32>
    tpu.vector_store %arg15[%c0_28, %c0_29, %c0_30], %44 {strides = array<i32>} : memref<12x8x32xf32, #tpu.memory_space<vmem>>, vector<1x8x32xf32>,
    %c0_31 = arith.constant 0 : index
    %c1_32 = arith.constant 1 : index
    %c0_33 = arith.constant 0 : index
    %c0_34 = arith.constant 0 : index
    %45 = vector.load %arg14[%c0_31, %c1_32, %c0_33, %c0_34] : memref<2x12x8x128xf32, #tpu.memory_space<vmem>>, vector<1x1x8x128xf32>
    %46 = vector.shape_cast %45 : vector<1x1x8x128xf32> to vector<8x128xf32>
    %cst_35 = arith.constant dense<0.000000e+00> : vector<8x128xf32>
    %47 = tpu.matmul %41, %20, %cst_35 {dimension_numbers = #tpu.dot_dimension_numbers<[1], [0], [0], [1], [0, 0, 1, 1], [], []>} : vector<8x32xf32>, vector<32x128xf32>, vector<8x128xf32> -> vector<8x128xf32>
    %48 = arith.addf %46, %47 : vector<8x128xf32>
    %49 = arith.negf %48 : vector<8x128xf32>
    %50 = math.exp %49 : vector<8x128xf32>
    %cst_36 = arith.constant 1.000000e+00 : f32
    %51 = vector.broadcast %cst_36 : f32 to vector<8x128xf32>
    %52 = arith.addf %51, %50 : vector<8x128xf32>
    %53 = arith.divf %51, %52 : vector<8x128xf32>
    %54 = vector.extract_strided_slice %53 {offsets = [0, 0], sizes = [8, 32], strides = [1, 1]} : vector<8x128xf32> to vector<8x32xf32>
    %55 = vector.extract_strided_slice %53 {offsets = [0, 32], sizes = [8, 32], strides = [1, 1]} : vector<8x128xf32> to vector<8x32xf32>
    %56 = vector.extract_strided_slice %53 {offsets = [0, 96], sizes = [8, 32], strides = [1, 1]} : vector<8x128xf32> to vector<8x32xf32>
    %57 = vector.extract_strided_slice %48 {offsets = [0, 64], sizes = [8, 32], strides = [1, 1]} : vector<8x128xf32> to vector<8x32xf32>
    %58 = math.tanh %57 : vector<8x32xf32>
    %59 = arith.mulf %55, %39 : vector<8x32xf32>
    %60 = arith.mulf %54, %58 : vector<8x32xf32>
    %61 = arith.addf %59, %60 : vector<8x32xf32>
    %62 = math.tanh %61 : vector<8x32xf32>
    %63 = arith.mulf %56, %62 : vector<8x32xf32>
    %c1_37 = arith.constant 1 : index
    %c0_38 = arith.constant 0 : index
    %c0_39 = arith.constant 0 : index
    %64 = vector.load %arg15[%c1_37, %c0_38, %c0_39] : memref<12x8x32xf32, #tpu.memory_space<vmem>>, vector<1x8x32xf32>
    %65 = vector.shape_cast %64 : vector<1x8x32xf32> to vector<8x32xf32>
    %66 = vector.shape_cast %63 : vector<8x32xf32> to vector<1x8x32xf32>
    tpu.vector_store %arg15[%c1_37, %c0_38, %c0_39], %66 {strides = array<i32>} : memref<12x8x32xf32, #tpu.memory_space<vmem>>, vector<1x8x32xf32>,
    %c0_40 = arith.constant 0 : index
    %c2 = arith.constant 2 : index
    %c0_41 = arith.constant 0 : index
    %c0_42 = arith.constant 0 : index
    %67 = vector.load %arg14[%c0_40, %c2, %c0_41, %c0_42] : memref<2x12x8x128xf32, #tpu.memory_space<vmem>>, vector<1x1x8x128xf32>
    %68 = vector.shape_cast %67 : vector<1x1x8x128xf32> to vector<8x128xf32>
    %cst_43 = arith.constant dense<0.000000e+00> : vector<8x128xf32>
    %69 = tpu.matmul %63, %20, %cst_43 {dimension_numbers = #tpu.dot_dimension_numbers<[1], [0], [0], [1], [0, 0, 1, 1], [], []>} : vector<8x32xf32>, vector<32x128xf32>, vector<8x128xf32> -> vector<8x128xf32>
    %70 = arith.addf %68, %69 : vector<8x128xf32>
    %71 = arith.negf %70 : vector<8x128xf32>
    %72 = math.exp %71 : vector<8x128xf32>
    %cst_44 = arith.constant 1.000000e+00 : f32
    %73 = vector.broadcast %cst_44 : f32 to vector<8x128xf32>
    %74 = arith.addf %73, %72 : vector<8x128xf32>
    %75 = arith.divf %73, %74 : vector<8x128xf32>
    %76 = vector.extract_strided_slice %75 {offsets = [0, 0], sizes = [8, 32], strides = [1, 1]} : vector<8x128xf32> to vector<8x32xf32>
    %77 = vector.extract_strided_slice %75 {offsets = [0, 32], sizes = [8, 32], strides = [1, 1]} : vector<8x128xf32> to vector<8x32xf32>
    %78 = vector.extract_strided_slice %75 {offsets = [0, 96], sizes = [8, 32], strides = [1, 1]} : vector<8x128xf32> to vector<8x32xf32>
    %79 = vector.extract_strided_slice %70 {offsets = [0, 64], sizes = [8, 32], strides = [1, 1]} : vector<8x128xf32> to vector<8x32xf32>
    %80 = math.tanh %79 : vector<8x32xf32>
    %81 = arith.mulf %77, %61 : vector<8x32xf32>
    %82 = arith.mulf %76, %80 : vector<8x32xf32>
    %83 = arith.addf %81, %82 : vector<8x32xf32>
    %84 = math.tanh %83 : vector<8x32xf32>
    %85 = arith.mulf %78, %84 : vector<8x32xf32>
    %c2_45 = arith.constant 2 : index
    %c0_46 = arith.constant 0 : index
    %c0_47 = arith.constant 0 : index
    %86 = vector.load %arg15[%c2_45, %c0_46, %c0_47] : memref<12x8x32xf32, #tpu.memory_space<vmem>>, vector<1x8x32xf32>
    %87 = vector.shape_cast %86 : vector<1x8x32xf32> to vector<8x32xf32>
    %88 = vector.shape_cast %85 : vector<8x32xf32> to vector<1x8x32xf32>
    tpu.vector_store %arg15[%c2_45, %c0_46, %c0_47], %88 {strides = array<i32>} : memref<12x8x32xf32, #tpu.memory_space<vmem>>, vector<1x8x32xf32>,
    %c0_48 = arith.constant 0 : index
    %c3 = arith.constant 3 : index
    %c0_49 = arith.constant 0 : index
    %c0_50 = arith.constant 0 : index
    %89 = vector.load %arg14[%c0_48, %c3, %c0_49, %c0_50] : memref<2x12x8x128xf32, #tpu.memory_space<vmem>>, vector<1x1x8x128xf32>
    %90 = vector.shape_cast %89 : vector<1x1x8x128xf32> to vector<8x128xf32>
    %cst_51 = arith.constant dense<0.000000e+00> : vector<8x128xf32>
    %91 = tpu.matmul %85, %20, %cst_51 {dimension_numbers = #tpu.dot_dimension_numbers<[1], [0], [0], [1], [0, 0, 1, 1], [], []>} : vector<8x32xf32>, vector<32x128xf32>, vector<8x128xf32> -> vector<8x128xf32>
    %92 = arith.addf %90, %91 : vector<8x128xf32>
    %93 = arith.negf %92 : vector<8x128xf32>
    %94 = math.exp %93 : vector<8x128xf32>
    %cst_52 = arith.constant 1.000000e+00 : f32
    %95 = vector.broadcast %cst_52 : f32 to vector<8x128xf32>
    %96 = arith.addf %95, %94 : vector<8x128xf32>
    %97 = arith.divf %95, %96 : vector<8x128xf32>
    %98 = vector.extract_strided_slice %97 {offsets = [0, 0], sizes = [8, 32], strides = [1, 1]} : vector<8x128xf32> to vector<8x32xf32>
    %99 = vector.extract_strided_slice %97 {offsets = [0, 32], sizes = [8, 32], strides = [1, 1]} : vector<8x128xf32> to vector<8x32xf32>
    %100 = vector.extract_strided_slice %97 {offsets = [0, 96], sizes = [8, 32], strides = [1, 1]} : vector<8x128xf32> to vector<8x32xf32>
    %101 = vector.extract_strided_slice %92 {offsets = [0, 64], sizes = [8, 32], strides = [1, 1]} : vector<8x128xf32> to vector<8x32xf32>
    %102 = math.tanh %101 : vector<8x32xf32>
    %103 = arith.mulf %99, %83 : vector<8x32xf32>
    %104 = arith.mulf %98, %102 : vector<8x32xf32>
    %105 = arith.addf %103, %104 : vector<8x32xf32>
    %106 = math.tanh %105 : vector<8x32xf32>
    %107 = arith.mulf %100, %106 : vector<8x32xf32>
    %c3_53 = arith.constant 3 : index
    %c0_54 = arith.constant 0 : index
    %c0_55 = arith.constant 0 : index
    %108 = vector.load %arg15[%c3_53, %c0_54, %c0_55] : memref<12x8x32xf32, #tpu.memory_space<vmem>>, vector<1x8x32xf32>
    %109 = vector.shape_cast %108 : vector<1x8x32xf32> to vector<8x32xf32>
    %110 = vector.shape_cast %107 : vector<8x32xf32> to vector<1x8x32xf32>
    tpu.vector_store %arg15[%c3_53, %c0_54, %c0_55], %110 {strides = array<i32>} : memref<12x8x32xf32, #tpu.memory_space<vmem>>, vector<1x8x32xf32>,
    %c0_56 = arith.constant 0 : index
    %c4 = arith.constant 4 : index
    %c0_57 = arith.constant 0 : index
    %c0_58 = arith.constant 0 : index
    %111 = vector.load %arg14[%c0_56, %c4, %c0_57, %c0_58] : memref<2x12x8x128xf32, #tpu.memory_space<vmem>>, vector<1x1x8x128xf32>
    %112 = vector.shape_cast %111 : vector<1x1x8x128xf32> to vector<8x128xf32>
    %cst_59 = arith.constant dense<0.000000e+00> : vector<8x128xf32>
    %113 = tpu.matmul %107, %20, %cst_59 {dimension_numbers = #tpu.dot_dimension_numbers<[1], [0], [0], [1], [0, 0, 1, 1], [], []>} : vector<8x32xf32>, vector<32x128xf32>, vector<8x128xf32> -> vector<8x128xf32>
    %114 = arith.addf %112, %113 : vector<8x128xf32>
    %115 = arith.negf %114 : vector<8x128xf32>
    %116 = math.exp %115 : vector<8x128xf32>
    %cst_60 = arith.constant 1.000000e+00 : f32
    %117 = vector.broadcast %cst_60 : f32 to vector<8x128xf32>
    %118 = arith.addf %117, %116 : vector<8x128xf32>
    %119 = arith.divf %117, %118 : vector<8x128xf32>
    %120 = vector.extract_strided_slice %119 {offsets = [0, 0], sizes = [8, 32], strides = [1, 1]} : vector<8x128xf32> to vector<8x32xf32>
    %121 = vector.extract_strided_slice %119 {offsets = [0, 32], sizes = [8, 32], strides = [1, 1]} : vector<8x128xf32> to vector<8x32xf32>
    %122 = vector.extract_strided_slice %119 {offsets = [0, 96], sizes = [8, 32], strides = [1, 1]} : vector<8x128xf32> to vector<8x32xf32>
    %123 = vector.extract_strided_slice %114 {offsets = [0, 64], sizes = [8, 32], strides = [1, 1]} : vector<8x128xf32> to vector<8x32xf32>
    %124 = math.tanh %123 : vector<8x32xf32>
    %125 = arith.mulf %121, %105 : vector<8x32xf32>
    %126 = arith.mulf %120, %124 : vector<8x32xf32>
    %127 = arith.addf %125, %126 : vector<8x32xf32>
    %128 = math.tanh %127 : vector<8x32xf32>
    %129 = arith.mulf %122, %128 : vector<8x32xf32>
    %c4_61 = arith.constant 4 : index
    %c0_62 = arith.constant 0 : index
    %c0_63 = arith.constant 0 : index
    %130 = vector.load %arg15[%c4_61, %c0_62, %c0_63] : memref<12x8x32xf32, #tpu.memory_space<vmem>>, vector<1x8x32xf32>
    %131 = vector.shape_cast %130 : vector<1x8x32xf32> to vector<8x32xf32>
    %132 = vector.shape_cast %129 : vector<8x32xf32> to vector<1x8x32xf32>
    tpu.vector_store %arg15[%c4_61, %c0_62, %c0_63], %132 {strides = array<i32>} : memref<12x8x32xf32, #tpu.memory_space<vmem>>, vector<1x8x32xf32>,
    %c0_64 = arith.constant 0 : index
    %c5 = arith.constant 5 : index
    %c0_65 = arith.constant 0 : index
    %c0_66 = arith.constant 0 : index
    %133 = vector.load %arg14[%c0_64, %c5, %c0_65, %c0_66] : memref<2x12x8x128xf32, #tpu.memory_space<vmem>>, vector<1x1x8x128xf32>
    %134 = vector.shape_cast %133 : vector<1x1x8x128xf32> to vector<8x128xf32>
    %cst_67 = arith.constant dense<0.000000e+00> : vector<8x128xf32>
    %135 = tpu.matmul %129, %20, %cst_67 {dimension_numbers = #tpu.dot_dimension_numbers<[1], [0], [0], [1], [0, 0, 1, 1], [], []>} : vector<8x32xf32>, vector<32x128xf32>, vector<8x128xf32> -> vector<8x128xf32>
    %136 = arith.addf %134, %135 : vector<8x128xf32>
    %137 = arith.negf %136 : vector<8x128xf32>
    %138 = math.exp %137 : vector<8x128xf32>
    %cst_68 = arith.constant 1.000000e+00 : f32
    %139 = vector.broadcast %cst_68 : f32 to vector<8x128xf32>
    %140 = arith.addf %139, %138 : vector<8x128xf32>
    %141 = arith.divf %139, %140 : vector<8x128xf32>
    %142 = vector.extract_strided_slice %141 {offsets = [0, 0], sizes = [8, 32], strides = [1, 1]} : vector<8x128xf32> to vector<8x32xf32>
    %143 = vector.extract_strided_slice %141 {offsets = [0, 32], sizes = [8, 32], strides = [1, 1]} : vector<8x128xf32> to vector<8x32xf32>
    %144 = vector.extract_strided_slice %141 {offsets = [0, 96], sizes = [8, 32], strides = [1, 1]} : vector<8x128xf32> to vector<8x32xf32>
    %145 = vector.extract_strided_slice %136 {offsets = [0, 64], sizes = [8, 32], strides = [1, 1]} : vector<8x128xf32> to vector<8x32xf32>
    %146 = math.tanh %145 : vector<8x32xf32>
    %147 = arith.mulf %143, %127 : vector<8x32xf32>
    %148 = arith.mulf %142, %146 : vector<8x32xf32>
    %149 = arith.addf %147, %148 : vector<8x32xf32>
    %150 = math.tanh %149 : vector<8x32xf32>
    %151 = arith.mulf %144, %150 : vector<8x32xf32>
    %c5_69 = arith.constant 5 : index
    %c0_70 = arith.constant 0 : index
    %c0_71 = arith.constant 0 : index
    %152 = vector.load %arg15[%c5_69, %c0_70, %c0_71] : memref<12x8x32xf32, #tpu.memory_space<vmem>>, vector<1x8x32xf32>
    %153 = vector.shape_cast %152 : vector<1x8x32xf32> to vector<8x32xf32>
    %154 = vector.shape_cast %151 : vector<8x32xf32> to vector<1x8x32xf32>
    tpu.vector_store %arg15[%c5_69, %c0_70, %c0_71], %154 {strides = array<i32>} : memref<12x8x32xf32, #tpu.memory_space<vmem>>, vector<1x8x32xf32>,
    %c0_72 = arith.constant 0 : index
    %c6 = arith.constant 6 : index
    %c0_73 = arith.constant 0 : index
    %c0_74 = arith.constant 0 : index
    %155 = vector.load %arg14[%c0_72, %c6, %c0_73, %c0_74] : memref<2x12x8x128xf32, #tpu.memory_space<vmem>>, vector<1x1x8x128xf32>
    %156 = vector.shape_cast %155 : vector<1x1x8x128xf32> to vector<8x128xf32>
    %cst_75 = arith.constant dense<0.000000e+00> : vector<8x128xf32>
    %157 = tpu.matmul %151, %20, %cst_75 {dimension_numbers = #tpu.dot_dimension_numbers<[1], [0], [0], [1], [0, 0, 1, 1], [], []>} : vector<8x32xf32>, vector<32x128xf32>, vector<8x128xf32> -> vector<8x128xf32>
    %158 = arith.addf %156, %157 : vector<8x128xf32>
    %159 = arith.negf %158 : vector<8x128xf32>
    %160 = math.exp %159 : vector<8x128xf32>
    %cst_76 = arith.constant 1.000000e+00 : f32
    %161 = vector.broadcast %cst_76 : f32 to vector<8x128xf32>
    %162 = arith.addf %161, %160 : vector<8x128xf32>
    %163 = arith.divf %161, %162 : vector<8x128xf32>
    %164 = vector.extract_strided_slice %163 {offsets = [0, 0], sizes = [8, 32], strides = [1, 1]} : vector<8x128xf32> to vector<8x32xf32>
    %165 = vector.extract_strided_slice %163 {offsets = [0, 32], sizes = [8, 32], strides = [1, 1]} : vector<8x128xf32> to vector<8x32xf32>
    %166 = vector.extract_strided_slice %163 {offsets = [0, 96], sizes = [8, 32], strides = [1, 1]} : vector<8x128xf32> to vector<8x32xf32>
    %167 = vector.extract_strided_slice %158 {offsets = [0, 64], sizes = [8, 32], strides = [1, 1]} : vector<8x128xf32> to vector<8x32xf32>
    %168 = math.tanh %167 : vector<8x32xf32>
    %169 = arith.mulf %165, %149 : vector<8x32xf32>
    %170 = arith.mulf %164, %168 : vector<8x32xf32>
    %171 = arith.addf %169, %170 : vector<8x32xf32>
    %172 = math.tanh %171 : vector<8x32xf32>
    %173 = arith.mulf %166, %172 : vector<8x32xf32>
    %c6_77 = arith.constant 6 : index
    %c0_78 = arith.constant 0 : index
    %c0_79 = arith.constant 0 : index
    %174 = vector.load %arg15[%c6_77, %c0_78, %c0_79] : memref<12x8x32xf32, #tpu.memory_space<vmem>>, vector<1x8x32xf32>
    %175 = vector.shape_cast %174 : vector<1x8x32xf32> to vector<8x32xf32>
    %176 = vector.shape_cast %173 : vector<8x32xf32> to vector<1x8x32xf32>
    tpu.vector_store %arg15[%c6_77, %c0_78, %c0_79], %176 {strides = array<i32>} : memref<12x8x32xf32, #tpu.memory_space<vmem>>, vector<1x8x32xf32>,
    %c0_80 = arith.constant 0 : index
    %c7 = arith.constant 7 : index
    %c0_81 = arith.constant 0 : index
    %c0_82 = arith.constant 0 : index
    %177 = vector.load %arg14[%c0_80, %c7, %c0_81, %c0_82] : memref<2x12x8x128xf32, #tpu.memory_space<vmem>>, vector<1x1x8x128xf32>
    %178 = vector.shape_cast %177 : vector<1x1x8x128xf32> to vector<8x128xf32>
    %cst_83 = arith.constant dense<0.000000e+00> : vector<8x128xf32>
    %179 = tpu.matmul %173, %20, %cst_83 {dimension_numbers = #tpu.dot_dimension_numbers<[1], [0], [0], [1], [0, 0, 1, 1], [], []>} : vector<8x32xf32>, vector<32x128xf32>, vector<8x128xf32> -> vector<8x128xf32>
    %180 = arith.addf %178, %179 : vector<8x128xf32>
    %181 = arith.negf %180 : vector<8x128xf32>
    %182 = math.exp %181 : vector<8x128xf32>
    %cst_84 = arith.constant 1.000000e+00 : f32
    %183 = vector.broadcast %cst_84 : f32 to vector<8x128xf32>
    %184 = arith.addf %183, %182 : vector<8x128xf32>
    %185 = arith.divf %183, %184 : vector<8x128xf32>
    %186 = vector.extract_strided_slice %185 {offsets = [0, 0], sizes = [8, 32], strides = [1, 1]} : vector<8x128xf32> to vector<8x32xf32>
    %187 = vector.extract_strided_slice %185 {offsets = [0, 32], sizes = [8, 32], strides = [1, 1]} : vector<8x128xf32> to vector<8x32xf32>
    %188 = vector.extract_strided_slice %185 {offsets = [0, 96], sizes = [8, 32], strides = [1, 1]} : vector<8x128xf32> to vector<8x32xf32>
    %189 = vector.extract_strided_slice %180 {offsets = [0, 64], sizes = [8, 32], strides = [1, 1]} : vector<8x128xf32> to vector<8x32xf32>
    %190 = math.tanh %189 : vector<8x32xf32>
    %191 = arith.mulf %187, %171 : vector<8x32xf32>
    %192 = arith.mulf %186, %190 : vector<8x32xf32>
    %193 = arith.addf %191, %192 : vector<8x32xf32>
    %194 = math.tanh %193 : vector<8x32xf32>
    %195 = arith.mulf %188, %194 : vector<8x32xf32>
    %c7_85 = arith.constant 7 : index
    %c0_86 = arith.constant 0 : index
    %c0_87 = arith.constant 0 : index
    %196 = vector.load %arg15[%c7_85, %c0_86, %c0_87] : memref<12x8x32xf32, #tpu.memory_space<vmem>>, vector<1x8x32xf32>
    %197 = vector.shape_cast %196 : vector<1x8x32xf32> to vector<8x32xf32>
    %198 = vector.shape_cast %195 : vector<8x32xf32> to vector<1x8x32xf32>
    tpu.vector_store %arg15[%c7_85, %c0_86, %c0_87], %198 {strides = array<i32>} : memref<12x8x32xf32, #tpu.memory_space<vmem>>, vector<1x8x32xf32>,
    %c0_88 = arith.constant 0 : index
    %c8 = arith.constant 8 : index
    %c0_89 = arith.constant 0 : index
    %c0_90 = arith.constant 0 : index
    %199 = vector.load %arg14[%c0_88, %c8, %c0_89, %c0_90] : memref<2x12x8x128xf32, #tpu.memory_space<vmem>>, vector<1x1x8x128xf32>
    %200 = vector.shape_cast %199 : vector<1x1x8x128xf32> to vector<8x128xf32>
    %cst_91 = arith.constant dense<0.000000e+00> : vector<8x128xf32>
    %201 = tpu.matmul %195, %20, %cst_91 {dimension_numbers = #tpu.dot_dimension_numbers<[1], [0], [0], [1], [0, 0, 1, 1], [], []>} : vector<8x32xf32>, vector<32x128xf32>, vector<8x128xf32> -> vector<8x128xf32>
    %202 = arith.addf %200, %201 : vector<8x128xf32>
    %203 = arith.negf %202 : vector<8x128xf32>
    %204 = math.exp %203 : vector<8x128xf32>
    %cst_92 = arith.constant 1.000000e+00 : f32
    %205 = vector.broadcast %cst_92 : f32 to vector<8x128xf32>
    %206 = arith.addf %205, %204 : vector<8x128xf32>
    %207 = arith.divf %205, %206 : vector<8x128xf32>
    %208 = vector.extract_strided_slice %207 {offsets = [0, 0], sizes = [8, 32], strides = [1, 1]} : vector<8x128xf32> to vector<8x32xf32>
    %209 = vector.extract_strided_slice %207 {offsets = [0, 32], sizes = [8, 32], strides = [1, 1]} : vector<8x128xf32> to vector<8x32xf32>
    %210 = vector.extract_strided_slice %207 {offsets = [0, 96], sizes = [8, 32], strides = [1, 1]} : vector<8x128xf32> to vector<8x32xf32>
    %211 = vector.extract_strided_slice %202 {offsets = [0, 64], sizes = [8, 32], strides = [1, 1]} : vector<8x128xf32> to vector<8x32xf32>
    %212 = math.tanh %211 : vector<8x32xf32>
    %213 = arith.mulf %209, %193 : vector<8x32xf32>
    %214 = arith.mulf %208, %212 : vector<8x32xf32>
    %215 = arith.addf %213, %214 : vector<8x32xf32>
    %216 = math.tanh %215 : vector<8x32xf32>
    %217 = arith.mulf %210, %216 : vector<8x32xf32>
    %c8_93 = arith.constant 8 : index
    %c0_94 = arith.constant 0 : index
    %c0_95 = arith.constant 0 : index
    %218 = vector.load %arg15[%c8_93, %c0_94, %c0_95] : memref<12x8x32xf32, #tpu.memory_space<vmem>>, vector<1x8x32xf32>
    %219 = vector.shape_cast %218 : vector<1x8x32xf32> to vector<8x32xf32>
    %220 = vector.shape_cast %217 : vector<8x32xf32> to vector<1x8x32xf32>
    tpu.vector_store %arg15[%c8_93, %c0_94, %c0_95], %220 {strides = array<i32>} : memref<12x8x32xf32, #tpu.memory_space<vmem>>, vector<1x8x32xf32>,
    %c0_96 = arith.constant 0 : index
    %c9 = arith.constant 9 : index
    %c0_97 = arith.constant 0 : index
    %c0_98 = arith.constant 0 : index
    %221 = vector.load %arg14[%c0_96, %c9, %c0_97, %c0_98] : memref<2x12x8x128xf32, #tpu.memory_space<vmem>>, vector<1x1x8x128xf32>
    %222 = vector.shape_cast %221 : vector<1x1x8x128xf32> to vector<8x128xf32>
    %cst_99 = arith.constant dense<0.000000e+00> : vector<8x128xf32>
    %223 = tpu.matmul %217, %20, %cst_99 {dimension_numbers = #tpu.dot_dimension_numbers<[1], [0], [0], [1], [0, 0, 1, 1], [], []>} : vector<8x32xf32>, vector<32x128xf32>, vector<8x128xf32> -> vector<8x128xf32>
    %224 = arith.addf %222, %223 : vector<8x128xf32>
    %225 = arith.negf %224 : vector<8x128xf32>
    %226 = math.exp %225 : vector<8x128xf32>
    %cst_100 = arith.constant 1.000000e+00 : f32
    %227 = vector.broadcast %cst_100 : f32 to vector<8x128xf32>
    %228 = arith.addf %227, %226 : vector<8x128xf32>
    %229 = arith.divf %227, %228 : vector<8x128xf32>
    %230 = vector.extract_strided_slice %229 {offsets = [0, 0], sizes = [8, 32], strides = [1, 1]} : vector<8x128xf32> to vector<8x32xf32>
    %231 = vector.extract_strided_slice %229 {offsets = [0, 32], sizes = [8, 32], strides = [1, 1]} : vector<8x128xf32> to vector<8x32xf32>
    %232 = vector.extract_strided_slice %229 {offsets = [0, 96], sizes = [8, 32], strides = [1, 1]} : vector<8x128xf32> to vector<8x32xf32>
    %233 = vector.extract_strided_slice %224 {offsets = [0, 64], sizes = [8, 32], strides = [1, 1]} : vector<8x128xf32> to vector<8x32xf32>
    %234 = math.tanh %233 : vector<8x32xf32>
    %235 = arith.mulf %231, %215 : vector<8x32xf32>
    %236 = arith.mulf %230, %234 : vector<8x32xf32>
    %237 = arith.addf %235, %236 : vector<8x32xf32>
    %238 = math.tanh %237 : vector<8x32xf32>
    %239 = arith.mulf %232, %238 : vector<8x32xf32>
    %c9_101 = arith.constant 9 : index
    %c0_102 = arith.constant 0 : index
    %c0_103 = arith.constant 0 : index
    %240 = vector.load %arg15[%c9_101, %c0_102, %c0_103] : memref<12x8x32xf32, #tpu.memory_space<vmem>>, vector<1x8x32xf32>
    %241 = vector.shape_cast %240 : vector<1x8x32xf32> to vector<8x32xf32>
    %242 = vector.shape_cast %239 : vector<8x32xf32> to vector<1x8x32xf32>
    tpu.vector_store %arg15[%c9_101, %c0_102, %c0_103], %242 {strides = array<i32>} : memref<12x8x32xf32, #tpu.memory_space<vmem>>, vector<1x8x32xf32>,
    %c0_104 = arith.constant 0 : index
    %c10 = arith.constant 10 : index
    %c0_105 = arith.constant 0 : index
    %c0_106 = arith.constant 0 : index
    %243 = vector.load %arg14[%c0_104, %c10, %c0_105, %c0_106] : memref<2x12x8x128xf32, #tpu.memory_space<vmem>>, vector<1x1x8x128xf32>
    %244 = vector.shape_cast %243 : vector<1x1x8x128xf32> to vector<8x128xf32>
    %cst_107 = arith.constant dense<0.000000e+00> : vector<8x128xf32>
    %245 = tpu.matmul %239, %20, %cst_107 {dimension_numbers = #tpu.dot_dimension_numbers<[1], [0], [0], [1], [0, 0, 1, 1], [], []>} : vector<8x32xf32>, vector<32x128xf32>, vector<8x128xf32> -> vector<8x128xf32>
    %246 = arith.addf %244, %245 : vector<8x128xf32>
    %247 = arith.negf %246 : vector<8x128xf32>
    %248 = math.exp %247 : vector<8x128xf32>
    %cst_108 = arith.constant 1.000000e+00 : f32
    %249 = vector.broadcast %cst_108 : f32 to vector<8x128xf32>
    %250 = arith.addf %249, %248 : vector<8x128xf32>
    %251 = arith.divf %249, %250 : vector<8x128xf32>
    %252 = vector.extract_strided_slice %251 {offsets = [0, 0], sizes = [8, 32], strides = [1, 1]} : vector<8x128xf32> to vector<8x32xf32>
    %253 = vector.extract_strided_slice %251 {offsets = [0, 32], sizes = [8, 32], strides = [1, 1]} : vector<8x128xf32> to vector<8x32xf32>
    %254 = vector.extract_strided_slice %251 {offsets = [0, 96], sizes = [8, 32], strides = [1, 1]} : vector<8x128xf32> to vector<8x32xf32>
    %255 = vector.extract_strided_slice %246 {offsets = [0, 64], sizes = [8, 32], strides = [1, 1]} : vector<8x128xf32> to vector<8x32xf32>
    %256 = math.tanh %255 : vector<8x32xf32>
    %257 = arith.mulf %253, %237 : vector<8x32xf32>
    %258 = arith.mulf %252, %256 : vector<8x32xf32>
    %259 = arith.addf %257, %258 : vector<8x32xf32>
    %260 = math.tanh %259 : vector<8x32xf32>
    %261 = arith.mulf %254, %260 : vector<8x32xf32>
    %c10_109 = arith.constant 10 : index
    %c0_110 = arith.constant 0 : index
    %c0_111 = arith.constant 0 : index
    %262 = vector.load %arg15[%c10_109, %c0_110, %c0_111] : memref<12x8x32xf32, #tpu.memory_space<vmem>>, vector<1x8x32xf32>
    %263 = vector.shape_cast %262 : vector<1x8x32xf32> to vector<8x32xf32>
    %264 = vector.shape_cast %261 : vector<8x32xf32> to vector<1x8x32xf32>
    tpu.vector_store %arg15[%c10_109, %c0_110, %c0_111], %264 {strides = array<i32>} : memref<12x8x32xf32, #tpu.memory_space<vmem>>, vector<1x8x32xf32>,
    %c0_112 = arith.constant 0 : index
    %c11 = arith.constant 11 : index
    %c0_113 = arith.constant 0 : index
    %c0_114 = arith.constant 0 : index
    %265 = vector.load %arg14[%c0_112, %c11, %c0_113, %c0_114] : memref<2x12x8x128xf32, #tpu.memory_space<vmem>>, vector<1x1x8x128xf32>
    %266 = vector.shape_cast %265 : vector<1x1x8x128xf32> to vector<8x128xf32>
    %cst_115 = arith.constant dense<0.000000e+00> : vector<8x128xf32>
    %267 = tpu.matmul %261, %20, %cst_115 {dimension_numbers = #tpu.dot_dimension_numbers<[1], [0], [0], [1], [0, 0, 1, 1], [], []>} : vector<8x32xf32>, vector<32x128xf32>, vector<8x128xf32> -> vector<8x128xf32>
    %268 = arith.addf %266, %267 : vector<8x128xf32>
    %269 = arith.negf %268 : vector<8x128xf32>
    %270 = math.exp %269 : vector<8x128xf32>
    %cst_116 = arith.constant 1.000000e+00 : f32
    %271 = vector.broadcast %cst_116 : f32 to vector<8x128xf32>
    %272 = arith.addf %271, %270 : vector<8x128xf32>
    %273 = arith.divf %271, %272 : vector<8x128xf32>
    %274 = vector.extract_strided_slice %273 {offsets = [0, 0], sizes = [8, 32], strides = [1, 1]} : vector<8x128xf32> to vector<8x32xf32>
    %275 = vector.extract_strided_slice %273 {offsets = [0, 32], sizes = [8, 32], strides = [1, 1]} : vector<8x128xf32> to vector<8x32xf32>
    %276 = vector.extract_strided_slice %273 {offsets = [0, 96], sizes = [8, 32], strides = [1, 1]} : vector<8x128xf32> to vector<8x32xf32>
    %277 = vector.extract_strided_slice %268 {offsets = [0, 64], sizes = [8, 32], strides = [1, 1]} : vector<8x128xf32> to vector<8x32xf32>
    %278 = math.tanh %277 : vector<8x32xf32>
    %279 = arith.mulf %275, %259 : vector<8x32xf32>
    %280 = arith.mulf %274, %278 : vector<8x32xf32>
    %281 = arith.addf %279, %280 : vector<8x32xf32>
    %282 = math.tanh %281 : vector<8x32xf32>
    %283 = arith.mulf %276, %282 : vector<8x32xf32>
    %c11_117 = arith.constant 11 : index
    %c0_118 = arith.constant 0 : index
    %c0_119 = arith.constant 0 : index
    %284 = vector.load %arg15[%c11_117, %c0_118, %c0_119] : memref<12x8x32xf32, #tpu.memory_space<vmem>>, vector<1x8x32xf32>
    %285 = vector.shape_cast %284 : vector<1x8x32xf32> to vector<8x32xf32>
    %286 = vector.shape_cast %283 : vector<8x32xf32> to vector<1x8x32xf32>
    tpu.vector_store %arg15[%c11_117, %c0_118, %c0_119], %286 {strides = array<i32>} : memref<12x8x32xf32, #tpu.memory_space<vmem>>, vector<1x8x32xf32>,
    %c0_120 = arith.constant 0 : index
    %c0_121 = arith.constant 0 : index
    %287 = vector.load %arg5[%c0_120, %c0_121] : memref<32x128xf32, #tpu.memory_space<vmem>>, vector<32x128xf32>
    %cst_122 = arith.constant 0.000000e+00 : f32
    %288 = vector.broadcast %cst_122 : f32 to vector<8x32xf32>
    %cst_123 = arith.constant 0.000000e+00 : f32
    %289 = vector.broadcast %cst_123 : f32 to vector<8x32xf32>
    %c1_124 = arith.constant 1 : index
    %c11_125 = arith.constant 11 : index
    %c0_126 = arith.constant 0 : index
    %c0_127 = arith.constant 0 : index
    %290 = vector.load %arg14[%c1_124, %c11_125, %c0_126, %c0_127] : memref<2x12x8x128xf32, #tpu.memory_space<vmem>>, vector<1x1x8x128xf32>
    %291 = vector.shape_cast %290 : vector<1x1x8x128xf32> to vector<8x128xf32>
    %cst_128 = arith.constant dense<0.000000e+00> : vector<8x128xf32>
    %292 = tpu.matmul %288, %287, %cst_128 {dimension_numbers = #tpu.dot_dimension_numbers<[1], [0], [0], [1], [0, 0, 1, 1], [], []>} : vector<8x32xf32>, vector<32x128xf32>, vector<8x128xf32> -> vector<8x128xf32>
    %293 = arith.addf %291, %292 : vector<8x128xf32>
    %294 = arith.negf %293 : vector<8x128xf32>
    %295 = math.exp %294 : vector<8x128xf32>
    %cst_129 = arith.constant 1.000000e+00 : f32
    %296 = vector.broadcast %cst_129 : f32 to vector<8x128xf32>
    %297 = arith.addf %296, %295 : vector<8x128xf32>
    %298 = arith.divf %296, %297 : vector<8x128xf32>
    %299 = vector.extract_strided_slice %298 {offsets = [0, 0], sizes = [8, 32], strides = [1, 1]} : vector<8x128xf32> to vector<8x32xf32>
    %300 = vector.extract_strided_slice %298 {offsets = [0, 32], sizes = [8, 32], strides = [1, 1]} : vector<8x128xf32> to vector<8x32xf32>
    %301 = vector.extract_strided_slice %298 {offsets = [0, 96], sizes = [8, 32], strides = [1, 1]} : vector<8x128xf32> to vector<8x32xf32>
    %302 = vector.extract_strided_slice %293 {offsets = [0, 64], sizes = [8, 32], strides = [1, 1]} : vector<8x128xf32> to vector<8x32xf32>
    %303 = math.tanh %302 : vector<8x32xf32>
    %304 = arith.mulf %300, %289 : vector<8x32xf32>
    %305 = arith.mulf %299, %303 : vector<8x32xf32>
    %306 = arith.addf %304, %305 : vector<8x32xf32>
    %307 = math.tanh %306 : vector<8x32xf32>
    %308 = arith.mulf %301, %307 : vector<8x32xf32>
    %c11_130 = arith.constant 11 : index
    %c0_131 = arith.constant 0 : index
    %c0_132 = arith.constant 0 : index
    %309 = vector.load %arg16[%c11_130, %c0_131, %c0_132] : memref<12x8x32xf32, #tpu.memory_space<vmem>>, vector<1x8x32xf32>
    %310 = vector.shape_cast %309 : vector<1x8x32xf32> to vector<8x32xf32>
    %311 = vector.shape_cast %308 : vector<8x32xf32> to vector<1x8x32xf32>
    tpu.vector_store %arg16[%c11_130, %c0_131, %c0_132], %311 {strides = array<i32>} : memref<12x8x32xf32, #tpu.memory_space<vmem>>, vector<1x8x32xf32>,
    %c1_133 = arith.constant 1 : index
    %c10_134 = arith.constant 10 : index
    %c0_135 = arith.constant 0 : index
    %c0_136 = arith.constant 0 : index
    %312 = vector.load %arg14[%c1_133, %c10_134, %c0_135, %c0_136] : memref<2x12x8x128xf32, #tpu.memory_space<vmem>>, vector<1x1x8x128xf32>
    %313 = vector.shape_cast %312 : vector<1x1x8x128xf32> to vector<8x128xf32>
    %cst_137 = arith.constant dense<0.000000e+00> : vector<8x128xf32>
    %314 = tpu.matmul %308, %287, %cst_137 {dimension_numbers = #tpu.dot_dimension_numbers<[1], [0], [0], [1], [0, 0, 1, 1], [], []>} : vector<8x32xf32>, vector<32x128xf32>, vector<8x128xf32> -> vector<8x128xf32>
    %315 = arith.addf %313, %314 : vector<8x128xf32>
    %316 = arith.negf %315 : vector<8x128xf32>
    %317 = math.exp %316 : vector<8x128xf32>
    %cst_138 = arith.constant 1.000000e+00 : f32
    %318 = vector.broadcast %cst_138 : f32 to vector<8x128xf32>
    %319 = arith.addf %318, %317 : vector<8x128xf32>
    %320 = arith.divf %318, %319 : vector<8x128xf32>
    %321 = vector.extract_strided_slice %320 {offsets = [0, 0], sizes = [8, 32], strides = [1, 1]} : vector<8x128xf32> to vector<8x32xf32>
    %322 = vector.extract_strided_slice %320 {offsets = [0, 32], sizes = [8, 32], strides = [1, 1]} : vector<8x128xf32> to vector<8x32xf32>
    %323 = vector.extract_strided_slice %320 {offsets = [0, 96], sizes = [8, 32], strides = [1, 1]} : vector<8x128xf32> to vector<8x32xf32>
    %324 = vector.extract_strided_slice %315 {offsets = [0, 64], sizes = [8, 32], strides = [1, 1]} : vector<8x128xf32> to vector<8x32xf32>
    %325 = math.tanh %324 : vector<8x32xf32>
    %326 = arith.mulf %322, %306 : vector<8x32xf32>
    %327 = arith.mulf %321, %325 : vector<8x32xf32>
    %328 = arith.addf %326, %327 : vector<8x32xf32>
    %329 = math.tanh %328 : vector<8x32xf32>
    %330 = arith.mulf %323, %329 : vector<8x32xf32>
    %c10_139 = arith.constant 10 : index
    %c0_140 = arith.constant 0 : index
    %c0_141 = arith.constant 0 : index
    %331 = vector.load %arg16[%c10_139, %c0_140, %c0_141] : memref<12x8x32xf32, #tpu.memory_space<vmem>>, vector<1x8x32xf32>
    %332 = vector.shape_cast %331 : vector<1x8x32xf32> to vector<8x32xf32>
    %333 = vector.shape_cast %330 : vector<8x32xf32> to vector<1x8x32xf32>
    tpu.vector_store %arg16[%c10_139, %c0_140, %c0_141], %333 {strides = array<i32>} : memref<12x8x32xf32, #tpu.memory_space<vmem>>, vector<1x8x32xf32>,
    %c1_142 = arith.constant 1 : index
    %c9_143 = arith.constant 9 : index
    %c0_144 = arith.constant 0 : index
    %c0_145 = arith.constant 0 : index
    %334 = vector.load %arg14[%c1_142, %c9_143, %c0_144, %c0_145] : memref<2x12x8x128xf32, #tpu.memory_space<vmem>>, vector<1x1x8x128xf32>
    %335 = vector.shape_cast %334 : vector<1x1x8x128xf32> to vector<8x128xf32>
    %cst_146 = arith.constant dense<0.000000e+00> : vector<8x128xf32>
    %336 = tpu.matmul %330, %287, %cst_146 {dimension_numbers = #tpu.dot_dimension_numbers<[1], [0], [0], [1], [0, 0, 1, 1], [], []>} : vector<8x32xf32>, vector<32x128xf32>, vector<8x128xf32> -> vector<8x128xf32>
    %337 = arith.addf %335, %336 : vector<8x128xf32>
    %338 = arith.negf %337 : vector<8x128xf32>
    %339 = math.exp %338 : vector<8x128xf32>
    %cst_147 = arith.constant 1.000000e+00 : f32
    %340 = vector.broadcast %cst_147 : f32 to vector<8x128xf32>
    %341 = arith.addf %340, %339 : vector<8x128xf32>
    %342 = arith.divf %340, %341 : vector<8x128xf32>
    %343 = vector.extract_strided_slice %342 {offsets = [0, 0], sizes = [8, 32], strides = [1, 1]} : vector<8x128xf32> to vector<8x32xf32>
    %344 = vector.extract_strided_slice %342 {offsets = [0, 32], sizes = [8, 32], strides = [1, 1]} : vector<8x128xf32> to vector<8x32xf32>
    %345 = vector.extract_strided_slice %342 {offsets = [0, 96], sizes = [8, 32], strides = [1, 1]} : vector<8x128xf32> to vector<8x32xf32>
    %346 = vector.extract_strided_slice %337 {offsets = [0, 64], sizes = [8, 32], strides = [1, 1]} : vector<8x128xf32> to vector<8x32xf32>
    %347 = math.tanh %346 : vector<8x32xf32>
    %348 = arith.mulf %344, %328 : vector<8x32xf32>
    %349 = arith.mulf %343, %347 : vector<8x32xf32>
    %350 = arith.addf %348, %349 : vector<8x32xf32>
    %351 = math.tanh %350 : vector<8x32xf32>
    %352 = arith.mulf %345, %351 : vector<8x32xf32>
    %c9_148 = arith.constant 9 : index
    %c0_149 = arith.constant 0 : index
    %c0_150 = arith.constant 0 : index
    %353 = vector.load %arg16[%c9_148, %c0_149, %c0_150] : memref<12x8x32xf32, #tpu.memory_space<vmem>>, vector<1x8x32xf32>
    %354 = vector.shape_cast %353 : vector<1x8x32xf32> to vector<8x32xf32>
    %355 = vector.shape_cast %352 : vector<8x32xf32> to vector<1x8x32xf32>
    tpu.vector_store %arg16[%c9_148, %c0_149, %c0_150], %355 {strides = array<i32>} : memref<12x8x32xf32, #tpu.memory_space<vmem>>, vector<1x8x32xf32>,
    %c1_151 = arith.constant 1 : index
    %c8_152 = arith.constant 8 : index
    %c0_153 = arith.constant 0 : index
    %c0_154 = arith.constant 0 : index
    %356 = vector.load %arg14[%c1_151, %c8_152, %c0_153, %c0_154] : memref<2x12x8x128xf32, #tpu.memory_space<vmem>>, vector<1x1x8x128xf32>
    %357 = vector.shape_cast %356 : vector<1x1x8x128xf32> to vector<8x128xf32>
    %cst_155 = arith.constant dense<0.000000e+00> : vector<8x128xf32>
    %358 = tpu.matmul %352, %287, %cst_155 {dimension_numbers = #tpu.dot_dimension_numbers<[1], [0], [0], [1], [0, 0, 1, 1], [], []>} : vector<8x32xf32>, vector<32x128xf32>, vector<8x128xf32> -> vector<8x128xf32>
    %359 = arith.addf %357, %358 : vector<8x128xf32>
    %360 = arith.negf %359 : vector<8x128xf32>
    %361 = math.exp %360 : vector<8x128xf32>
    %cst_156 = arith.constant 1.000000e+00 : f32
    %362 = vector.broadcast %cst_156 : f32 to vector<8x128xf32>
    %363 = arith.addf %362, %361 : vector<8x128xf32>
    %364 = arith.divf %362, %363 : vector<8x128xf32>
    %365 = vector.extract_strided_slice %364 {offsets = [0, 0], sizes = [8, 32], strides = [1, 1]} : vector<8x128xf32> to vector<8x32xf32>
    %366 = vector.extract_strided_slice %364 {offsets = [0, 32], sizes = [8, 32], strides = [1, 1]} : vector<8x128xf32> to vector<8x32xf32>
    %367 = vector.extract_strided_slice %364 {offsets = [0, 96], sizes = [8, 32], strides = [1, 1]} : vector<8x128xf32> to vector<8x32xf32>
    %368 = vector.extract_strided_slice %359 {offsets = [0, 64], sizes = [8, 32], strides = [1, 1]} : vector<8x128xf32> to vector<8x32xf32>
    %369 = math.tanh %368 : vector<8x32xf32>
    %370 = arith.mulf %366, %350 : vector<8x32xf32>
    %371 = arith.mulf %365, %369 : vector<8x32xf32>
    %372 = arith.addf %370, %371 : vector<8x32xf32>
    %373 = math.tanh %372 : vector<8x32xf32>
    %374 = arith.mulf %367, %373 : vector<8x32xf32>
    %c8_157 = arith.constant 8 : index
    %c0_158 = arith.constant 0 : index
    %c0_159 = arith.constant 0 : index
    %375 = vector.load %arg16[%c8_157, %c0_158, %c0_159] : memref<12x8x32xf32, #tpu.memory_space<vmem>>, vector<1x8x32xf32>
    %376 = vector.shape_cast %375 : vector<1x8x32xf32> to vector<8x32xf32>
    %377 = vector.shape_cast %374 : vector<8x32xf32> to vector<1x8x32xf32>
    tpu.vector_store %arg16[%c8_157, %c0_158, %c0_159], %377 {strides = array<i32>} : memref<12x8x32xf32, #tpu.memory_space<vmem>>, vector<1x8x32xf32>,
    %c1_160 = arith.constant 1 : index
    %c7_161 = arith.constant 7 : index
    %c0_162 = arith.constant 0 : index
    %c0_163 = arith.constant 0 : index
    %378 = vector.load %arg14[%c1_160, %c7_161, %c0_162, %c0_163] : memref<2x12x8x128xf32, #tpu.memory_space<vmem>>, vector<1x1x8x128xf32>
    %379 = vector.shape_cast %378 : vector<1x1x8x128xf32> to vector<8x128xf32>
    %cst_164 = arith.constant dense<0.000000e+00> : vector<8x128xf32>
    %380 = tpu.matmul %374, %287, %cst_164 {dimension_numbers = #tpu.dot_dimension_numbers<[1], [0], [0], [1], [0, 0, 1, 1], [], []>} : vector<8x32xf32>, vector<32x128xf32>, vector<8x128xf32> -> vector<8x128xf32>
    %381 = arith.addf %379, %380 : vector<8x128xf32>
    %382 = arith.negf %381 : vector<8x128xf32>
    %383 = math.exp %382 : vector<8x128xf32>
    %cst_165 = arith.constant 1.000000e+00 : f32
    %384 = vector.broadcast %cst_165 : f32 to vector<8x128xf32>
    %385 = arith.addf %384, %383 : vector<8x128xf32>
    %386 = arith.divf %384, %385 : vector<8x128xf32>
    %387 = vector.extract_strided_slice %386 {offsets = [0, 0], sizes = [8, 32], strides = [1, 1]} : vector<8x128xf32> to vector<8x32xf32>
    %388 = vector.extract_strided_slice %386 {offsets = [0, 32], sizes = [8, 32], strides = [1, 1]} : vector<8x128xf32> to vector<8x32xf32>
    %389 = vector.extract_strided_slice %386 {offsets = [0, 96], sizes = [8, 32], strides = [1, 1]} : vector<8x128xf32> to vector<8x32xf32>
    %390 = vector.extract_strided_slice %381 {offsets = [0, 64], sizes = [8, 32], strides = [1, 1]} : vector<8x128xf32> to vector<8x32xf32>
    %391 = math.tanh %390 : vector<8x32xf32>
    %392 = arith.mulf %388, %372 : vector<8x32xf32>
    %393 = arith.mulf %387, %391 : vector<8x32xf32>
    %394 = arith.addf %392, %393 : vector<8x32xf32>
    %395 = math.tanh %394 : vector<8x32xf32>
    %396 = arith.mulf %389, %395 : vector<8x32xf32>
    %c7_166 = arith.constant 7 : index
    %c0_167 = arith.constant 0 : index
    %c0_168 = arith.constant 0 : index
    %397 = vector.load %arg16[%c7_166, %c0_167, %c0_168] : memref<12x8x32xf32, #tpu.memory_space<vmem>>, vector<1x8x32xf32>
    %398 = vector.shape_cast %397 : vector<1x8x32xf32> to vector<8x32xf32>
    %399 = vector.shape_cast %396 : vector<8x32xf32> to vector<1x8x32xf32>
    tpu.vector_store %arg16[%c7_166, %c0_167, %c0_168], %399 {strides = array<i32>} : memref<12x8x32xf32, #tpu.memory_space<vmem>>, vector<1x8x32xf32>,
    %c1_169 = arith.constant 1 : index
    %c6_170 = arith.constant 6 : index
    %c0_171 = arith.constant 0 : index
    %c0_172 = arith.constant 0 : index
    %400 = vector.load %arg14[%c1_169, %c6_170, %c0_171, %c0_172] : memref<2x12x8x128xf32, #tpu.memory_space<vmem>>, vector<1x1x8x128xf32>
    %401 = vector.shape_cast %400 : vector<1x1x8x128xf32> to vector<8x128xf32>
    %cst_173 = arith.constant dense<0.000000e+00> : vector<8x128xf32>
    %402 = tpu.matmul %396, %287, %cst_173 {dimension_numbers = #tpu.dot_dimension_numbers<[1], [0], [0], [1], [0, 0, 1, 1], [], []>} : vector<8x32xf32>, vector<32x128xf32>, vector<8x128xf32> -> vector<8x128xf32>
    %403 = arith.addf %401, %402 : vector<8x128xf32>
    %404 = arith.negf %403 : vector<8x128xf32>
    %405 = math.exp %404 : vector<8x128xf32>
    %cst_174 = arith.constant 1.000000e+00 : f32
    %406 = vector.broadcast %cst_174 : f32 to vector<8x128xf32>
    %407 = arith.addf %406, %405 : vector<8x128xf32>
    %408 = arith.divf %406, %407 : vector<8x128xf32>
    %409 = vector.extract_strided_slice %408 {offsets = [0, 0], sizes = [8, 32], strides = [1, 1]} : vector<8x128xf32> to vector<8x32xf32>
    %410 = vector.extract_strided_slice %408 {offsets = [0, 32], sizes = [8, 32], strides = [1, 1]} : vector<8x128xf32> to vector<8x32xf32>
    %411 = vector.extract_strided_slice %408 {offsets = [0, 96], sizes = [8, 32], strides = [1, 1]} : vector<8x128xf32> to vector<8x32xf32>
    %412 = vector.extract_strided_slice %403 {offsets = [0, 64], sizes = [8, 32], strides = [1, 1]} : vector<8x128xf32> to vector<8x32xf32>
    %413 = math.tanh %412 : vector<8x32xf32>
    %414 = arith.mulf %410, %394 : vector<8x32xf32>
    %415 = arith.mulf %409, %413 : vector<8x32xf32>
    %416 = arith.addf %414, %415 : vector<8x32xf32>
    %417 = math.tanh %416 : vector<8x32xf32>
    %418 = arith.mulf %411, %417 : vector<8x32xf32>
    %c6_175 = arith.constant 6 : index
    %c0_176 = arith.constant 0 : index
    %c0_177 = arith.constant 0 : index
    %419 = vector.load %arg16[%c6_175, %c0_176, %c0_177] : memref<12x8x32xf32, #tpu.memory_space<vmem>>, vector<1x8x32xf32>
    %420 = vector.shape_cast %419 : vector<1x8x32xf32> to vector<8x32xf32>
    %421 = vector.shape_cast %418 : vector<8x32xf32> to vector<1x8x32xf32>
    tpu.vector_store %arg16[%c6_175, %c0_176, %c0_177], %421 {strides = array<i32>} : memref<12x8x32xf32, #tpu.memory_space<vmem>>, vector<1x8x32xf32>,
    %c1_178 = arith.constant 1 : index
    %c5_179 = arith.constant 5 : index
    %c0_180 = arith.constant 0 : index
    %c0_181 = arith.constant 0 : index
    %422 = vector.load %arg14[%c1_178, %c5_179, %c0_180, %c0_181] : memref<2x12x8x128xf32, #tpu.memory_space<vmem>>, vector<1x1x8x128xf32>
    %423 = vector.shape_cast %422 : vector<1x1x8x128xf32> to vector<8x128xf32>
    %cst_182 = arith.constant dense<0.000000e+00> : vector<8x128xf32>
    %424 = tpu.matmul %418, %287, %cst_182 {dimension_numbers = #tpu.dot_dimension_numbers<[1], [0], [0], [1], [0, 0, 1, 1], [], []>} : vector<8x32xf32>, vector<32x128xf32>, vector<8x128xf32> -> vector<8x128xf32>
    %425 = arith.addf %423, %424 : vector<8x128xf32>
    %426 = arith.negf %425 : vector<8x128xf32>
    %427 = math.exp %426 : vector<8x128xf32>
    %cst_183 = arith.constant 1.000000e+00 : f32
    %428 = vector.broadcast %cst_183 : f32 to vector<8x128xf32>
    %429 = arith.addf %428, %427 : vector<8x128xf32>
    %430 = arith.divf %428, %429 : vector<8x128xf32>
    %431 = vector.extract_strided_slice %430 {offsets = [0, 0], sizes = [8, 32], strides = [1, 1]} : vector<8x128xf32> to vector<8x32xf32>
    %432 = vector.extract_strided_slice %430 {offsets = [0, 32], sizes = [8, 32], strides = [1, 1]} : vector<8x128xf32> to vector<8x32xf32>
    %433 = vector.extract_strided_slice %430 {offsets = [0, 96], sizes = [8, 32], strides = [1, 1]} : vector<8x128xf32> to vector<8x32xf32>
    %434 = vector.extract_strided_slice %425 {offsets = [0, 64], sizes = [8, 32], strides = [1, 1]} : vector<8x128xf32> to vector<8x32xf32>
    %435 = math.tanh %434 : vector<8x32xf32>
    %436 = arith.mulf %432, %416 : vector<8x32xf32>
    %437 = arith.mulf %431, %435 : vector<8x32xf32>
    %438 = arith.addf %436, %437 : vector<8x32xf32>
    %439 = math.tanh %438 : vector<8x32xf32>
    %440 = arith.mulf %433, %439 : vector<8x32xf32>
    %c5_184 = arith.constant 5 : index
    %c0_185 = arith.constant 0 : index
    %c0_186 = arith.constant 0 : index
    %441 = vector.load %arg16[%c5_184, %c0_185, %c0_186] : memref<12x8x32xf32, #tpu.memory_space<vmem>>, vector<1x8x32xf32>
    %442 = vector.shape_cast %441 : vector<1x8x32xf32> to vector<8x32xf32>
    %443 = vector.shape_cast %440 : vector<8x32xf32> to vector<1x8x32xf32>
    tpu.vector_store %arg16[%c5_184, %c0_185, %c0_186], %443 {strides = array<i32>} : memref<12x8x32xf32, #tpu.memory_space<vmem>>, vector<1x8x32xf32>,
    %c1_187 = arith.constant 1 : index
    %c4_188 = arith.constant 4 : index
    %c0_189 = arith.constant 0 : index
    %c0_190 = arith.constant 0 : index
    %444 = vector.load %arg14[%c1_187, %c4_188, %c0_189, %c0_190] : memref<2x12x8x128xf32, #tpu.memory_space<vmem>>, vector<1x1x8x128xf32>
    %445 = vector.shape_cast %444 : vector<1x1x8x128xf32> to vector<8x128xf32>
    %cst_191 = arith.constant dense<0.000000e+00> : vector<8x128xf32>
    %446 = tpu.matmul %440, %287, %cst_191 {dimension_numbers = #tpu.dot_dimension_numbers<[1], [0], [0], [1], [0, 0, 1, 1], [], []>} : vector<8x32xf32>, vector<32x128xf32>, vector<8x128xf32> -> vector<8x128xf32>
    %447 = arith.addf %445, %446 : vector<8x128xf32>
    %448 = arith.negf %447 : vector<8x128xf32>
    %449 = math.exp %448 : vector<8x128xf32>
    %cst_192 = arith.constant 1.000000e+00 : f32
    %450 = vector.broadcast %cst_192 : f32 to vector<8x128xf32>
    %451 = arith.addf %450, %449 : vector<8x128xf32>
    %452 = arith.divf %450, %451 : vector<8x128xf32>
    %453 = vector.extract_strided_slice %452 {offsets = [0, 0], sizes = [8, 32], strides = [1, 1]} : vector<8x128xf32> to vector<8x32xf32>
    %454 = vector.extract_strided_slice %452 {offsets = [0, 32], sizes = [8, 32], strides = [1, 1]} : vector<8x128xf32> to vector<8x32xf32>
    %455 = vector.extract_strided_slice %452 {offsets = [0, 96], sizes = [8, 32], strides = [1, 1]} : vector<8x128xf32> to vector<8x32xf32>
    %456 = vector.extract_strided_slice %447 {offsets = [0, 64], sizes = [8, 32], strides = [1, 1]} : vector<8x128xf32> to vector<8x32xf32>
    %457 = math.tanh %456 : vector<8x32xf32>
    %458 = arith.mulf %454, %438 : vector<8x32xf32>
    %459 = arith.mulf %453, %457 : vector<8x32xf32>
    %460 = arith.addf %458, %459 : vector<8x32xf32>
    %461 = math.tanh %460 : vector<8x32xf32>
    %462 = arith.mulf %455, %461 : vector<8x32xf32>
    %c4_193 = arith.constant 4 : index
    %c0_194 = arith.constant 0 : index
    %c0_195 = arith.constant 0 : index
    %463 = vector.load %arg16[%c4_193, %c0_194, %c0_195] : memref<12x8x32xf32, #tpu.memory_space<vmem>>, vector<1x8x32xf32>
    %464 = vector.shape_cast %463 : vector<1x8x32xf32> to vector<8x32xf32>
    %465 = vector.shape_cast %462 : vector<8x32xf32> to vector<1x8x32xf32>
    tpu.vector_store %arg16[%c4_193, %c0_194, %c0_195], %465 {strides = array<i32>} : memref<12x8x32xf32, #tpu.memory_space<vmem>>, vector<1x8x32xf32>,
    %c1_196 = arith.constant 1 : index
    %c3_197 = arith.constant 3 : index
    %c0_198 = arith.constant 0 : index
    %c0_199 = arith.constant 0 : index
    %466 = vector.load %arg14[%c1_196, %c3_197, %c0_198, %c0_199] : memref<2x12x8x128xf32, #tpu.memory_space<vmem>>, vector<1x1x8x128xf32>
    %467 = vector.shape_cast %466 : vector<1x1x8x128xf32> to vector<8x128xf32>
    %cst_200 = arith.constant dense<0.000000e+00> : vector<8x128xf32>
    %468 = tpu.matmul %462, %287, %cst_200 {dimension_numbers = #tpu.dot_dimension_numbers<[1], [0], [0], [1], [0, 0, 1, 1], [], []>} : vector<8x32xf32>, vector<32x128xf32>, vector<8x128xf32> -> vector<8x128xf32>
    %469 = arith.addf %467, %468 : vector<8x128xf32>
    %470 = arith.negf %469 : vector<8x128xf32>
    %471 = math.exp %470 : vector<8x128xf32>
    %cst_201 = arith.constant 1.000000e+00 : f32
    %472 = vector.broadcast %cst_201 : f32 to vector<8x128xf32>
    %473 = arith.addf %472, %471 : vector<8x128xf32>
    %474 = arith.divf %472, %473 : vector<8x128xf32>
    %475 = vector.extract_strided_slice %474 {offsets = [0, 0], sizes = [8, 32], strides = [1, 1]} : vector<8x128xf32> to vector<8x32xf32>
    %476 = vector.extract_strided_slice %474 {offsets = [0, 32], sizes = [8, 32], strides = [1, 1]} : vector<8x128xf32> to vector<8x32xf32>
    %477 = vector.extract_strided_slice %474 {offsets = [0, 96], sizes = [8, 32], strides = [1, 1]} : vector<8x128xf32> to vector<8x32xf32>
    %478 = vector.extract_strided_slice %469 {offsets = [0, 64], sizes = [8, 32], strides = [1, 1]} : vector<8x128xf32> to vector<8x32xf32>
    %479 = math.tanh %478 : vector<8x32xf32>
    %480 = arith.mulf %476, %460 : vector<8x32xf32>
    %481 = arith.mulf %475, %479 : vector<8x32xf32>
    %482 = arith.addf %480, %481 : vector<8x32xf32>
    %483 = math.tanh %482 : vector<8x32xf32>
    %484 = arith.mulf %477, %483 : vector<8x32xf32>
    %c3_202 = arith.constant 3 : index
    %c0_203 = arith.constant 0 : index
    %c0_204 = arith.constant 0 : index
    %485 = vector.load %arg16[%c3_202, %c0_203, %c0_204] : memref<12x8x32xf32, #tpu.memory_space<vmem>>, vector<1x8x32xf32>
    %486 = vector.shape_cast %485 : vector<1x8x32xf32> to vector<8x32xf32>
    %487 = vector.shape_cast %484 : vector<8x32xf32> to vector<1x8x32xf32>
    tpu.vector_store %arg16[%c3_202, %c0_203, %c0_204], %487 {strides = array<i32>} : memref<12x8x32xf32, #tpu.memory_space<vmem>>, vector<1x8x32xf32>,
    %c1_205 = arith.constant 1 : index
    %c2_206 = arith.constant 2 : index
    %c0_207 = arith.constant 0 : index
    %c0_208 = arith.constant 0 : index
    %488 = vector.load %arg14[%c1_205, %c2_206, %c0_207, %c0_208] : memref<2x12x8x128xf32, #tpu.memory_space<vmem>>, vector<1x1x8x128xf32>
    %489 = vector.shape_cast %488 : vector<1x1x8x128xf32> to vector<8x128xf32>
    %cst_209 = arith.constant dense<0.000000e+00> : vector<8x128xf32>
    %490 = tpu.matmul %484, %287, %cst_209 {dimension_numbers = #tpu.dot_dimension_numbers<[1], [0], [0], [1], [0, 0, 1, 1], [], []>} : vector<8x32xf32>, vector<32x128xf32>, vector<8x128xf32> -> vector<8x128xf32>
    %491 = arith.addf %489, %490 : vector<8x128xf32>
    %492 = arith.negf %491 : vector<8x128xf32>
    %493 = math.exp %492 : vector<8x128xf32>
    %cst_210 = arith.constant 1.000000e+00 : f32
    %494 = vector.broadcast %cst_210 : f32 to vector<8x128xf32>
    %495 = arith.addf %494, %493 : vector<8x128xf32>
    %496 = arith.divf %494, %495 : vector<8x128xf32>
    %497 = vector.extract_strided_slice %496 {offsets = [0, 0], sizes = [8, 32], strides = [1, 1]} : vector<8x128xf32> to vector<8x32xf32>
    %498 = vector.extract_strided_slice %496 {offsets = [0, 32], sizes = [8, 32], strides = [1, 1]} : vector<8x128xf32> to vector<8x32xf32>
    %499 = vector.extract_strided_slice %496 {offsets = [0, 96], sizes = [8, 32], strides = [1, 1]} : vector<8x128xf32> to vector<8x32xf32>
    %500 = vector.extract_strided_slice %491 {offsets = [0, 64], sizes = [8, 32], strides = [1, 1]} : vector<8x128xf32> to vector<8x32xf32>
    %501 = math.tanh %500 : vector<8x32xf32>
    %502 = arith.mulf %498, %482 : vector<8x32xf32>
    %503 = arith.mulf %497, %501 : vector<8x32xf32>
    %504 = arith.addf %502, %503 : vector<8x32xf32>
    %505 = math.tanh %504 : vector<8x32xf32>
    %506 = arith.mulf %499, %505 : vector<8x32xf32>
    %c2_211 = arith.constant 2 : index
    %c0_212 = arith.constant 0 : index
    %c0_213 = arith.constant 0 : index
    %507 = vector.load %arg16[%c2_211, %c0_212, %c0_213] : memref<12x8x32xf32, #tpu.memory_space<vmem>>, vector<1x8x32xf32>
    %508 = vector.shape_cast %507 : vector<1x8x32xf32> to vector<8x32xf32>
    %509 = vector.shape_cast %506 : vector<8x32xf32> to vector<1x8x32xf32>
    tpu.vector_store %arg16[%c2_211, %c0_212, %c0_213], %509 {strides = array<i32>} : memref<12x8x32xf32, #tpu.memory_space<vmem>>, vector<1x8x32xf32>,
    %c1_214 = arith.constant 1 : index
    %c1_215 = arith.constant 1 : index
    %c0_216 = arith.constant 0 : index
    %c0_217 = arith.constant 0 : index
    %510 = vector.load %arg14[%c1_214, %c1_215, %c0_216, %c0_217] : memref<2x12x8x128xf32, #tpu.memory_space<vmem>>, vector<1x1x8x128xf32>
    %511 = vector.shape_cast %510 : vector<1x1x8x128xf32> to vector<8x128xf32>
    %cst_218 = arith.constant dense<0.000000e+00> : vector<8x128xf32>
    %512 = tpu.matmul %506, %287, %cst_218 {dimension_numbers = #tpu.dot_dimension_numbers<[1], [0], [0], [1], [0, 0, 1, 1], [], []>} : vector<8x32xf32>, vector<32x128xf32>, vector<8x128xf32> -> vector<8x128xf32>
    %513 = arith.addf %511, %512 : vector<8x128xf32>
    %514 = arith.negf %513 : vector<8x128xf32>
    %515 = math.exp %514 : vector<8x128xf32>
    %cst_219 = arith.constant 1.000000e+00 : f32
    %516 = vector.broadcast %cst_219 : f32 to vector<8x128xf32>
    %517 = arith.addf %516, %515 : vector<8x128xf32>
    %518 = arith.divf %516, %517 : vector<8x128xf32>
    %519 = vector.extract_strided_slice %518 {offsets = [0, 0], sizes = [8, 32], strides = [1, 1]} : vector<8x128xf32> to vector<8x32xf32>
    %520 = vector.extract_strided_slice %518 {offsets = [0, 32], sizes = [8, 32], strides = [1, 1]} : vector<8x128xf32> to vector<8x32xf32>
    %521 = vector.extract_strided_slice %518 {offsets = [0, 96], sizes = [8, 32], strides = [1, 1]} : vector<8x128xf32> to vector<8x32xf32>
    %522 = vector.extract_strided_slice %513 {offsets = [0, 64], sizes = [8, 32], strides = [1, 1]} : vector<8x128xf32> to vector<8x32xf32>
    %523 = math.tanh %522 : vector<8x32xf32>
    %524 = arith.mulf %520, %504 : vector<8x32xf32>
    %525 = arith.mulf %519, %523 : vector<8x32xf32>
    %526 = arith.addf %524, %525 : vector<8x32xf32>
    %527 = math.tanh %526 : vector<8x32xf32>
    %528 = arith.mulf %521, %527 : vector<8x32xf32>
    %c1_220 = arith.constant 1 : index
    %c0_221 = arith.constant 0 : index
    %c0_222 = arith.constant 0 : index
    %529 = vector.load %arg16[%c1_220, %c0_221, %c0_222] : memref<12x8x32xf32, #tpu.memory_space<vmem>>, vector<1x8x32xf32>
    %530 = vector.shape_cast %529 : vector<1x8x32xf32> to vector<8x32xf32>
    %531 = vector.shape_cast %528 : vector<8x32xf32> to vector<1x8x32xf32>
    tpu.vector_store %arg16[%c1_220, %c0_221, %c0_222], %531 {strides = array<i32>} : memref<12x8x32xf32, #tpu.memory_space<vmem>>, vector<1x8x32xf32>,
    %c1_223 = arith.constant 1 : index
    %c0_224 = arith.constant 0 : index
    %c0_225 = arith.constant 0 : index
    %c0_226 = arith.constant 0 : index
    %532 = vector.load %arg14[%c1_223, %c0_224, %c0_225, %c0_226] : memref<2x12x8x128xf32, #tpu.memory_space<vmem>>, vector<1x1x8x128xf32>
    %533 = vector.shape_cast %532 : vector<1x1x8x128xf32> to vector<8x128xf32>
    %cst_227 = arith.constant dense<0.000000e+00> : vector<8x128xf32>
    %534 = tpu.matmul %528, %287, %cst_227 {dimension_numbers = #tpu.dot_dimension_numbers<[1], [0], [0], [1], [0, 0, 1, 1], [], []>} : vector<8x32xf32>, vector<32x128xf32>, vector<8x128xf32> -> vector<8x128xf32>
    %535 = arith.addf %533, %534 : vector<8x128xf32>
    %536 = arith.negf %535 : vector<8x128xf32>
    %537 = math.exp %536 : vector<8x128xf32>
    %cst_228 = arith.constant 1.000000e+00 : f32
    %538 = vector.broadcast %cst_228 : f32 to vector<8x128xf32>
    %539 = arith.addf %538, %537 : vector<8x128xf32>
    %540 = arith.divf %538, %539 : vector<8x128xf32>
    %541 = vector.extract_strided_slice %540 {offsets = [0, 0], sizes = [8, 32], strides = [1, 1]} : vector<8x128xf32> to vector<8x32xf32>
    %542 = vector.extract_strided_slice %540 {offsets = [0, 32], sizes = [8, 32], strides = [1, 1]} : vector<8x128xf32> to vector<8x32xf32>
    %543 = vector.extract_strided_slice %540 {offsets = [0, 96], sizes = [8, 32], strides = [1, 1]} : vector<8x128xf32> to vector<8x32xf32>
    %544 = vector.extract_strided_slice %535 {offsets = [0, 64], sizes = [8, 32], strides = [1, 1]} : vector<8x128xf32> to vector<8x32xf32>
    %545 = math.tanh %544 : vector<8x32xf32>
    %546 = arith.mulf %542, %526 : vector<8x32xf32>
    %547 = arith.mulf %541, %545 : vector<8x32xf32>
    %548 = arith.addf %546, %547 : vector<8x32xf32>
    %549 = math.tanh %548 : vector<8x32xf32>
    %550 = arith.mulf %543, %549 : vector<8x32xf32>
    %c0_229 = arith.constant 0 : index
    %c0_230 = arith.constant 0 : index
    %c0_231 = arith.constant 0 : index
    %551 = vector.load %arg16[%c0_229, %c0_230, %c0_231] : memref<12x8x32xf32, #tpu.memory_space<vmem>>, vector<1x8x32xf32>
    %552 = vector.shape_cast %551 : vector<1x8x32xf32> to vector<8x32xf32>
    %553 = vector.shape_cast %550 : vector<8x32xf32> to vector<1x8x32xf32>
    tpu.vector_store %arg16[%c0_229, %c0_230, %c0_231], %553 {strides = array<i32>} : memref<12x8x32xf32, #tpu.memory_space<vmem>>, vector<1x8x32xf32>,
    %c0_232 = arith.constant 0 : index
    %c0_233 = arith.constant 0 : index
    %c0_234 = arith.constant 0 : index
    %554 = vector.load %arg15[%c0_232, %c0_233, %c0_234] : memref<12x8x32xf32, #tpu.memory_space<vmem>>, vector<12x8x32xf32>
    %555 = vector.shape_cast %554 : vector<12x8x32xf32> to vector<96x32xf32>
    %c0_235 = arith.constant 0 : index
    %c0_236 = arith.constant 0 : index
    %c0_237 = arith.constant 0 : index
    %556 = vector.load %arg16[%c0_235, %c0_236, %c0_237] : memref<12x8x32xf32, #tpu.memory_space<vmem>>, vector<12x8x32xf32>
    %557 = vector.shape_cast %556 : vector<12x8x32xf32> to vector<96x32xf32>
    %c0_238 = arith.constant 0 : index
    %c0_239 = arith.constant 0 : index
    %558 = vector.load %arg10[%c0_238, %c0_239] : memref<64x128xf32, #tpu.memory_space<vmem>>, vector<32x128xf32>
    %cst_240 = arith.constant dense<0.000000e+00> : vector<96x128xf32>
    %559 = tpu.matmul %555, %558, %cst_240 {dimension_numbers = #tpu.dot_dimension_numbers<[1], [0], [0], [1], [0, 0, 1, 1], [], []>} : vector<96x32xf32>, vector<32x128xf32>, vector<96x128xf32> -> vector<96x128xf32>
    %c32 = arith.constant 32 : index
    %c0_241 = arith.constant 0 : index
    %560 = vector.load %arg10[%c32, %c0_241] : memref<64x128xf32, #tpu.memory_space<vmem>>, vector<32x128xf32>
    %cst_242 = arith.constant dense<0.000000e+00> : vector<96x128xf32>
    %561 = tpu.matmul %557, %560, %cst_242 {dimension_numbers = #tpu.dot_dimension_numbers<[1], [0], [0], [1], [0, 0, 1, 1], [], []>} : vector<96x32xf32>, vector<32x128xf32>, vector<96x128xf32> -> vector<96x128xf32>
    %562 = arith.addf %559, %561 : vector<96x128xf32>
    %c0_243 = arith.constant 0 : index
    %c0_244 = arith.constant 0 : index
    %563 = vector.load %arg12[%c0_243, %c0_244] : memref<1x128xf32, #tpu.memory_space<vmem>>, vector<1x128xf32>
    %564 = vector.broadcast %563 : vector<1x128xf32> to vector<96x128xf32>
    %565 = arith.addf %562, %564 : vector<96x128xf32>
    %566 = vector.shape_cast %565 : vector<96x128xf32> to vector<12x8x128xf32>
    %c1_245 = arith.constant 1 : index
    %c0_246 = arith.constant 0 : index
    %c0_247 = arith.constant 0 : index
    %c0_248 = arith.constant 0 : index
    %567 = vector.load %arg14[%c1_245, %c0_246, %c0_247, %c0_248] : memref<2x12x8x128xf32, #tpu.memory_space<vmem>>, vector<1x12x8x128xf32>
    %568 = vector.shape_cast %567 : vector<1x12x8x128xf32> to vector<12x8x128xf32>
    %569 = vector.shape_cast %566 : vector<12x8x128xf32> to vector<1x12x8x128xf32>
    tpu.vector_store %arg14[%c1_245, %c0_246, %c0_247, %c0_248], %569 {strides = array<i32>} : memref<2x12x8x128xf32, #tpu.memory_space<vmem>>, vector<1x12x8x128xf32>,
    %c0_249 = arith.constant 0 : index
    %c0_250 = arith.constant 0 : index
    %570 = vector.load %arg11[%c0_249, %c0_250] : memref<32x128xf32, #tpu.memory_space<vmem>>, vector<32x128xf32>
    %cst_251 = arith.constant 0.000000e+00 : f32
    %571 = vector.broadcast %cst_251 : f32 to vector<8x32xf32>
    %cst_252 = arith.constant 0.000000e+00 : f32
    %572 = vector.broadcast %cst_252 : f32 to vector<8x32xf32>
    %c1_253 = arith.constant 1 : index
    %c11_254 = arith.constant 11 : index
    %c0_255 = arith.constant 0 : index
    %c0_256 = arith.constant 0 : index
    %573 = vector.load %arg14[%c1_253, %c11_254, %c0_255, %c0_256] : memref<2x12x8x128xf32, #tpu.memory_space<vmem>>, vector<1x1x8x128xf32>
    %574 = vector.shape_cast %573 : vector<1x1x8x128xf32> to vector<8x128xf32>
    %cst_257 = arith.constant dense<0.000000e+00> : vector<8x128xf32>
    %575 = tpu.matmul %571, %570, %cst_257 {dimension_numbers = #tpu.dot_dimension_numbers<[1], [0], [0], [1], [0, 0, 1, 1], [], []>} : vector<8x32xf32>, vector<32x128xf32>, vector<8x128xf32> -> vector<8x128xf32>
    %576 = arith.addf %574, %575 : vector<8x128xf32>
    %577 = arith.negf %576 : vector<8x128xf32>
    %578 = math.exp %577 : vector<8x128xf32>
    %cst_258 = arith.constant 1.000000e+00 : f32
    %579 = vector.broadcast %cst_258 : f32 to vector<8x128xf32>
    %580 = arith.addf %579, %578 : vector<8x128xf32>
    %581 = arith.divf %579, %580 : vector<8x128xf32>
    %582 = vector.extract_strided_slice %581 {offsets = [0, 0], sizes = [8, 32], strides = [1, 1]} : vector<8x128xf32> to vector<8x32xf32>
    %583 = vector.extract_strided_slice %581 {offsets = [0, 32], sizes = [8, 32], strides = [1, 1]} : vector<8x128xf32> to vector<8x32xf32>
    %584 = vector.extract_strided_slice %581 {offsets = [0, 96], sizes = [8, 32], strides = [1, 1]} : vector<8x128xf32> to vector<8x32xf32>
    %585 = vector.extract_strided_slice %576 {offsets = [0, 64], sizes = [8, 32], strides = [1, 1]} : vector<8x128xf32> to vector<8x32xf32>
    %586 = math.tanh %585 : vector<8x32xf32>
    %587 = arith.mulf %583, %572 : vector<8x32xf32>
    %588 = arith.mulf %582, %586 : vector<8x32xf32>
    %589 = arith.addf %587, %588 : vector<8x32xf32>
    %590 = math.tanh %589 : vector<8x32xf32>
    %591 = arith.mulf %584, %590 : vector<8x32xf32>
    %c1_259 = arith.constant 1 : index
    %c10_260 = arith.constant 10 : index
    %c0_261 = arith.constant 0 : index
    %c0_262 = arith.constant 0 : index
    %592 = vector.load %arg14[%c1_259, %c10_260, %c0_261, %c0_262] : memref<2x12x8x128xf32, #tpu.memory_space<vmem>>, vector<1x1x8x128xf32>
    %593 = vector.shape_cast %592 : vector<1x1x8x128xf32> to vector<8x128xf32>
    %cst_263 = arith.constant dense<0.000000e+00> : vector<8x128xf32>
    %594 = tpu.matmul %591, %570, %cst_263 {dimension_numbers = #tpu.dot_dimension_numbers<[1], [0], [0], [1], [0, 0, 1, 1], [], []>} : vector<8x32xf32>, vector<32x128xf32>, vector<8x128xf32> -> vector<8x128xf32>
    %595 = arith.addf %593, %594 : vector<8x128xf32>
    %596 = arith.negf %595 : vector<8x128xf32>
    %597 = math.exp %596 : vector<8x128xf32>
    %cst_264 = arith.constant 1.000000e+00 : f32
    %598 = vector.broadcast %cst_264 : f32 to vector<8x128xf32>
    %599 = arith.addf %598, %597 : vector<8x128xf32>
    %600 = arith.divf %598, %599 : vector<8x128xf32>
    %601 = vector.extract_strided_slice %600 {offsets = [0, 0], sizes = [8, 32], strides = [1, 1]} : vector<8x128xf32> to vector<8x32xf32>
    %602 = vector.extract_strided_slice %600 {offsets = [0, 32], sizes = [8, 32], strides = [1, 1]} : vector<8x128xf32> to vector<8x32xf32>
    %603 = vector.extract_strided_slice %600 {offsets = [0, 96], sizes = [8, 32], strides = [1, 1]} : vector<8x128xf32> to vector<8x32xf32>
    %604 = vector.extract_strided_slice %595 {offsets = [0, 64], sizes = [8, 32], strides = [1, 1]} : vector<8x128xf32> to vector<8x32xf32>
    %605 = math.tanh %604 : vector<8x32xf32>
    %606 = arith.mulf %602, %589 : vector<8x32xf32>
    %607 = arith.mulf %601, %605 : vector<8x32xf32>
    %608 = arith.addf %606, %607 : vector<8x32xf32>
    %609 = math.tanh %608 : vector<8x32xf32>
    %610 = arith.mulf %603, %609 : vector<8x32xf32>
    %c1_265 = arith.constant 1 : index
    %c9_266 = arith.constant 9 : index
    %c0_267 = arith.constant 0 : index
    %c0_268 = arith.constant 0 : index
    %611 = vector.load %arg14[%c1_265, %c9_266, %c0_267, %c0_268] : memref<2x12x8x128xf32, #tpu.memory_space<vmem>>, vector<1x1x8x128xf32>
    %612 = vector.shape_cast %611 : vector<1x1x8x128xf32> to vector<8x128xf32>
    %cst_269 = arith.constant dense<0.000000e+00> : vector<8x128xf32>
    %613 = tpu.matmul %610, %570, %cst_269 {dimension_numbers = #tpu.dot_dimension_numbers<[1], [0], [0], [1], [0, 0, 1, 1], [], []>} : vector<8x32xf32>, vector<32x128xf32>, vector<8x128xf32> -> vector<8x128xf32>
    %614 = arith.addf %612, %613 : vector<8x128xf32>
    %615 = arith.negf %614 : vector<8x128xf32>
    %616 = math.exp %615 : vector<8x128xf32>
    %cst_270 = arith.constant 1.000000e+00 : f32
    %617 = vector.broadcast %cst_270 : f32 to vector<8x128xf32>
    %618 = arith.addf %617, %616 : vector<8x128xf32>
    %619 = arith.divf %617, %618 : vector<8x128xf32>
    %620 = vector.extract_strided_slice %619 {offsets = [0, 0], sizes = [8, 32], strides = [1, 1]} : vector<8x128xf32> to vector<8x32xf32>
    %621 = vector.extract_strided_slice %619 {offsets = [0, 32], sizes = [8, 32], strides = [1, 1]} : vector<8x128xf32> to vector<8x32xf32>
    %622 = vector.extract_strided_slice %619 {offsets = [0, 96], sizes = [8, 32], strides = [1, 1]} : vector<8x128xf32> to vector<8x32xf32>
    %623 = vector.extract_strided_slice %614 {offsets = [0, 64], sizes = [8, 32], strides = [1, 1]} : vector<8x128xf32> to vector<8x32xf32>
    %624 = math.tanh %623 : vector<8x32xf32>
    %625 = arith.mulf %621, %608 : vector<8x32xf32>
    %626 = arith.mulf %620, %624 : vector<8x32xf32>
    %627 = arith.addf %625, %626 : vector<8x32xf32>
    %628 = math.tanh %627 : vector<8x32xf32>
    %629 = arith.mulf %622, %628 : vector<8x32xf32>
    %c1_271 = arith.constant 1 : index
    %c8_272 = arith.constant 8 : index
    %c0_273 = arith.constant 0 : index
    %c0_274 = arith.constant 0 : index
    %630 = vector.load %arg14[%c1_271, %c8_272, %c0_273, %c0_274] : memref<2x12x8x128xf32, #tpu.memory_space<vmem>>, vector<1x1x8x128xf32>
    %631 = vector.shape_cast %630 : vector<1x1x8x128xf32> to vector<8x128xf32>
    %cst_275 = arith.constant dense<0.000000e+00> : vector<8x128xf32>
    %632 = tpu.matmul %629, %570, %cst_275 {dimension_numbers = #tpu.dot_dimension_numbers<[1], [0], [0], [1], [0, 0, 1, 1], [], []>} : vector<8x32xf32>, vector<32x128xf32>, vector<8x128xf32> -> vector<8x128xf32>
    %633 = arith.addf %631, %632 : vector<8x128xf32>
    %634 = arith.negf %633 : vector<8x128xf32>
    %635 = math.exp %634 : vector<8x128xf32>
    %cst_276 = arith.constant 1.000000e+00 : f32
    %636 = vector.broadcast %cst_276 : f32 to vector<8x128xf32>
    %637 = arith.addf %636, %635 : vector<8x128xf32>
    %638 = arith.divf %636, %637 : vector<8x128xf32>
    %639 = vector.extract_strided_slice %638 {offsets = [0, 0], sizes = [8, 32], strides = [1, 1]} : vector<8x128xf32> to vector<8x32xf32>
    %640 = vector.extract_strided_slice %638 {offsets = [0, 32], sizes = [8, 32], strides = [1, 1]} : vector<8x128xf32> to vector<8x32xf32>
    %641 = vector.extract_strided_slice %638 {offsets = [0, 96], sizes = [8, 32], strides = [1, 1]} : vector<8x128xf32> to vector<8x32xf32>
    %642 = vector.extract_strided_slice %633 {offsets = [0, 64], sizes = [8, 32], strides = [1, 1]} : vector<8x128xf32> to vector<8x32xf32>
    %643 = math.tanh %642 : vector<8x32xf32>
    %644 = arith.mulf %640, %627 : vector<8x32xf32>
    %645 = arith.mulf %639, %643 : vector<8x32xf32>
    %646 = arith.addf %644, %645 : vector<8x32xf32>
    %647 = math.tanh %646 : vector<8x32xf32>
    %648 = arith.mulf %641, %647 : vector<8x32xf32>
    %c1_277 = arith.constant 1 : index
    %c7_278 = arith.constant 7 : index
    %c0_279 = arith.constant 0 : index
    %c0_280 = arith.constant 0 : index
    %649 = vector.load %arg14[%c1_277, %c7_278, %c0_279, %c0_280] : memref<2x12x8x128xf32, #tpu.memory_space<vmem>>, vector<1x1x8x128xf32>
    %650 = vector.shape_cast %649 : vector<1x1x8x128xf32> to vector<8x128xf32>
    %cst_281 = arith.constant dense<0.000000e+00> : vector<8x128xf32>
    %651 = tpu.matmul %648, %570, %cst_281 {dimension_numbers = #tpu.dot_dimension_numbers<[1], [0], [0], [1], [0, 0, 1, 1], [], []>} : vector<8x32xf32>, vector<32x128xf32>, vector<8x128xf32> -> vector<8x128xf32>
    %652 = arith.addf %650, %651 : vector<8x128xf32>
    %653 = arith.negf %652 : vector<8x128xf32>
    %654 = math.exp %653 : vector<8x128xf32>
    %cst_282 = arith.constant 1.000000e+00 : f32
    %655 = vector.broadcast %cst_282 : f32 to vector<8x128xf32>
    %656 = arith.addf %655, %654 : vector<8x128xf32>
    %657 = arith.divf %655, %656 : vector<8x128xf32>
    %658 = vector.extract_strided_slice %657 {offsets = [0, 0], sizes = [8, 32], strides = [1, 1]} : vector<8x128xf32> to vector<8x32xf32>
    %659 = vector.extract_strided_slice %657 {offsets = [0, 32], sizes = [8, 32], strides = [1, 1]} : vector<8x128xf32> to vector<8x32xf32>
    %660 = vector.extract_strided_slice %657 {offsets = [0, 96], sizes = [8, 32], strides = [1, 1]} : vector<8x128xf32> to vector<8x32xf32>
    %661 = vector.extract_strided_slice %652 {offsets = [0, 64], sizes = [8, 32], strides = [1, 1]} : vector<8x128xf32> to vector<8x32xf32>
    %662 = math.tanh %661 : vector<8x32xf32>
    %663 = arith.mulf %659, %646 : vector<8x32xf32>
    %664 = arith.mulf %658, %662 : vector<8x32xf32>
    %665 = arith.addf %663, %664 : vector<8x32xf32>
    %666 = math.tanh %665 : vector<8x32xf32>
    %667 = arith.mulf %660, %666 : vector<8x32xf32>
    %c1_283 = arith.constant 1 : index
    %c6_284 = arith.constant 6 : index
    %c0_285 = arith.constant 0 : index
    %c0_286 = arith.constant 0 : index
    %668 = vector.load %arg14[%c1_283, %c6_284, %c0_285, %c0_286] : memref<2x12x8x128xf32, #tpu.memory_space<vmem>>, vector<1x1x8x128xf32>
    %669 = vector.shape_cast %668 : vector<1x1x8x128xf32> to vector<8x128xf32>
    %cst_287 = arith.constant dense<0.000000e+00> : vector<8x128xf32>
    %670 = tpu.matmul %667, %570, %cst_287 {dimension_numbers = #tpu.dot_dimension_numbers<[1], [0], [0], [1], [0, 0, 1, 1], [], []>} : vector<8x32xf32>, vector<32x128xf32>, vector<8x128xf32> -> vector<8x128xf32>
    %671 = arith.addf %669, %670 : vector<8x128xf32>
    %672 = arith.negf %671 : vector<8x128xf32>
    %673 = math.exp %672 : vector<8x128xf32>
    %cst_288 = arith.constant 1.000000e+00 : f32
    %674 = vector.broadcast %cst_288 : f32 to vector<8x128xf32>
    %675 = arith.addf %674, %673 : vector<8x128xf32>
    %676 = arith.divf %674, %675 : vector<8x128xf32>
    %677 = vector.extract_strided_slice %676 {offsets = [0, 0], sizes = [8, 32], strides = [1, 1]} : vector<8x128xf32> to vector<8x32xf32>
    %678 = vector.extract_strided_slice %676 {offsets = [0, 32], sizes = [8, 32], strides = [1, 1]} : vector<8x128xf32> to vector<8x32xf32>
    %679 = vector.extract_strided_slice %676 {offsets = [0, 96], sizes = [8, 32], strides = [1, 1]} : vector<8x128xf32> to vector<8x32xf32>
    %680 = vector.extract_strided_slice %671 {offsets = [0, 64], sizes = [8, 32], strides = [1, 1]} : vector<8x128xf32> to vector<8x32xf32>
    %681 = math.tanh %680 : vector<8x32xf32>
    %682 = arith.mulf %678, %665 : vector<8x32xf32>
    %683 = arith.mulf %677, %681 : vector<8x32xf32>
    %684 = arith.addf %682, %683 : vector<8x32xf32>
    %685 = math.tanh %684 : vector<8x32xf32>
    %686 = arith.mulf %679, %685 : vector<8x32xf32>
    %c1_289 = arith.constant 1 : index
    %c5_290 = arith.constant 5 : index
    %c0_291 = arith.constant 0 : index
    %c0_292 = arith.constant 0 : index
    %687 = vector.load %arg14[%c1_289, %c5_290, %c0_291, %c0_292] : memref<2x12x8x128xf32, #tpu.memory_space<vmem>>, vector<1x1x8x128xf32>
    %688 = vector.shape_cast %687 : vector<1x1x8x128xf32> to vector<8x128xf32>
    %cst_293 = arith.constant dense<0.000000e+00> : vector<8x128xf32>
    %689 = tpu.matmul %686, %570, %cst_293 {dimension_numbers = #tpu.dot_dimension_numbers<[1], [0], [0], [1], [0, 0, 1, 1], [], []>} : vector<8x32xf32>, vector<32x128xf32>, vector<8x128xf32> -> vector<8x128xf32>
    %690 = arith.addf %688, %689 : vector<8x128xf32>
    %691 = arith.negf %690 : vector<8x128xf32>
    %692 = math.exp %691 : vector<8x128xf32>
    %cst_294 = arith.constant 1.000000e+00 : f32
    %693 = vector.broadcast %cst_294 : f32 to vector<8x128xf32>
    %694 = arith.addf %693, %692 : vector<8x128xf32>
    %695 = arith.divf %693, %694 : vector<8x128xf32>
    %696 = vector.extract_strided_slice %695 {offsets = [0, 0], sizes = [8, 32], strides = [1, 1]} : vector<8x128xf32> to vector<8x32xf32>
    %697 = vector.extract_strided_slice %695 {offsets = [0, 32], sizes = [8, 32], strides = [1, 1]} : vector<8x128xf32> to vector<8x32xf32>
    %698 = vector.extract_strided_slice %695 {offsets = [0, 96], sizes = [8, 32], strides = [1, 1]} : vector<8x128xf32> to vector<8x32xf32>
    %699 = vector.extract_strided_slice %690 {offsets = [0, 64], sizes = [8, 32], strides = [1, 1]} : vector<8x128xf32> to vector<8x32xf32>
    %700 = math.tanh %699 : vector<8x32xf32>
    %701 = arith.mulf %697, %684 : vector<8x32xf32>
    %702 = arith.mulf %696, %700 : vector<8x32xf32>
    %703 = arith.addf %701, %702 : vector<8x32xf32>
    %704 = math.tanh %703 : vector<8x32xf32>
    %705 = arith.mulf %698, %704 : vector<8x32xf32>
    %c1_295 = arith.constant 1 : index
    %c4_296 = arith.constant 4 : index
    %c0_297 = arith.constant 0 : index
    %c0_298 = arith.constant 0 : index
    %706 = vector.load %arg14[%c1_295, %c4_296, %c0_297, %c0_298] : memref<2x12x8x128xf32, #tpu.memory_space<vmem>>, vector<1x1x8x128xf32>
    %707 = vector.shape_cast %706 : vector<1x1x8x128xf32> to vector<8x128xf32>
    %cst_299 = arith.constant dense<0.000000e+00> : vector<8x128xf32>
    %708 = tpu.matmul %705, %570, %cst_299 {dimension_numbers = #tpu.dot_dimension_numbers<[1], [0], [0], [1], [0, 0, 1, 1], [], []>} : vector<8x32xf32>, vector<32x128xf32>, vector<8x128xf32> -> vector<8x128xf32>
    %709 = arith.addf %707, %708 : vector<8x128xf32>
    %710 = arith.negf %709 : vector<8x128xf32>
    %711 = math.exp %710 : vector<8x128xf32>
    %cst_300 = arith.constant 1.000000e+00 : f32
    %712 = vector.broadcast %cst_300 : f32 to vector<8x128xf32>
    %713 = arith.addf %712, %711 : vector<8x128xf32>
    %714 = arith.divf %712, %713 : vector<8x128xf32>
    %715 = vector.extract_strided_slice %714 {offsets = [0, 0], sizes = [8, 32], strides = [1, 1]} : vector<8x128xf32> to vector<8x32xf32>
    %716 = vector.extract_strided_slice %714 {offsets = [0, 32], sizes = [8, 32], strides = [1, 1]} : vector<8x128xf32> to vector<8x32xf32>
    %717 = vector.extract_strided_slice %714 {offsets = [0, 96], sizes = [8, 32], strides = [1, 1]} : vector<8x128xf32> to vector<8x32xf32>
    %718 = vector.extract_strided_slice %709 {offsets = [0, 64], sizes = [8, 32], strides = [1, 1]} : vector<8x128xf32> to vector<8x32xf32>
    %719 = math.tanh %718 : vector<8x32xf32>
    %720 = arith.mulf %716, %703 : vector<8x32xf32>
    %721 = arith.mulf %715, %719 : vector<8x32xf32>
    %722 = arith.addf %720, %721 : vector<8x32xf32>
    %723 = math.tanh %722 : vector<8x32xf32>
    %724 = arith.mulf %717, %723 : vector<8x32xf32>
    %c1_301 = arith.constant 1 : index
    %c3_302 = arith.constant 3 : index
    %c0_303 = arith.constant 0 : index
    %c0_304 = arith.constant 0 : index
    %725 = vector.load %arg14[%c1_301, %c3_302, %c0_303, %c0_304] : memref<2x12x8x128xf32, #tpu.memory_space<vmem>>, vector<1x1x8x128xf32>
    %726 = vector.shape_cast %725 : vector<1x1x8x128xf32> to vector<8x128xf32>
    %cst_305 = arith.constant dense<0.000000e+00> : vector<8x128xf32>
    %727 = tpu.matmul %724, %570, %cst_305 {dimension_numbers = #tpu.dot_dimension_numbers<[1], [0], [0], [1], [0, 0, 1, 1], [], []>} : vector<8x32xf32>, vector<32x128xf32>, vector<8x128xf32> -> vector<8x128xf32>
    %728 = arith.addf %726, %727 : vector<8x128xf32>
    %729 = arith.negf %728 : vector<8x128xf32>
    %730 = math.exp %729 : vector<8x128xf32>
    %cst_306 = arith.constant 1.000000e+00 : f32
    %731 = vector.broadcast %cst_306 : f32 to vector<8x128xf32>
    %732 = arith.addf %731, %730 : vector<8x128xf32>
    %733 = arith.divf %731, %732 : vector<8x128xf32>
    %734 = vector.extract_strided_slice %733 {offsets = [0, 0], sizes = [8, 32], strides = [1, 1]} : vector<8x128xf32> to vector<8x32xf32>
    %735 = vector.extract_strided_slice %733 {offsets = [0, 32], sizes = [8, 32], strides = [1, 1]} : vector<8x128xf32> to vector<8x32xf32>
    %736 = vector.extract_strided_slice %733 {offsets = [0, 96], sizes = [8, 32], strides = [1, 1]} : vector<8x128xf32> to vector<8x32xf32>
    %737 = vector.extract_strided_slice %728 {offsets = [0, 64], sizes = [8, 32], strides = [1, 1]} : vector<8x128xf32> to vector<8x32xf32>
    %738 = math.tanh %737 : vector<8x32xf32>
    %739 = arith.mulf %735, %722 : vector<8x32xf32>
    %740 = arith.mulf %734, %738 : vector<8x32xf32>
    %741 = arith.addf %739, %740 : vector<8x32xf32>
    %742 = math.tanh %741 : vector<8x32xf32>
    %743 = arith.mulf %736, %742 : vector<8x32xf32>
    %c1_307 = arith.constant 1 : index
    %c2_308 = arith.constant 2 : index
    %c0_309 = arith.constant 0 : index
    %c0_310 = arith.constant 0 : index
    %744 = vector.load %arg14[%c1_307, %c2_308, %c0_309, %c0_310] : memref<2x12x8x128xf32, #tpu.memory_space<vmem>>, vector<1x1x8x128xf32>
    %745 = vector.shape_cast %744 : vector<1x1x8x128xf32> to vector<8x128xf32>
    %cst_311 = arith.constant dense<0.000000e+00> : vector<8x128xf32>
    %746 = tpu.matmul %743, %570, %cst_311 {dimension_numbers = #tpu.dot_dimension_numbers<[1], [0], [0], [1], [0, 0, 1, 1], [], []>} : vector<8x32xf32>, vector<32x128xf32>, vector<8x128xf32> -> vector<8x128xf32>
    %747 = arith.addf %745, %746 : vector<8x128xf32>
    %748 = arith.negf %747 : vector<8x128xf32>
    %749 = math.exp %748 : vector<8x128xf32>
    %cst_312 = arith.constant 1.000000e+00 : f32
    %750 = vector.broadcast %cst_312 : f32 to vector<8x128xf32>
    %751 = arith.addf %750, %749 : vector<8x128xf32>
    %752 = arith.divf %750, %751 : vector<8x128xf32>
    %753 = vector.extract_strided_slice %752 {offsets = [0, 0], sizes = [8, 32], strides = [1, 1]} : vector<8x128xf32> to vector<8x32xf32>
    %754 = vector.extract_strided_slice %752 {offsets = [0, 32], sizes = [8, 32], strides = [1, 1]} : vector<8x128xf32> to vector<8x32xf32>
    %755 = vector.extract_strided_slice %752 {offsets = [0, 96], sizes = [8, 32], strides = [1, 1]} : vector<8x128xf32> to vector<8x32xf32>
    %756 = vector.extract_strided_slice %747 {offsets = [0, 64], sizes = [8, 32], strides = [1, 1]} : vector<8x128xf32> to vector<8x32xf32>
    %757 = math.tanh %756 : vector<8x32xf32>
    %758 = arith.mulf %754, %741 : vector<8x32xf32>
    %759 = arith.mulf %753, %757 : vector<8x32xf32>
    %760 = arith.addf %758, %759 : vector<8x32xf32>
    %761 = math.tanh %760 : vector<8x32xf32>
    %762 = arith.mulf %755, %761 : vector<8x32xf32>
    %c1_313 = arith.constant 1 : index
    %c1_314 = arith.constant 1 : index
    %c0_315 = arith.constant 0 : index
    %c0_316 = arith.constant 0 : index
    %763 = vector.load %arg14[%c1_313, %c1_314, %c0_315, %c0_316] : memref<2x12x8x128xf32, #tpu.memory_space<vmem>>, vector<1x1x8x128xf32>
    %764 = vector.shape_cast %763 : vector<1x1x8x128xf32> to vector<8x128xf32>
    %cst_317 = arith.constant dense<0.000000e+00> : vector<8x128xf32>
    %765 = tpu.matmul %762, %570, %cst_317 {dimension_numbers = #tpu.dot_dimension_numbers<[1], [0], [0], [1], [0, 0, 1, 1], [], []>} : vector<8x32xf32>, vector<32x128xf32>, vector<8x128xf32> -> vector<8x128xf32>
    %766 = arith.addf %764, %765 : vector<8x128xf32>
    %767 = arith.negf %766 : vector<8x128xf32>
    %768 = math.exp %767 : vector<8x128xf32>
    %cst_318 = arith.constant 1.000000e+00 : f32
    %769 = vector.broadcast %cst_318 : f32 to vector<8x128xf32>
    %770 = arith.addf %769, %768 : vector<8x128xf32>
    %771 = arith.divf %769, %770 : vector<8x128xf32>
    %772 = vector.extract_strided_slice %771 {offsets = [0, 0], sizes = [8, 32], strides = [1, 1]} : vector<8x128xf32> to vector<8x32xf32>
    %773 = vector.extract_strided_slice %771 {offsets = [0, 32], sizes = [8, 32], strides = [1, 1]} : vector<8x128xf32> to vector<8x32xf32>
    %774 = vector.extract_strided_slice %771 {offsets = [0, 96], sizes = [8, 32], strides = [1, 1]} : vector<8x128xf32> to vector<8x32xf32>
    %775 = vector.extract_strided_slice %766 {offsets = [0, 64], sizes = [8, 32], strides = [1, 1]} : vector<8x128xf32> to vector<8x32xf32>
    %776 = math.tanh %775 : vector<8x32xf32>
    %777 = arith.mulf %773, %760 : vector<8x32xf32>
    %778 = arith.mulf %772, %776 : vector<8x32xf32>
    %779 = arith.addf %777, %778 : vector<8x32xf32>
    %780 = math.tanh %779 : vector<8x32xf32>
    %781 = arith.mulf %774, %780 : vector<8x32xf32>
    %c1_319 = arith.constant 1 : index
    %c0_320 = arith.constant 0 : index
    %c0_321 = arith.constant 0 : index
    %c0_322 = arith.constant 0 : index
    %782 = vector.load %arg14[%c1_319, %c0_320, %c0_321, %c0_322] : memref<2x12x8x128xf32, #tpu.memory_space<vmem>>, vector<1x1x8x128xf32>
    %783 = vector.shape_cast %782 : vector<1x1x8x128xf32> to vector<8x128xf32>
    %cst_323 = arith.constant dense<0.000000e+00> : vector<8x128xf32>
    %784 = tpu.matmul %781, %570, %cst_323 {dimension_numbers = #tpu.dot_dimension_numbers<[1], [0], [0], [1], [0, 0, 1, 1], [], []>} : vector<8x32xf32>, vector<32x128xf32>, vector<8x128xf32> -> vector<8x128xf32>
    %785 = arith.addf %783, %784 : vector<8x128xf32>
    %786 = arith.negf %785 : vector<8x128xf32>
    %787 = math.exp %786 : vector<8x128xf32>
    %cst_324 = arith.constant 1.000000e+00 : f32
    %788 = vector.broadcast %cst_324 : f32 to vector<8x128xf32>
    %789 = arith.addf %788, %787 : vector<8x128xf32>
    %790 = arith.divf %788, %789 : vector<8x128xf32>
    %791 = vector.extract_strided_slice %790 {offsets = [0, 0], sizes = [8, 32], strides = [1, 1]} : vector<8x128xf32> to vector<8x32xf32>
    %792 = vector.extract_strided_slice %790 {offsets = [0, 32], sizes = [8, 32], strides = [1, 1]} : vector<8x128xf32> to vector<8x32xf32>
    %793 = vector.extract_strided_slice %790 {offsets = [0, 96], sizes = [8, 32], strides = [1, 1]} : vector<8x128xf32> to vector<8x32xf32>
    %794 = vector.extract_strided_slice %785 {offsets = [0, 64], sizes = [8, 32], strides = [1, 1]} : vector<8x128xf32> to vector<8x32xf32>
    %795 = math.tanh %794 : vector<8x32xf32>
    %796 = arith.mulf %792, %779 : vector<8x32xf32>
    %797 = arith.mulf %791, %795 : vector<8x32xf32>
    %798 = arith.addf %796, %797 : vector<8x32xf32>
    %799 = math.tanh %798 : vector<8x32xf32>
    %800 = arith.mulf %793, %799 : vector<8x32xf32>
    %c0_325 = arith.constant 0 : index
    %c0_326 = arith.constant 0 : index
    %801 = vector.load %arg13[%c0_325, %c0_326] : memref<8x32xf32, #tpu.memory_space<vmem>>, vector<8x32xf32>
    tpu.vector_store %arg13[%c0_325, %c0_326], %800 {strides = array<i32>} : memref<8x32xf32, #tpu.memory_space<vmem>>, vector<8x32xf32>,
    return
  }
}

</mosaic_0001>

<bundles_post_ra>
// kernel: tpu_custom_call.1
= control target key start
LH: loop header
LB: loop body
LE: loop exit
PB: predicated region body
PF: predicated region fallthrough
CT: control target
= control target key end

     0   :  { %18 = vsyncpa [#allocation6], 0  ;;  %s7198_s0 = inlined_call_operand.hbm [shape: f32[12,8,32], index: 0, kind: input, shape index: {}]   ;;  %s7199_s1 = inlined_call_operand.hbm [shape: f32[32,128], index: 1, kind: input, shape index: {}]   ;;  %s7200_s2 = inlined_call_operand.hbm [shape: f32[32,128], index: 2, kind: input, shape index: {}]   ;;  %s7201_s3 = inlined_call_operand.vmem [shape: f32[1,128], index: 3, kind: input, shape index: {}]   ;;  %s7202_s4 = inlined_call_operand.hbm [shape: f32[32,128], index: 4, kind: input, shape index: {}]   ;;  %s7203_s5 = inlined_call_operand.hbm [shape: f32[32,128], index: 5, kind: input, shape index: {}]   ;;  %s7204_s6 = inlined_call_operand.vmem [shape: f32[1,128], index: 6, kind: input, shape index: {}]   ;;  %s7205_s7 = inlined_call_operand.hbm [shape: f32[64,128], index: 7, kind: input, shape index: {}]   ;;  %s7206_s8 = inlined_call_operand.hbm [shape: f32[32,128], index: 8, kind: input, shape index: {}]   ;;  %s7207_s9 = inlined_call_operand.vmem [shape: f32[1,128], index: 9, kind: input, shape index: {}]   ;;  %s7208_s10 = inlined_call_operand.hbm [shape: f32[64,128], index: 10, kind: input, shape index: {}]   ;;  %s7209_s11 = inlined_call_operand.vmem [shape: f32[32,128], index: 11, kind: input, shape index: {}]   ;;  %s7210_s12 = inlined_call_operand.vmem [shape: f32[1,128], index: 12, kind: input, shape index: {}]   ;;  %s7211_s13 = inlined_call_operand.hbm [shape: f32[8,32], index: 13, kind: output, shape index: {}]  }
   0x1   :  { %19 = vsyncpa [#allocation9], 0 }
   0x2   :  { %20 = vsyncpa [#allocation12], 0 }
   0x3   :  { %21 = vsyncpa [#allocation15], 0 }
   0x4   :  { %22 = vsyncpa [#allocation18], 0 }
   0x5   :  { %23 = vsyncpa [#allocation7], 0  ;;  %s6281_s25 = smov [#allocation8]   ;;  %s6282_s26 = smov [#allocation11]  }
   0x6   :  { %s41_s9 = sshll.u32 %s6281_s25, 4  ;;  %s67_s27 = sshll.u32 %s6282_s26, 4  ;;  %s42_s9 = int_to_ptr.vmem [resolvable:$true] %s41_s9  ;;  %s6367_s27 = int_to_ptr.vmem [resolvable:$true] %s67_s27 }
   0x7   :  { %s6071_s30 = scalar_lea.hbm %s7199_s1, 512 }
   0x8   :  { %p6072_p0 = scmp.ne.s32.totalorder %s7199_s1, %s6071_s30  ;;  %p6075_p1 = scmp.lt.u32.totalorder %s6071_s30, %s7199_s1 }
   0xa   :  { %p6077_p2 = pnand %p6075_p1, %p6072_p0 }
   0xc   :  { %6080 = shalt.err (!%p6077_p2)
}
   0xd   :  { %s6081_s18 = scalar_lea.vmem %s42_s9, 512  ;;  %p6086_p4 = scmp.lt.s32.totalorder %s42_s9, %s42_s9 }
   0xe   :  { %p6082_p3 = scmp.ne.s32.totalorder %s42_s9, %s6081_s18  ;;  %p6087_p5 = scmp.lt.s32.totalorder %s6081_s18, %s6081_s18 }
  0x10   :  { %p6088_p6 = por %p6087_p5, %p6086_p4 }
  0x12   :  { %p6089_p7 = pnand %p6088_p6, %p6082_p3 }
  0x14   :  { %6092 = shalt.err (!%p6089_p7)
}
  0x15   :  { %s6283_s19 = smov 128   ;;  %s6284_s20 = smov 8  }
  0x16   :  { %47 = dma.hbm_to_vmem [thread:$0]  %s7199_s1, 512, %s42_s9, [#allocation9], %s6283_s19, %s6283_s19, %s6284_s20  }
  0x17   :  { %s6093_s25 = scalar_lea.hbm %s7202_s4, 512 }
  0x18   :  { %p6094_p8 = scmp.ne.s32.totalorder %s7202_s4, %s6093_s25  ;;  %p6097_p9 = scmp.lt.u32.totalorder %s6093_s25, %s7202_s4 }
  0x1a   :  { %p6099_p10 = pnand %p6097_p9, %p6094_p8 }
  0x1c   :  { %6102 = shalt.err (!%p6099_p10)
}
  0x1d   :  { %s6103_s14 = scalar_lea.vmem %s6367_s27, 512  ;;  %p6108_p12 = scmp.lt.s32.totalorder %s6367_s27, %s6367_s27 }
  0x1e   :  { %p6104_p11 = scmp.ne.s32.totalorder %s6367_s27, %s6103_s14  ;;  %p6109_p13 = scmp.lt.s32.totalorder %s6103_s14, %s6103_s14 }
  0x20   :  { %p6110_p0 = por %p6109_p13, %p6108_p12 }
  0x22   :  { %p6111_p1 = pnand %p6110_p0, %p6104_p11 }
  0x24   :  { %6114 = shalt.err (!%p6111_p1)
}
  0x25   :  { %73 = dma.hbm_to_vmem [thread:$0]  %s7202_s4, 512, %s6367_s27, [#allocation12], %s6283_s19, %s6283_s19, %s6284_s20  }
  0x26   :  { %s6285_s15 = smov [#allocation14]   ;;  %s6286_s17 = smov [#allocation5]  }
  0x27   :  { %s93_s16 = sshll.u32 %s6285_s15, 4  ;;  %s29_s18 = sshll.u32 %s6286_s17, 4  ;;  %s94_s16 = int_to_ptr.vmem [resolvable:$true] %s93_s16  ;;  %s6404_s18 = int_to_ptr.vmem [resolvable:$true] %s29_s18 }
  0x28   :  { %s6115_s23 = scalar_lea.hbm %s7205_s7, 1024 }
  0x29   :  { %p6116_p2 = scmp.ne.s32.totalorder %s7205_s7, %s6115_s23  ;;  %p6119_p3 = scmp.lt.u32.totalorder %s6115_s23, %s7205_s7 }
  0x2b   :  { %p6121_p4 = pnand %p6119_p3, %p6116_p2 }
  0x2d   :  { %6124 = shalt.err (!%p6121_p4)
}
  0x2e   :  { %s6125_s4 = scalar_lea.vmem %s94_s16, 1024  ;;  %p6130_p6 = scmp.lt.s32.totalorder %s94_s16, %s94_s16 }
  0x2f   :  { %p6126_p5 = scmp.ne.s32.totalorder %s94_s16, %s6125_s4  ;;  %p6131_p7 = scmp.lt.s32.totalorder %s6125_s4, %s6125_s4 }
  0x31   :  { %p6132_p8 = por %p6131_p7, %p6130_p6 }
  0x33   :  { %p6133_p9 = pnand %p6132_p8, %p6126_p5 }
  0x35   :  { %6136 = shalt.err (!%p6133_p9)
}
  0x36   :  { %99 = dma.hbm_to_vmem [thread:$0]  %s7205_s7, 1024, %s94_s16, [#allocation15], %s6283_s19, %s6283_s19, %s6284_s20  }
  0x37   :  { %s6137_s1 = scalar_lea.hbm %s7198_s0, 1536 }
  0x38   :  { %p6138_p10 = scmp.ne.s32.totalorder %s7198_s0, %s6137_s1  ;;  %p6141_p11 = scmp.lt.u32.totalorder %s6137_s1, %s7198_s0 }
  0x3a   :  { %p6143_p12 = pnand %p6141_p11, %p6138_p10 }
  0x3c   :  { %6146 = shalt.err (!%p6143_p12)
}
  0x3d   :  { %s6147_s22 = scalar_lea.vmem %s6404_s18, 1536  ;;  %p6152_p0 = scmp.lt.s32.totalorder %s6404_s18, %s6404_s18 }
  0x3e   :  { %p6148_p13 = scmp.ne.s32.totalorder %s6404_s18, %s6147_s22  ;;  %p6153_p1 = scmp.lt.s32.totalorder %s6147_s22, %s6147_s22 }
  0x40   :  { %p6154_p2 = por %p6153_p1, %p6152_p0 }
  0x42   :  { %p6155_p3 = pnand %p6154_p2, %p6148_p13 }
  0x44   :  { %6158 = shalt.err (!%p6155_p3)
}
  0x45   :  { %35 = dma.hbm_to_vmem [thread:$0]  %s7198_s0, 1536, %s6404_s18, [#allocation6], %s6283_s19, %s6283_s19, %s6284_s20  }
  0x46   :  { %s6287_s23 = smov [#allocation10]   ;;  %s6288_s25 = smov [#allocation13]  }
  0x47   :  { %s53_s24 = sshll.u32 %s6287_s23, 4  ;;  %s79_s26 = sshll.u32 %s6288_s25, 4  ;;  %s54_s24 = int_to_ptr.vmem [resolvable:$true] %s53_s24  ;;  %s6441_s26 = int_to_ptr.vmem [resolvable:$true] %s79_s26 }
  0x48   :  { %s6159_s27 = scalar_lea.hbm %s7200_s2, 512 }
  0x49   :  { %p6160_p4 = scmp.ne.s32.totalorder %s7200_s2, %s6159_s27  ;;  %p6163_p5 = scmp.lt.u32.totalorder %s6159_s27, %s7200_s2 }
  0x4b   :  { %p6165_p6 = pnand %p6163_p5, %p6160_p4 }
  0x4d   :  { %6168 = shalt.err (!%p6165_p6)
}
  0x4e   :  { %s6169_s0 = scalar_lea.vmem %s54_s24, 512  ;;  %p6174_p8 = scmp.lt.s32.totalorder %s54_s24, %s54_s24 }
  0x4f   :  { %p6170_p7 = scmp.ne.s32.totalorder %s54_s24, %s6169_s0  ;;  %p6175_p9 = scmp.lt.s32.totalorder %s6169_s0, %s6169_s0 }
  0x51   :  { %p6176_p10 = por %p6175_p9, %p6174_p8 }
  0x53   :  { %p6177_p11 = pnand %p6176_p10, %p6170_p7 }
  0x55   :  { %6180 = shalt.err (!%p6177_p11)
}
  0x56   :  { %59 = dma.hbm_to_vmem [thread:$0]  %s7200_s2, 512, %s54_s24, [#allocation9], %s6283_s19, %s6283_s19, %s6284_s20  }
  0x57   :  { %s6181_s21 = scalar_lea.hbm %s7203_s5, 512 }
  0x58   :  { %p6182_p12 = scmp.ne.s32.totalorder %s7203_s5, %s6181_s21  ;;  %p6185_p13 = scmp.lt.u32.totalorder %s6181_s21, %s7203_s5 }
  0x5a   :  { %p6187_p0 = pnand %p6185_p13, %p6182_p12 }
  0x5c   :  { %6190 = shalt.err (!%p6187_p0)
}
  0x5d   :  { %s6191_s25 = scalar_lea.vmem %s6441_s26, 512  ;;  %p6196_p2 = scmp.lt.s32.totalorder %s6441_s26, %s6441_s26 }
  0x5e   :  { %p6192_p1 = scmp.ne.s32.totalorder %s6441_s26, %s6191_s25  ;;  %p6197_p3 = scmp.lt.s32.totalorder %s6191_s25, %s6191_s25 }
  0x60   :  { %p6198_p4 = por %p6197_p3, %p6196_p2 }
  0x62   :  { %p6199_p5 = pnand %p6198_p4, %p6192_p1 }
  0x64   :  { %6202 = shalt.err (!%p6199_p5)
}
  0x65   :  { %85 = dma.hbm_to_vmem [thread:$0]  %s7203_s5, 512, %s6441_s26, [#allocation12], %s6283_s19, %s6283_s19, %s6284_s20  }
  0x66   :  { %s6289_s28 = smov [#allocation16]   ;;  %s6290_s27 = smov [#allocation17]  }
  0x67   :  { %s105_s4 = sshll.u32 %s6289_s28, 4  ;;  %s119_s29 = sshll.u32 %s6290_s27, 4  ;;  %s106_s4 = int_to_ptr.vmem [resolvable:$true] %s105_s4  ;;  %s6478_s29 = int_to_ptr.vmem [resolvable:$true] %s119_s29 }
  0x68   :  { %s6203_s1 = scalar_lea.hbm %s7206_s8, 512 }
  0x69   :  { %p6204_p6 = scmp.ne.s32.totalorder %s7206_s8, %s6203_s1  ;;  %p6207_p7 = scmp.lt.u32.totalorder %s6203_s1, %s7206_s8 }
  0x6b   :  { %p6209_p8 = pnand %p6207_p7, %p6204_p6 }
  0x6d   :  { %6212 = shalt.err (!%p6209_p8)
}
  0x6e   :  { %s6213_s5 = scalar_lea.vmem %s106_s4, 512  ;;  %p6218_p10 = scmp.lt.s32.totalorder %s106_s4, %s106_s4 }
  0x6f   :  { %p6214_p9 = scmp.ne.s32.totalorder %s106_s4, %s6213_s5  ;;  %p6219_p11 = scmp.lt.s32.totalorder %s6213_s5, %s6213_s5 }
  0x71   :  { %p6220_p12 = por %p6219_p11, %p6218_p10 }
  0x73   :  { %p6221_p13 = pnand %p6220_p12, %p6214_p9 }
  0x75   :  { %6224 = shalt.err (!%p6221_p13)
}
  0x76   :  { %111 = dma.hbm_to_vmem [thread:$0]  %s7206_s8, 512, %s106_s4, [#allocation15], %s6283_s19, %s6283_s19, %s6284_s20  }
  0x77   :  { %s6225_s7 = scalar_lea.hbm %s7208_s10, 1024 }
  0x78   :  { %p6226_p0 = scmp.ne.s32.totalorder %s7208_s10, %s6225_s7  ;;  %p6229_p1 = scmp.lt.u32.totalorder %s6225_s7, %s7208_s10 }
  0x7a   :  { %p6231_p2 = pnand %p6229_p1, %p6226_p0 }
  0x7c   :  { %6234 = shalt.err (!%p6231_p2)
}
  0x7d   :  { %s6235_s24 = scalar_lea.vmem %s6478_s29, 1024  ;;  %p6240_p4 = scmp.lt.s32.totalorder %s6478_s29, %s6478_s29 }
  0x7e   :  { %p6236_p3 = scmp.ne.s32.totalorder %s6478_s29, %s6235_s24  ;;  %p6241_p5 = scmp.lt.s32.totalorder %s6235_s24, %s6235_s24 }
  0x80   :  { %p6242_p6 = por %p6241_p5, %p6240_p4 }
  0x82   :  { %p6243_p7 = pnand %p6242_p6, %p6236_p3 }
  0x84   :  { %6246 = shalt.err (!%p6243_p7)
}
  0x85   :  { %125 = dma.hbm_to_vmem [thread:$0]  %s7208_s10, 1024, %s6478_s29, [#allocation18], %s6283_s19, %s6283_s19, %s6284_s20  }
  0x86   :  { %6269 = dma.done.wait [#allocation6], 1536  }
  0x87   :  { %6270 = vsyncadd [#allocation6], 4294965760 }
  0x88   :  { %6271 = dma.done.wait [#allocation9], 1024  }
  0x89   :  { %6272 = vsyncadd [#allocation9], 4294966272 }
  0x8a   :  { %6273 = dma.done.wait [#allocation12], 1024  }
  0x8b   :  { %6274 = vsyncadd [#allocation12], 4294966272 }
  0x8c   :  { %6275 = dma.done.wait [#allocation15], 1536  }
  0x8d   :  { %6276 = vsyncadd [#allocation15], 4294965760 }
  0x8e   :  { %6277 = dma.done.wait [#allocation18], 1024  }
  0x8f   :  { %6278 = vsyncadd [#allocation18], 4294966272  ;;  %vm177_vm0 = vcmask 261120   ;;  %v166_v0 = vld [vmem:[#allocation8] sm:$0xff]  ;;  %v167_v1 = vld [vmem:[#allocation8 + $0x8] sm:$0xff]  ;;  %v6291_v11 = vmov 0.0|0.0  }
  0x90   :  { %v168_v2 = vld [vmem:[#allocation8 + $0x10] sm:$0xff]  ;;  %v5507_v3 = vpack.c.bf16 %v167_v1, %v166_v0  ;;  %v169_v4 = vld [vmem:[#allocation8 + $0x18] sm:$0xff]  ;;  %v154_v5 = vld [vmem:[#allocation5] sm:$0xff]  ;;  %vm6292_vm1 = vmmov 0   ;;  %v6293_v25 = vmov 0.0   ;;  %s6295_s20 = smov 32  }
  0x91   :  { %v5511_v6 = vpack.c.bf16 %v169_v4, %v168_v2  ;;  %5015 = vmatprep.mubr.msk.f32.mxu0 %vm177_vm0, %v154_v5  ;;  %5041 = vmatprep.mubr.msk.f32.mxu1 %vm177_vm0, %v154_v5  ;;  %v500_v7 = vld [vmem:[#allocation10] sm:$0xff]  ;;  %v501_v8 = vld [vmem:[#allocation10 + $0x8] sm:$0xff]  ;;  %v6522_v12 = vld [vmem:[#allocation5 + $0x10] sm:$0xff] }
  0x92   :  { %5508 = vmatprep.subr.bf16.mxu0 %v5507_v3  ;;  %v6517_v9 = vld [vmem:[#allocation5 + $0x8] sm:$0xff]  ;;  %v6519_v10 = vpack.c.bf16 %v501_v8, %v500_v7  ;;  %v502_v13 = vld [vmem:[#allocation10 + $0x10] sm:$0xff]  ;;  %v503_v14 = vld [vmem:[#allocation10 + $0x18] sm:$0xff] }
  0x93   :  { %5510 = vmatpush3.bf16.msra.mxu0 %v5507_v3  ;;  %v6529_v15 = vld [vmem:[#allocation5 + $0x18] sm:$0xff]  ;;  %v6531_v16 = vpack.c.bf16 %v503_v14, %v502_v13  ;;  %v6533_v17 = vld [vmem:[#allocation5 + $0x20] sm:$0xff]  ;;  %v6540_v18 = vld [vmem:[#allocation5 + $0x28] sm:$0xff] }
  0x94   :  { %5512 = vmatprep.subr.bf16.mxu0 %v5511_v6  ;;  %v6543_v19 = vld [vmem:[#allocation5 + $0x30] sm:$0xff]  ;;  %v6550_v20 = vld [vmem:[#allocation5 + $0x38] sm:$0xff]  ;;  %v6552_v21 = vld [vmem:[#allocation5 + $0x40] sm:$0xff] }
  0x95   :  { %v6558_v22 = vld [vmem:[#allocation5 + $0x48] sm:$0xff]  ;;  %v6560_v23 = vld [vmem:[#allocation5 + $0x50] sm:$0xff]  ;;  %v6566_v24 = vld [vmem:[#allocation5 + $0x58] sm:$0xff] }
  0x96   :  { %v4643_v26 = vld [vmem:[%s7201_s3] ss:$0 sm:$0xff]  ;;  %s6294_s3 = smov 64   ;;  %v352_v1 = vld [vmem:[#allocation11 + $0x8] sm:$0xff]  ;;  %v353_v2 = vld [vmem:[#allocation11 + $0x10] sm:$0xff] }
  0x97   :  { %5514 = vmatpush3.bf16.msra.mxu0 %v5511_v6  ;;  %v351_v0 = vld [vmem:[#allocation11] sm:$0xff]  ;;  %v354_v4 = vld [vmem:[#allocation11 + $0x18] sm:$0xff] }
  0x98   :  { %5523 = vmatprep.subr.bf16.mxu0 %v6291_v11  ;;  %v5515_v3 = vpack.c.bf16 %v352_v1, %v351_v0  ;;  %v5519_v5 = vpack.c.bf16 %v354_v4, %v353_v2 }
  0x9a   :  { %5016 = vmatmul.mubr.msk.f32.vlgmr.msra.gmra.mrb[0].mxu0 %vm177_vm0, %v6517_v9  ;;  %5516 = vmatprep.subr.bf16.mxu1 %v5515_v3 }
  0x9b   :  { %5525 = vmatpush3.bf16.msra.mxu0 %v6519_v10  ;;  %5018 = vmatprep.mubr.msk.f32.mxu0 %vm177_vm0, %v6522_v12 }
  0x9c   :  { %5526 = vmatprep.subr.bf16.mxu0 %v6291_v11  ;;  %5518 = vmatpush3.bf16.msra.mxu1 %v5515_v3 }
  0x9d   :  { %5520 = vmatprep.subr.bf16.mxu1 %v5519_v5 }
  0x9e   :  { %5019 = vmatmul.mubr.msk.f32.gmra.mrb[2].mxu0 %vm177_vm0, %v6529_v15 }
  0x9f   :  { %5021 = vmatprep.mubr.msk.f32.mxu0 %vm177_vm0, %v6533_v17  ;;  %5528 = vmatpush3.bf16.msra.mxu0 %v6531_v16 }
  0xa0   :  { %5535 = vmatprep.subr.bf16.mxu0 %v6291_v11  ;;  %5522 = vmatpush3.bf16.msra.mxu1 %v5519_v5 }
  0xa1   :  { %5529 = vmatprep.subr.bf16.mxu1 %v6291_v11 }
  0xa2   :  { %5022 = vmatmul.mubr.msk.f32.gmra.mrb[4].mxu0 %vm177_vm0, %v6540_v18 }
  0xa3   :  { %5024 = vmatprep.mubr.msk.f32.mxu0 %vm177_vm0, %v6543_v19  ;;  %5042 = vmatmul.mubr.msk.f32.vlgmr.msra.gmra.mrb[0].mxu1 %vm177_vm0, %v6517_v9  ;;  %v6643_v9 = vld [vmem:[%s7204_s6] ss:$0 sm:$0xff] }
  0xa4   :  { %5531 = vmatpush3.bf16.msra.mxu1 %v6519_v10  ;;  %5044 = vmatprep.mubr.msk.f32.mxu1 %vm177_vm0, %v6522_v12 }
  0xa5   :  { %5532 = vmatprep.subr.bf16.mxu1 %v6291_v11 }
  0xa6   :  { %5025 = vmatmul.mubr.msk.f32.gmra.mrb[6].mxu0 %vm177_vm0, %v6550_v20 }
  0xa7   :  { %5027 = vmatprep.mubr.msk.f32.mxu0 %vm177_vm0, %v6552_v21  ;;  %5045 = vmatmul.mubr.msk.f32.gmra.mrb[2].mxu1 %vm177_vm0, %v6529_v15 }
  0xa8   :  { %5047 = vmatprep.mubr.msk.f32.mxu1 %vm177_vm0, %v6533_v17  ;;  %5534 = vmatpush3.bf16.msra.mxu1 %v6531_v16 }
  0xa9   :  { %5541 = vmatprep.subr.bf16.mxu1 %v6291_v11 }
  0xaa   :  { %5028 = vmatmul.mubr.msk.f32.gmra.mrb[8].mxu0 %vm177_vm0, %v6558_v22 }
  0xab   :  { %5030 = vmatprep.mubr.msk.f32.mxu0 %vm177_vm0, %v6560_v23  ;;  %5048 = vmatmul.mubr.msk.f32.gmra.mrb[4].mxu1 %vm177_vm0, %v6540_v18 }
  0xac   :  { %5050 = vmatprep.mubr.msk.f32.mxu1 %vm177_vm0, %v6543_v19 }
  0xae   :  { %5031 = vmatmul.mubr.msk.f32.gmra.mrb[10].mxu0 %vm177_vm0, %v6566_v24 }
  0xaf   :  { %5067 = vmatprep.mubr.msk.f32.mxu0 %vm6292_vm1, %v6293_v25  ;;  %5051 = vmatmul.mubr.msk.f32.gmra.mrb[6].mxu1 %vm177_vm0, %v6550_v20 }
  0xb0   :  { %5053 = vmatprep.mubr.msk.f32.mxu1 %vm177_vm0, %v6552_v21 }
  0xb2   :  { %5068 = vmatmul.mubr.f32.vlgmr.msra.gmra.mrb[12].mxu0 %v6293_v25 }
  0xb3   :  { %5537 = vmatpush3.bf16.msra.mxu0 %v6519_v10  ;;  %5089 = vmatprep.mubr.msk.f32.mxu0 %vm6292_vm1, %v6293_v25 }
  0xb4   :  { %5538 = vmatprep.subr.bf16.mxu0 %v6291_v11  ;;  %5054 = vmatmul.mubr.msk.f32.gmra.mrb[8].mxu1 %vm177_vm0, %v6558_v22 }
  0xb5   :  { %5056 = vmatprep.mubr.msk.f32.mxu1 %vm177_vm0, %v6560_v23 }
  0xb7   :  { %5540 = vmatpush3.bf16.msra.mxu0 %v6531_v16 }
  0xb8   :  { %5547 = vmatprep.subr.bf16.mxu0 %v6291_v11  ;;  %5057 = vmatmul.mubr.msk.f32.gmra.mrb[10].mxu1 %vm177_vm0, %v6566_v24 }
  0xb9   :  { %5078 = vmatprep.mubr.msk.f32.mxu1 %vm6292_vm1, %v6293_v25 }
 0x16d   :  { %v5017_v27 = vpop.f32.mrb[0].mxu0 }
 0x16e   :  { %v6582_v28 = vadd.f32 %v5017_v27, %v4643_v26  ;;  %v280_v29 = vpop.f32.mrb[1].mxu0 }
 0x16f   :  { %v281_v50 = vadd.f32 %v4643_v26, %v280_v29 }
 0x171   :  { %v5020_v30 = vpop.f32.mrb[2].mxu0 }
 0x172   :  { %v6584_v31 = vadd.f32 %v5020_v30, %v4643_v26  ;;  %v290_v32 = vpop.f32.mrb[3].mxu0 }
 0x173   :  { %v6586_v33 = vadd.f32 %v4643_v26, %v290_v32 }
 0x175   :  { %v5023_v34 = vpop.f32.mrb[4].mxu0 }
 0x176   :  { %v6588_v35 = vadd.f32 %v5023_v34, %v4643_v26  ;;  %v300_v36 = vpop.f32.mrb[5].mxu0  ;;  %v5043_v12 = vpop.f32.mrb[0].mxu1 }
 0x177   :  { %v6590_v37 = vadd.f32 %v4643_v26, %v300_v36  ;;  %v6646_v13 = vadd.f32 %v5043_v12, %v6643_v9  ;;  %v428_v14 = vpop.f32.mrb[1].mxu1 }
 0x178   :  { %v6649_v15 = vadd.f32 %v6643_v9, %v428_v14 }
 0x179   :  { %v5026_v38 = vpop.f32.mrb[6].mxu0 }
 0x17a   :  { %v6592_v39 = vadd.f32 %v5026_v38, %v4643_v26  ;;  %v310_v40 = vpop.f32.mrb[7].mxu0  ;;  %v5046_v17 = vpop.f32.mrb[2].mxu1 }
 0x17b   :  { %v6594_v41 = vadd.f32 %v4643_v26, %v310_v40  ;;  %v6652_v18 = vadd.f32 %v5046_v17, %v6643_v9  ;;  %v438_v19 = vpop.f32.mrb[3].mxu1 }
 0x17c   :  { %v6655_v20 = vadd.f32 %v6643_v9, %v438_v19 }
 0x17d   :  { %v5029_v42 = vpop.f32.mrb[8].mxu0 }
 0x17e   :  { %v6596_v43 = vadd.f32 %v5029_v42, %v4643_v26  ;;  %v320_v44 = vpop.f32.mrb[9].mxu0  ;;  %v5049_v21 = vpop.f32.mrb[4].mxu1 }
 0x17f   :  { %v6598_v45 = vadd.f32 %v4643_v26, %v320_v44  ;;  %v6658_v22 = vadd.f32 %v5049_v21, %v6643_v9  ;;  %v448_v23 = vpop.f32.mrb[5].mxu1 }
 0x180   :  { %v6661_v24 = vadd.f32 %v6643_v9, %v448_v23 }
 0x181   :  { %v5032_v46 = vpop.f32.mrb[10].mxu0 }
 0x182   :  { %v6600_v47 = vadd.f32 %v5032_v46, %v4643_v26  ;;  %v330_v48 = vpop.f32.mrb[11].mxu0 }
 0x183   :  { %v6602_v49 = vadd.f32 %v4643_v26, %v330_v48  ;;  %v5052_v26 = vpop.f32.mrb[6].mxu1 }
 0x184   :  { %v6664_v27 = vadd.f32 %v5052_v26, %v6643_v9  ;;  %v458_v29 = vpop.f32.mrb[7].mxu1 }
 0x185   :  { %v574_v51 = vpop.f32.mrb[12].mxu0  ;;  %v6667_v30 = vadd.f32 %v6643_v9, %v458_v29 }
 0x186   :  { %v578_v52 = vadd.f32 %v574_v51, %v281_v50  ;;  %v5069_v53 = vpop.f32.mrb[13].mxu0 }
 0x187   :  { %v5055_v32 = vpop.f32.mrb[8].mxu1 }
 0x188   :  { %5783 = vtanh.f32 %v578_v52  ;;  %v4669_v55 = vmul.f32 -1.442695, %v578_v52  ;;  %v6670_v34 = vadd.f32 %v5055_v32, %v6643_v9  ;;  %v468_v36 = vpop.f32.mrb[9].mxu1 }
 0x189   :  { %v6673_v38 = vadd.f32 %v6643_v9, %v468_v36 }
 0x18a   :  { %5785 = vpow2.f32 %v4669_v55 }
 0x18b   :  { %v6675_v42 = vpop.f32.mrb[10].mxu1 }
 0x18c   :  { %v478_v44 = vpop.f32.mrb[11].mxu1 }
 0x18d   :  { %v6680_v46 = vadd.f32 %v6643_v9, %v478_v44 }
 0x192   :  { %v5784_v54 = vpop.eup %5783 }
 0x193   :  { %588 = vrot.lane.b32.xlu0 %v5784_v54, %s6294_s3 }
 0x194   :  { %v5786_v56 = vpop.eup %5785 }
 0x195   :  { %v582_v57 = vadd.f32 1.0, %v5786_v56 }
 0x197   :  { %5787 = vrcp.f32 %v582_v57 }
 0x1a1   :  { %v5788_v58 = vpop.eup %5787 }
 0x1a2   :  { %v586_v61 = vmul.f32 0.0, %v5788_v58 }
 0x205   :  { %v589_v59 = vpop.permute.xlu0 %588 }
 0x206   :  { %v591_v60 = vmul.f32 %v5788_v58, %v589_v59 }
 0x208   :  { %593 = vrot.lane.b32.xlu0 %v591_v60, %s6295_s20 }
 0x27a   :  { %v594_v62 = vpop.permute.xlu0 %593 }
 0x27b   :  { %v6606_v63 = vadd.f32 %v594_v62, %v586_v61 }
 0x27d   :  { %5789 = vtanh.f32 %v6606_v63 }
 0x287   :  { %v5790_v6 = vpop.eup %5789 }
 0x288   :  { %599 = vrot.lane.b32.xlu1 %v5790_v6, %s6294_s3 }
 0x2fa   :  { %v600_v7 = vpop.permute.xlu1 %599 }
 0x2fb   :  { %v602_v8 = vmul.f32 %v5788_v58, %v600_v7 }
 0x2fd   :  { %604 = vrot.lane.b32.xlu1 %v602_v8, %s6295_s20 }
 0x36f   :  { %v605_v40 = vpop.permute.xlu1 %604 }
 0x370   :  { %607 = vst.msk [vmem:[#allocation3] sm:$0xff] %vm177_vm0, %v605_v40  ;;  %5079 = vmatmul.mubr.msk.f32.vlgmr.msra.gmra.mrb[12].mxu1 %vm177_vm0, %v605_v40 }
 0x371   :  { %5543 = vmatpush3.bf16.msra.mxu1 %v6519_v10  ;;  %5100 = vmatprep.mubr.msk.f32.mxu1 %vm6292_vm1, %v6293_v25 }
 0x372   :  { %5544 = vmatprep.subr.bf16.mxu1 %v6291_v11 }
 0x375   :  { %5546 = vmatpush3.bf16.msra.mxu1 %v6531_v16 }
 0x376   :  { %5553 = vmatprep.subr.bf16.mxu1 %v6291_v11 }
 0x443   :  { %v678_v48 = vpop.f32.mrb[12].mxu1 }
 0x444   :  { %v682_v50 = vadd.f32 %v678_v48, %v6582_v28  ;;  %v5080_v51 = vpop.f32.mrb[13].mxu1 }
 0x446   :  { %5791 = vtanh.f32 %v682_v50  ;;  %v4671_v53 = vmul.f32 -1.442695, %v682_v50 }
 0x448   :  { %5793 = vpow2.f32 %v4671_v53 }
 0x450   :  { %v5792_v52 = vpop.eup %5791 }
 0x451   :  { %692 = vrot.lane.b32.xlu0 %v5792_v52, %s6294_s3 }
 0x452   :  { %v5794_v54 = vpop.eup %5793 }
 0x453   :  { %v686_v55 = vadd.f32 1.0, %v5794_v54 }
 0x455   :  { %5795 = vrcp.f32 %v686_v55 }
 0x45f   :  { %v5796_v56 = vpop.eup %5795 }
 0x460   :  { %v690_v59 = vmul.f32 %v5796_v56, %v6606_v63 }
 0x4c3   :  { %v693_v57 = vpop.permute.xlu0 %692 }
 0x4c4   :  { %v695_v58 = vmul.f32 %v5796_v56, %v693_v57 }
 0x4c6   :  { %697 = vrot.lane.b32.xlu1 %v695_v58, %s6295_s20 }
 0x538   :  { %v698_v60 = vpop.permute.xlu1 %697 }
 0x539   :  { %v700_v61 = vadd.f32 %v698_v60, %v690_v59 }
 0x53b   :  { %5797 = vtanh.f32 %v700_v61 }
 0x545   :  { %v5798_v28 = vpop.eup %5797 }
 0x546   :  { %703 = vrot.lane.b32.xlu0 %v5798_v28, %s6294_s3 }
 0x5b8   :  { %v704_v62 = vpop.permute.xlu0 %703 }
 0x5b9   :  { %v706_v0 = vmul.f32 %v5796_v56, %v704_v62 }
 0x5bb   :  { %708 = vrot.lane.b32.xlu1 %v706_v0, %s6295_s20 }
 0x62d   :  { %v709_v1 = vpop.permute.xlu1 %708 }
 0x62e   :  { %712 = vst.msk [vmem:[#allocation3 + $0x8] sm:$0xff] %vm177_vm0, %v709_v1  ;;  %5090 = vmatmul.mubr.msk.f32.vlgmr.msra.gmra.mrb[14].mxu0 %vm177_vm0, %v709_v1 }
 0x62f   :  { %5549 = vmatpush3.bf16.msra.mxu0 %v6519_v10  ;;  %5111 = vmatprep.mubr.msk.f32.mxu0 %vm6292_vm1, %v6293_v25 }
 0x630   :  { %5550 = vmatprep.subr.bf16.mxu0 %v6291_v11 }
 0x633   :  { %5552 = vmatpush3.bf16.msra.mxu0 %v6531_v16 }
 0x634   :  { %5559 = vmatprep.subr.bf16.mxu0 %v6291_v11 }
 0x701   :  { %v783_v63 = vpop.f32.mrb[14].mxu0 }
 0x702   :  { %v787_v2 = vadd.f32 %v783_v63, %v6586_v33  ;;  %v5091_v3 = vpop.f32.mrb[15].mxu0 }
 0x704   :  { %5799 = vtanh.f32 %v787_v2  ;;  %v4673_v5 = vmul.f32 -1.442695, %v787_v2 }
 0x706   :  { %5801 = vpow2.f32 %v4673_v5 }
 0x70e   :  { %v5800_v4 = vpop.eup %5799 }
 0x70f   :  { %797 = vrot.lane.b32.xlu0 %v5800_v4, %s6294_s3 }
 0x710   :  { %v5802_v6 = vpop.eup %5801 }
 0x711   :  { %v791_v7 = vadd.f32 1.0, %v5802_v6 }
 0x713   :  { %5803 = vrcp.f32 %v791_v7 }
 0x71d   :  { %v5804_v8 = vpop.eup %5803 }
 0x71e   :  { %v795_v17 = vmul.f32 %v5804_v8, %v700_v61 }
 0x781   :  { %v798_v12 = vpop.permute.xlu0 %797 }
 0x782   :  { %v800_v14 = vmul.f32 %v5804_v8, %v798_v12 }
 0x784   :  { %802 = vrot.lane.b32.xlu1 %v800_v14, %s6295_s20 }
 0x7f6   :  { %v803_v19 = vpop.permute.xlu1 %802 }
 0x7f7   :  { %v805_v21 = vadd.f32 %v803_v19, %v795_v17 }
 0x7f9   :  { %5805 = vtanh.f32 %v805_v21 }
 0x803   :  { %v5806_v33 = vpop.eup %5805 }
 0x804   :  { %808 = vrot.lane.b32.xlu0 %v5806_v33, %s6294_s3 }
 0x876   :  { %v809_v23 = vpop.permute.xlu0 %808 }
 0x877   :  { %v811_v26 = vmul.f32 %v5804_v8, %v809_v23 }
 0x879   :  { %813 = vrot.lane.b32.xlu1 %v811_v26, %s6295_s20 }
 0x8eb   :  { %v814_v29 = vpop.permute.xlu1 %813 }
 0x8ec   :  { %817 = vst.msk [vmem:[#allocation3 + $0x10] sm:$0xff] %vm177_vm0, %v814_v29  ;;  %5101 = vmatmul.mubr.msk.f32.vlgmr.msra.gmra.mrb[14].mxu1 %vm177_vm0, %v814_v29 }
 0x8ed   :  { %5555 = vmatpush3.bf16.msra.mxu1 %v6519_v10  ;;  %5122 = vmatprep.mubr.msk.f32.mxu1 %vm6292_vm1, %v6293_v25 }
 0x8ee   :  { %5556 = vmatprep.subr.bf16.mxu1 %v6291_v11 }
 0x8f1   :  { %5558 = vmatpush3.bf16.msra.mxu1 %v6531_v16 }
 0x8f2   :  { %5565 = vmatprep.subr.bf16.mxu1 %v6291_v11 }
 0x9bf   :  { %v888_v32 = vpop.f32.mrb[14].mxu1 }
 0x9c0   :  { %v892_v36 = vadd.f32 %v888_v32, %v6584_v31  ;;  %v5102_v40 = vpop.f32.mrb[15].mxu1 }
 0x9c2   :  { %5807 = vtanh.f32 %v892_v36  ;;  %v4675_v48 = vmul.f32 -1.442695, %v892_v36 }
 0x9c4   :  { %5809 = vpow2.f32 %v4675_v48 }
 0x9cc   :  { %v5808_v44 = vpop.eup %5807 }
 0x9cd   :  { %902 = vrot.lane.b32.xlu0 %v5808_v44, %s6294_s3 }
 0x9ce   :  { %v5810_v50 = vpop.eup %5809 }
 0x9cf   :  { %v896_v51 = vadd.f32 1.0, %v5810_v50 }
 0x9d1   :  { %5811 = vrcp.f32 %v896_v51 }
 0x9db   :  { %v5812_v52 = vpop.eup %5811 }
 0x9dc   :  { %v900_v55 = vmul.f32 %v5812_v52, %v805_v21 }
 0xa3f   :  { %v903_v53 = vpop.permute.xlu0 %902 }
 0xa40   :  { %v905_v54 = vmul.f32 %v5812_v52, %v903_v53 }
 0xa42   :  { %907 = vrot.lane.b32.xlu1 %v905_v54, %s6295_s20 }
 0xab4   :  { %v908_v56 = vpop.permute.xlu1 %907 }
 0xab5   :  { %v910_v57 = vadd.f32 %v908_v56, %v900_v55 }
 0xab7   :  { %5813 = vtanh.f32 %v910_v57 }
 0xac1   :  { %v5814_v31 = vpop.eup %5813 }
 0xac2   :  { %913 = vrot.lane.b32.xlu0 %v5814_v31, %s6294_s3 }
 0xb34   :  { %v914_v58 = vpop.permute.xlu0 %913 }
 0xb35   :  { %v916_v59 = vmul.f32 %v5812_v52, %v914_v58 }
 0xb37   :  { %918 = vrot.lane.b32.xlu1 %v916_v59, %s6295_s20 }
 0xba9   :  { %v919_v60 = vpop.permute.xlu1 %918 }
 0xbaa   :  { %922 = vst.msk [vmem:[#allocation3 + $0x18] sm:$0xff] %vm177_vm0, %v919_v60  ;;  %5112 = vmatmul.mubr.msk.f32.vlgmr.msra.gmra.mrb[16].mxu0 %vm177_vm0, %v919_v60 }
 0xbab   :  { %5561 = vmatpush3.bf16.msra.mxu0 %v6519_v10  ;;  %5133 = vmatprep.mubr.msk.f32.mxu0 %vm6292_vm1, %v6293_v25 }
 0xbac   :  { %5562 = vmatprep.subr.bf16.mxu0 %v6291_v11 }
 0xbaf   :  { %5564 = vmatpush3.bf16.msra.mxu0 %v6531_v16 }
 0xbb0   :  { %5571 = vmatprep.subr.bf16.mxu0 %v6291_v11 }
 0xc7d   :  { %v993_v61 = vpop.f32.mrb[16].mxu0 }
 0xc7e   :  { %v997_v28 = vadd.f32 %v993_v61, %v6590_v37  ;;  %v5113_v62 = vpop.f32.mrb[17].mxu0 }
 0xc80   :  { %5815 = vtanh.f32 %v997_v28  ;;  %v4677_v1 = vmul.f32 -1.442695, %v997_v28 }
 0xc82   :  { %5817 = vpow2.f32 %v4677_v1 }
 0xc8a   :  { %v5816_v0 = vpop.eup %5815 }
 0xc8b   :  { %1007 = vrot.lane.b32.xlu0 %v5816_v0, %s6294_s3 }
 0xc8c   :  { %v5818_v63 = vpop.eup %5817 }
 0xc8d   :  { %v1001_v2 = vadd.f32 1.0, %v5818_v63 }
 0xc8f   :  { %5819 = vrcp.f32 %v1001_v2 }
 0xc99   :  { %v5820_v3 = vpop.eup %5819 }
 0xc9a   :  { %v1005_v6 = vmul.f32 %v5820_v3, %v910_v57 }
 0xcfd   :  { %v1008_v4 = vpop.permute.xlu0 %1007 }
 0xcfe   :  { %v1010_v5 = vmul.f32 %v5820_v3, %v1008_v4 }
 0xd00   :  { %1012 = vrot.lane.b32.xlu1 %v1010_v5, %s6295_s20 }
 0xd72   :  { %v1013_v7 = vpop.permute.xlu1 %1012 }
 0xd73   :  { %v1015_v8 = vadd.f32 %v1013_v7, %v1005_v6 }
 0xd75   :  { %5821 = vtanh.f32 %v1015_v8 }
 0xd7f   :  { %v5822_v37 = vpop.eup %5821 }
 0xd80   :  { %1018 = vrot.lane.b32.xlu0 %v5822_v37, %s6294_s3 }
 0xdf2   :  { %v1019_v12 = vpop.permute.xlu0 %1018 }
 0xdf3   :  { %v1021_v14 = vmul.f32 %v5820_v3, %v1019_v12 }
 0xdf5   :  { %1023 = vrot.lane.b32.xlu1 %v1021_v14, %s6295_s20 }
 0xe67   :  { %v1024_v17 = vpop.permute.xlu1 %1023 }
 0xe68   :  { %1027 = vst.msk [vmem:[#allocation3 + $0x20] sm:$0xff] %vm177_vm0, %v1024_v17  ;;  %5123 = vmatmul.mubr.msk.f32.vlgmr.msra.gmra.mrb[16].mxu1 %vm177_vm0, %v1024_v17 }
 0xe69   :  { %5567 = vmatpush3.bf16.msra.mxu1 %v6519_v10  ;;  %5144 = vmatprep.mubr.msk.f32.mxu1 %vm6292_vm1, %v6293_v25 }
 0xe6a   :  { %5568 = vmatprep.subr.bf16.mxu1 %v6291_v11 }
 0xe6d   :  { %5570 = vmatpush3.bf16.msra.mxu1 %v6531_v16 }
 0xe6e   :  { %5577 = vmatprep.subr.bf16.mxu1 %v6291_v11 }
 0xf3b   :  { %v1098_v19 = vpop.f32.mrb[16].mxu1 }
 0xf3c   :  { %v1102_v21 = vadd.f32 %v1098_v19, %v6588_v35  ;;  %v5124_v33 = vpop.f32.mrb[17].mxu1 }
 0xf3e   :  { %5823 = vtanh.f32 %v1102_v21  ;;  %v4679_v26 = vmul.f32 -1.442695, %v1102_v21 }
 0xf40   :  { %5825 = vpow2.f32 %v4679_v26 }
 0xf48   :  { %v5824_v23 = vpop.eup %5823 }
 0xf49   :  { %1112 = vrot.lane.b32.xlu0 %v5824_v23, %s6294_s3 }
 0xf4a   :  { %v5826_v29 = vpop.eup %5825 }
 0xf4b   :  { %v1106_v32 = vadd.f32 1.0, %v5826_v29 }
 0xf4d   :  { %5827 = vrcp.f32 %v1106_v32 }
 0xf57   :  { %v5828_v36 = vpop.eup %5827 }
 0xf58   :  { %v1110_v48 = vmul.f32 %v5828_v36, %v1015_v8 }
 0xfbb   :  { %v1113_v40 = vpop.permute.xlu0 %1112 }
 0xfbc   :  { %v1115_v44 = vmul.f32 %v5828_v36, %v1113_v40 }
 0xfbe   :  { %1117 = vrot.lane.b32.xlu1 %v1115_v44, %s6295_s20 }
0x1030   :  { %v1118_v50 = vpop.permute.xlu1 %1117 }
0x1031   :  { %v1120_v51 = vadd.f32 %v1118_v50, %v1110_v48 }
0x1033   :  { %5829 = vtanh.f32 %v1120_v51 }
0x103d   :  { %v5830_v35 = vpop.eup %5829 }
0x103e   :  { %1123 = vrot.lane.b32.xlu0 %v5830_v35, %s6294_s3 }
0x10b0   :  { %v1124_v52 = vpop.permute.xlu0 %1123 }
0x10b1   :  { %v1126_v53 = vmul.f32 %v5828_v36, %v1124_v52 }
0x10b3   :  { %1128 = vrot.lane.b32.xlu1 %v1126_v53, %s6295_s20 }
0x1125   :  { %v1129_v54 = vpop.permute.xlu1 %1128 }
0x1126   :  { %1132 = vst.msk [vmem:[#allocation3 + $0x28] sm:$0xff] %vm177_vm0, %v1129_v54  ;;  %5134 = vmatmul.mubr.msk.f32.vlgmr.msra.gmra.mrb[18].mxu0 %vm177_vm0, %v1129_v54 }
0x1127   :  { %5573 = vmatpush3.bf16.msra.mxu0 %v6519_v10  ;;  %5155 = vmatprep.mubr.msk.f32.mxu0 %vm6292_vm1, %v6293_v25 }
0x1128   :  { %5574 = vmatprep.subr.bf16.mxu0 %v6291_v11 }
0x112b   :  { %5576 = vmatpush3.bf16.msra.mxu0 %v6531_v16 }
0x112c   :  { %5583 = vmatprep.subr.bf16.mxu0 %v6291_v11 }
0x11f9   :  { %v1203_v55 = vpop.f32.mrb[18].mxu0 }
0x11fa   :  { %v1207_v56 = vadd.f32 %v1203_v55, %v6594_v41  ;;  %v5135_v57 = vpop.f32.mrb[19].mxu0 }
0x11fc   :  { %5831 = vtanh.f32 %v1207_v56  ;;  %v4681_v58 = vmul.f32 -1.442695, %v1207_v56 }
0x11fe   :  { %5833 = vpow2.f32 %v4681_v58 }
0x1206   :  { %v5832_v31 = vpop.eup %5831 }
0x1207   :  { %1217 = vrot.lane.b32.xlu0 %v5832_v31, %s6294_s3 }
0x1208   :  { %v5834_v59 = vpop.eup %5833 }
0x1209   :  { %v1211_v60 = vadd.f32 1.0, %v5834_v59 }
0x120b   :  { %5835 = vrcp.f32 %v1211_v60 }
0x1215   :  { %v5836_v61 = vpop.eup %5835 }
0x1216   :  { %v1215_v0 = vmul.f32 %v5836_v61, %v1120_v51 }
0x1279   :  { %v1218_v28 = vpop.permute.xlu0 %1217 }
0x127a   :  { %v1220_v62 = vmul.f32 %v5836_v61, %v1218_v28 }
0x127c   :  { %1222 = vrot.lane.b32.xlu1 %v1220_v62, %s6295_s20 }
0x12ee   :  { %v1223_v1 = vpop.permute.xlu1 %1222 }
0x12ef   :  { %v1225_v63 = vadd.f32 %v1223_v1, %v1215_v0 }
0x12f1   :  { %5837 = vtanh.f32 %v1225_v63 }
0x12fb   :  { %v5838_v41 = vpop.eup %5837 }
0x12fc   :  { %1228 = vrot.lane.b32.xlu0 %v5838_v41, %s6294_s3 }
0x136e   :  { %v1229_v2 = vpop.permute.xlu0 %1228 }
0x136f   :  { %v1231_v3 = vmul.f32 %v5836_v61, %v1229_v2 }
0x1371   :  { %1233 = vrot.lane.b32.xlu1 %v1231_v3, %s6295_s20 }
0x13e3   :  { %v1234_v4 = vpop.permute.xlu1 %1233 }
0x13e4   :  { %1237 = vst.msk [vmem:[#allocation3 + $0x30] sm:$0xff] %vm177_vm0, %v1234_v4  ;;  %5145 = vmatmul.mubr.msk.f32.vlgmr.msra.gmra.mrb[18].mxu1 %vm177_vm0, %v1234_v4 }
0x13e5   :  { %5579 = vmatpush3.bf16.msra.mxu1 %v6519_v10  ;;  %5166 = vmatprep.mubr.msk.f32.mxu1 %vm6292_vm1, %v6293_v25 }
0x13e6   :  { %5580 = vmatprep.subr.bf16.mxu1 %v6291_v11 }
0x13e9   :  { %5582 = vmatpush3.bf16.msra.mxu1 %v6531_v16 }
0x13ea   :  { %5589 = vmatprep.subr.bf16.mxu1 %v6291_v11 }
0x14b7   :  { %v1308_v5 = vpop.f32.mrb[18].mxu1 }
0x14b8   :  { %v1312_v6 = vadd.f32 %v1308_v5, %v6592_v39  ;;  %v5146_v7 = vpop.f32.mrb[19].mxu1 }
0x14ba   :  { %5839 = vtanh.f32 %v1312_v6  ;;  %v4683_v37 = vmul.f32 -1.442695, %v1312_v6 }
0x14bc   :  { %5841 = vpow2.f32 %v4683_v37  ;;  %v1764_v37 = vld [vmem:[#allocation13 + $0x8] sm:$0xff] }
0x14c4   :  { %v5840_v8 = vpop.eup %5839 }
0x14c5   :  { %1322 = vrot.lane.b32.xlu0 %v5840_v8, %s6294_s3  ;;  %v1763_v8 = vld [vmem:[#allocation13] sm:$0xff] }
0x14c6   :  { %v5842_v12 = vpop.eup %5841 }
0x14c7   :  { %v1316_v14 = vadd.f32 1.0, %v5842_v12  ;;  %v6798_v12 = vpack.c.bf16 %v1764_v37, %v1763_v8 }
0x14c9   :  { %5843 = vrcp.f32 %v1316_v14  ;;  %v1765_v14 = vld [vmem:[#allocation13 + $0x10] sm:$0xff] }
0x14d3   :  { %v5844_v17 = vpop.eup %5843 }
0x14d4   :  { %v1320_v33 = vmul.f32 %v5844_v17, %v1225_v63 }
0x1537   :  { %v1323_v19 = vpop.permute.xlu0 %1322 }
0x1538   :  { %v1325_v21 = vmul.f32 %v5844_v17, %v1323_v19 }
0x153a   :  { %1327 = vrot.lane.b32.xlu1 %v1325_v21, %s6295_s20 }
0x15ac   :  { %v1328_v23 = vpop.permute.xlu1 %1327 }
0x15ad   :  { %v1330_v26 = vadd.f32 %v1328_v23, %v1320_v33 }
0x15af   :  { %5845 = vtanh.f32 %v1330_v26 }
0x15b9   :  { %v5846_v39 = vpop.eup %5845 }
0x15ba   :  { %1333 = vrot.lane.b32.xlu0 %v5846_v39, %s6294_s3  ;;  %v484_v39 = vadd.f32 %v6675_v42, %v6643_v9 }
0x162c   :  { %v1334_v29 = vpop.permute.xlu0 %1333 }
0x162d   :  { %v1336_v32 = vmul.f32 %v5844_v17, %v1334_v29  ;;  %v1766_v17 = vld [vmem:[#allocation13 + $0x18] sm:$0xff] }
0x162e   :  { %v6803_v21 = vpack.c.bf16 %v1766_v17, %v1765_v14 }
0x162f   :  { %1338 = vrot.lane.b32.xlu1 %v1336_v32, %s6295_s20 }
0x16a1   :  { %v1339_v36 = vpop.permute.xlu1 %1338 }
0x16a2   :  { %1342 = vst.msk [vmem:[#allocation3 + $0x38] sm:$0xff] %vm177_vm0, %v1339_v36  ;;  %5156 = vmatmul.mubr.msk.f32.vlgmr.msra.gmra.mrb[20].mxu0 %vm177_vm0, %v1339_v36 }
0x16a3   :  { %5585 = vmatpush3.bf16.msra.mxu0 %v6519_v10  ;;  %5177 = vmatprep.mubr.msk.f32.mxu0 %vm6292_vm1, %v6293_v25 }
0x16a4   :  { %5586 = vmatprep.subr.bf16.mxu0 %v6291_v11 }
0x16a7   :  { %5588 = vmatpush3.bf16.msra.mxu0 %v6531_v16 }
0x16a8   :  { %5595 = vmatprep.subr.bf16.mxu0 %v6291_v11 }
0x1775   :  { %v1413_v40 = vpop.f32.mrb[20].mxu0 }
0x1776   :  { %v1417_v44 = vadd.f32 %v1413_v40, %v6598_v45  ;;  %v5157_v48 = vpop.f32.mrb[21].mxu0 }
0x1778   :  { %5847 = vtanh.f32 %v1417_v44  ;;  %v4685_v51 = vmul.f32 -1.442695, %v1417_v44 }
0x177a   :  { %5849 = vpow2.f32 %v4685_v51 }
0x1782   :  { %v5848_v50 = vpop.eup %5847 }
0x1783   :  { %1427 = vrot.lane.b32.xlu0 %v5848_v50, %s6294_s3 }
0x1784   :  { %v5850_v35 = vpop.eup %5849 }
0x1785   :  { %v1421_v52 = vadd.f32 1.0, %v5850_v35 }
0x1787   :  { %5851 = vrcp.f32 %v1421_v52 }
0x1791   :  { %v5852_v53 = vpop.eup %5851 }
0x1792   :  { %v1425_v56 = vmul.f32 %v5852_v53, %v1330_v26 }
0x17f5   :  { %v1428_v54 = vpop.permute.xlu0 %1427 }
0x17f6   :  { %v1430_v55 = vmul.f32 %v5852_v53, %v1428_v54 }
0x17f8   :  { %1432 = vrot.lane.b32.xlu1 %v1430_v55, %s6295_s20 }
0x186a   :  { %v1433_v57 = vpop.permute.xlu1 %1432 }
0x186b   :  { %v1435_v31 = vadd.f32 %v1433_v57, %v1425_v56 }
0x186d   :  { %5853 = vtanh.f32 %v1435_v31 }
0x1877   :  { %v5854_v45 = vpop.eup %5853 }
0x1878   :  { %1438 = vrot.lane.b32.xlu0 %v5854_v45, %s6294_s3 }
0x18ea   :  { %v1439_v58 = vpop.permute.xlu0 %1438 }
0x18eb   :  { %v1441_v59 = vmul.f32 %v5852_v53, %v1439_v58 }
0x18ed   :  { %1443 = vrot.lane.b32.xlu1 %v1441_v59, %s6295_s20 }
0x195f   :  { %v1444_v60 = vpop.permute.xlu1 %1443 }
0x1960   :  { %1447 = vst.msk [vmem:[#allocation3 + $0x40] sm:$0xff] %vm177_vm0, %v1444_v60  ;;  %5167 = vmatmul.mubr.msk.f32.vlgmr.msra.gmra.mrb[20].mxu1 %vm177_vm0, %v1444_v60 }
0x1961   :  { %5591 = vmatpush3.bf16.msra.mxu1 %v6519_v10  ;;  %5188 = vmatprep.mubr.msk.f32.mxu1 %vm6292_vm1, %v6293_v25 }
0x1962   :  { %5592 = vmatprep.subr.bf16.mxu1 %v6291_v11 }
0x1965   :  { %5594 = vmatpush3.bf16.msra.mxu1 %v6531_v16 }
0x1966   :  { %5601 = vmatprep.subr.bf16.mxu1 %v6291_v11 }
0x1a33   :  { %v1518_v61 = vpop.f32.mrb[20].mxu1 }
0x1a34   :  { %v1522_v28 = vadd.f32 %v1518_v61, %v6596_v43  ;;  %v5168_v62 = vpop.f32.mrb[21].mxu1 }
0x1a36   :  { %5855 = vtanh.f32 %v1522_v28  ;;  %v4687_v1 = vmul.f32 -1.442695, %v1522_v28 }
0x1a38   :  { %5857 = vpow2.f32 %v4687_v1 }
0x1a40   :  { %v5856_v0 = vpop.eup %5855 }
0x1a41   :  { %1532 = vrot.lane.b32.xlu0 %v5856_v0, %s6294_s3 }
0x1a42   :  { %v5858_v10 = vpop.eup %5857 }
0x1a43   :  { %v1526_v63 = vadd.f32 1.0, %v5858_v10 }
0x1a45   :  { %5859 = vrcp.f32 %v1526_v63 }
0x1a4f   :  { %v5860_v41 = vpop.eup %5859 }
0x1a50   :  { %v1530_v16 = vmul.f32 %v5860_v41, %v1435_v31 }
0x1ab3   :  { %v1533_v2 = vpop.permute.xlu0 %1532 }
0x1ab4   :  { %v1535_v3 = vmul.f32 %v5860_v41, %v1533_v2 }
0x1ab6   :  { %1537 = vrot.lane.b32.xlu1 %v1535_v3, %s6295_s20 }
0x1b28   :  { %v1538_v4 = vpop.permute.xlu1 %1537 }
0x1b29   :  { %v1540_v5 = vadd.f32 %v1538_v4, %v1530_v16 }
0x1b2b   :  { %5861 = vtanh.f32 %v1540_v5 }
0x1b35   :  { %v5862_v43 = vpop.eup %5861 }
0x1b36   :  { %1543 = vrot.lane.b32.xlu0 %v5862_v43, %s6294_s3 }
0x1ba8   :  { %v1544_v6 = vpop.permute.xlu0 %1543 }
0x1ba9   :  { %v1546_v7 = vmul.f32 %v5860_v41, %v1544_v6 }
0x1bab   :  { %1548 = vrot.lane.b32.xlu1 %v1546_v7, %s6295_s20 }
0x1c1d   :  { %v1549_v19 = vpop.permute.xlu1 %1548 }
0x1c1e   :  { %1552 = vst.msk [vmem:[#allocation3 + $0x48] sm:$0xff] %vm177_vm0, %v1549_v19  ;;  %5178 = vmatmul.mubr.msk.f32.vlgmr.msra.gmra.mrb[22].mxu0 %vm177_vm0, %v1549_v19 }
0x1c1f   :  { %5597 = vmatpush3.bf16.msra.mxu0 %v6798_v12  ;;  %5199 = vmatprep.mubr.msk.f32.mxu0 %vm6292_vm1, %v6293_v25 }
0x1c20   :  { %5598 = vmatprep.subr.bf16.mxu0 %v6291_v11 }
0x1c23   :  { %5600 = vmatpush3.bf16.msra.mxu0 %v6803_v21 }
0x1c24   :  { %5607 = vmatprep.subr.bf16.mxu0 %v6291_v11 }
0x1c26   :  { %5200 = vmatmul.mubr.f32.vlgmr.msra.gmra.mrb[24].mxu0 %v6293_v25 }
0x1c27   :  { %5609 = vmatpush3.bf16.msra.mxu0 %v6798_v12  ;;  %5221 = vmatprep.mubr.msk.f32.mxu0 %vm6292_vm1, %v6293_v25 }
0x1c28   :  { %5610 = vmatprep.subr.bf16.mxu0 %v6291_v11 }
0x1c2b   :  { %5612 = vmatpush3.bf16.msra.mxu0 %v6803_v21 }
0x1c2c   :  { %5619 = vmatprep.subr.bf16.mxu0 %v6291_v11 }
0x1cf1   :  { %v1623_v33 = vpop.f32.mrb[22].mxu0 }
0x1cf2   :  { %v1627_v23 = vadd.f32 %v1623_v33, %v6602_v49  ;;  %v5179_v26 = vpop.f32.mrb[23].mxu0 }
0x1cf4   :  { %5863 = vtanh.f32 %v1627_v23  ;;  %v4689_v48 = vmul.f32 -1.442695, %v1627_v23 }
0x1cf9   :  { %v1835_v29 = vpop.f32.mrb[24].mxu0 }
0x1cfa   :  { %v1839_v32 = vadd.f32 %v1835_v29, %v484_v39  ;;  %v5201_v36 = vpop.f32.mrb[25].mxu0 }
0x1cfc   :  { %5865 = vtanh.f32 %v1839_v32  ;;  %v4692_v50 = vmul.f32 -1.442695, %v1839_v32 }
0x1cfd   :  { %5867 = vpow2.f32 %v4689_v48 }
0x1cfe   :  { %v5864_v40 = vpop.eup %5863  ;;  %5869 = vpow2.f32 %v4692_v50 }
0x1cff   :  { %1637 = vrot.lane.b32.xlu0 %v5864_v40, %s6294_s3 }
0x1d06   :  { %v5866_v44 = vpop.eup %5865 }
0x1d07   :  { %1849 = vrot.lane.b32.xlu1 %v5866_v44, %s6294_s3  ;;  %v5868_v49 = vpop.eup %5867 }
0x1d08   :  { %v1631_v51 = vadd.f32 1.0, %v5868_v49  ;;  %v5870_v35 = vpop.eup %5869 }
0x1d09   :  { %v1843_v52 = vadd.f32 1.0, %v5870_v35 }
0x1d0a   :  { %5871 = vrcp.f32 %v1631_v51 }
0x1d0b   :  { %5873 = vrcp.f32 %v1843_v52 }
0x1d14   :  { %v5872_v9 = vpop.eup %5871 }
0x1d15   :  { %v5874_v54 = vpop.eup %5873  ;;  %v1635_v57 = vmul.f32 %v5872_v9, %v1540_v5 }
0x1d16   :  { %v1847_v58 = vmul.f32 0.0, %v5874_v54 }
0x1d71   :  { %v1638_v42 = vpop.permute.xlu0 %1637 }
0x1d72   :  { %v1640_v53 = vmul.f32 %v5872_v9, %v1638_v42 }
0x1d74   :  { %1642 = vrot.lane.b32.xlu0 %v1640_v53, %s6295_s20 }
0x1d79   :  { %v1850_v55 = vpop.permute.xlu1 %1849 }
0x1d7a   :  { %v1852_v56 = vmul.f32 %v5874_v54, %v1850_v55 }
0x1d7c   :  { %1854 = vrot.lane.b32.xlu1 %v1852_v56, %s6295_s20 }
0x1de6   :  { %v1643_v31 = vpop.permute.xlu0 %1642 }
0x1de7   :  { %v6824_v45 = vadd.f32 %v1643_v31, %v1635_v57 }
0x1de9   :  { %5875 = vtanh.f32 %v6824_v45 }
0x1dee   :  { %v1855_v59 = vpop.permute.xlu1 %1854 }
0x1def   :  { %v1857_v60 = vadd.f32 %v1855_v59, %v1847_v58 }
0x1df1   :  { %5877 = vtanh.f32 %v1857_v60 }
0x1df3   :  { %v5876_v61 = vpop.eup %5875 }
0x1df4   :  { %1648 = vrot.lane.b32.xlu0 %v5876_v61, %s6294_s3 }
0x1dfb   :  { %v5878_v28 = vpop.eup %5877 }
0x1dfc   :  { %1860 = vrot.lane.b32.xlu1 %v5878_v28, %s6294_s3 }
0x1e66   :  { %v1649_v62 = vpop.permute.xlu0 %1648 }
0x1e67   :  { %v1651_v0 = vmul.f32 %v5872_v9, %v1649_v62 }
0x1e69   :  { %1653 = vrot.lane.b32.xlu0 %v1651_v0, %s6295_s20 }
0x1e6e   :  { %v1861_v1 = vpop.permute.xlu1 %1860 }
0x1e6f   :  { %v1863_v10 = vmul.f32 %v5874_v54, %v1861_v1 }
0x1e71   :  { %1865 = vrot.lane.b32.xlu1 %v1863_v10, %s6295_s20 }
0x1edb   :  { %v1654_v63 = vpop.permute.xlu0 %1653 }
0x1edc   :  { %1657 = vst.msk [vmem:[#allocation3 + $0x50] sm:$0xff] %vm177_vm0, %v1654_v63  ;;  %5189 = vmatmul.mubr.msk.f32.vlgmr.msra.gmra.mrb[22].mxu1 %vm177_vm0, %v1654_v63 }
0x1edd   :  { %5603 = vmatpush3.bf16.msra.mxu1 %v6798_v12  ;;  %5210 = vmatprep.mubr.msk.f32.mxu1 %vm6292_vm1, %v6293_v25 }
0x1ede   :  { %5604 = vmatprep.subr.bf16.mxu1 %v6291_v11 }
0x1ee1   :  { %5606 = vmatpush3.bf16.msra.mxu1 %v6803_v21 }
0x1ee2   :  { %5613 = vmatprep.subr.bf16.mxu1 %v6291_v11 }
0x1ee3   :  { %v1866_v41 = vpop.permute.xlu1 %1865 }
0x1ee4   :  { %1869 = vst.msk [vmem:[#allocation4 + $0x58] sm:$0xff] %vm177_vm0, %v1866_v41  ;;  %5211 = vmatmul.mubr.msk.f32.vlgmr.msra.gmra.mrb[24].mxu1 %vm177_vm0, %v1866_v41 }
0x1ee5   :  { %5615 = vmatpush3.bf16.msra.mxu1 %v6798_v12  ;;  %5232 = vmatprep.mubr.msk.f32.mxu1 %vm6292_vm1, %v6293_v25 }
0x1ee6   :  { %5616 = vmatprep.subr.bf16.mxu1 %v6291_v11 }
0x1ee9   :  { %5618 = vmatpush3.bf16.msra.mxu1 %v6803_v21 }
0x1eea   :  { %5625 = vmatprep.subr.bf16.mxu1 %v6291_v11 }
0x1faf   :  { %v1728_v2 = vpop.f32.mrb[22].mxu1 }
0x1fb0   :  { %v6848_v3 = vadd.f32 %v1728_v2, %v6600_v47  ;;  %v5190_v16 = vpop.f32.mrb[23].mxu1 }
0x1fb7   :  { %v1940_v4 = vpop.f32.mrb[24].mxu1 }
0x1fb8   :  { %v1944_v5 = vadd.f32 %v1940_v4, %v6680_v46  ;;  %v5212_v43 = vpop.f32.mrb[25].mxu1 }
0x1fba   :  { %5879 = vtanh.f32 %v1944_v5  ;;  %v4694_v7 = vmul.f32 -1.442695, %v1944_v5 }
0x1fbc   :  { %5881 = vpow2.f32 %v4694_v7 }
0x1fc4   :  { %v5880_v6 = vpop.eup %5879 }
0x1fc5   :  { %1954 = vrot.lane.b32.xlu0 %v5880_v6, %s6294_s3 }
0x1fc6   :  { %v5882_v8 = vpop.eup %5881 }
0x1fc7   :  { %v1948_v37 = vadd.f32 1.0, %v5882_v8 }
0x1fc9   :  { %5883 = vrcp.f32 %v1948_v37 }
0x1fd3   :  { %v5884_v14 = vpop.eup %5883 }
0x1fd4   :  { %v1952_v47 = vmul.f32 %v5884_v14, %v1857_v60 }
0x2037   :  { %v1955_v17 = vpop.permute.xlu0 %1954 }
0x2038   :  { %v1957_v19 = vmul.f32 %v5884_v14, %v1955_v17 }
0x203a   :  { %1959 = vrot.lane.b32.xlu1 %v1957_v19, %s6295_s20 }
0x20ac   :  { %v1960_v33 = vpop.permute.xlu1 %1959 }
0x20ad   :  { %v1962_v23 = vadd.f32 %v1960_v33, %v1952_v47 }
0x20af   :  { %5885 = vtanh.f32 %v1962_v23 }
0x20b9   :  { %v5886_v46 = vpop.eup %5885 }
0x20ba   :  { %1965 = vrot.lane.b32.xlu0 %v5886_v46, %s6294_s3 }
0x212c   :  { %v1966_v26 = vpop.permute.xlu0 %1965 }
0x212d   :  { %v1968_v39 = vmul.f32 %v5884_v14, %v1966_v26 }
0x212f   :  { %1970 = vrot.lane.b32.xlu1 %v1968_v39, %s6295_s20 }
0x21a1   :  { %v1971_v29 = vpop.permute.xlu1 %1970 }
0x21a2   :  { %1974 = vst.msk [vmem:[#allocation4 + $0x50] sm:$0xff] %vm177_vm0, %v1971_v29  ;;  %5222 = vmatmul.mubr.msk.f32.vlgmr.msra.gmra.mrb[26].mxu0 %vm177_vm0, %v1971_v29 }
0x21a3   :  { %5621 = vmatpush3.bf16.msra.mxu0 %v6798_v12  ;;  %5243 = vmatprep.mubr.msk.f32.mxu0 %vm6292_vm1, %v6293_v25 }
0x21a4   :  { %5622 = vmatprep.subr.bf16.mxu0 %v6291_v11 }
0x21a7   :  { %5624 = vmatpush3.bf16.msra.mxu0 %v6803_v21 }
0x21a8   :  { %5631 = vmatprep.subr.bf16.mxu0 %v6291_v11 }
0x2275   :  { %v2045_v32 = vpop.f32.mrb[26].mxu0 }
0x2276   :  { %v2049_v36 = vadd.f32 %v2045_v32, %v6670_v34  ;;  %v5223_v40 = vpop.f32.mrb[27].mxu0 }
0x2278   :  { %5887 = vtanh.f32 %v2049_v36  ;;  %v4696_v48 = vmul.f32 -1.442695, %v2049_v36 }
0x227a   :  { %5889 = vpow2.f32 %v4696_v48 }
0x2282   :  { %v5888_v44 = vpop.eup %5887 }
0x2283   :  { %2059 = vrot.lane.b32.xlu0 %v5888_v44, %s6294_s3 }
0x2284   :  { %v5890_v50 = vpop.eup %5889 }
0x2285   :  { %v2053_v49 = vadd.f32 1.0, %v5890_v50 }
0x2287   :  { %5891 = vrcp.f32 %v2053_v49 }
0x2291   :  { %v5892_v51 = vpop.eup %5891 }
0x2292   :  { %v2057_v9 = vmul.f32 %v5892_v51, %v1962_v23 }
0x22f5   :  { %v2060_v35 = vpop.permute.xlu0 %2059 }
0x22f6   :  { %v2062_v52 = vmul.f32 %v5892_v51, %v2060_v35 }
0x22f8   :  { %2064 = vrot.lane.b32.xlu1 %v2062_v52, %s6295_s20 }
0x236a   :  { %v2065_v42 = vpop.permute.xlu1 %2064 }
0x236b   :  { %v2067_v53 = vadd.f32 %v2065_v42, %v2057_v9 }
0x236d   :  { %5893 = vtanh.f32 %v2067_v53 }
0x2377   :  { %v5894_v34 = vpop.eup %5893 }
0x2378   :  { %2070 = vrot.lane.b32.xlu0 %v5894_v34, %s6294_s3 }
0x23ea   :  { %v2071_v54 = vpop.permute.xlu0 %2070 }
0x23eb   :  { %v2073_v55 = vmul.f32 %v5892_v51, %v2071_v54 }
0x23ed   :  { %2075 = vrot.lane.b32.xlu1 %v2073_v55, %s6295_s20 }
0x245f   :  { %v2076_v56 = vpop.permute.xlu1 %2075 }
0x2460   :  { %2079 = vst.msk [vmem:[#allocation4 + $0x48] sm:$0xff] %vm177_vm0, %v2076_v56  ;;  %5233 = vmatmul.mubr.msk.f32.vlgmr.msra.gmra.mrb[26].mxu1 %vm177_vm0, %v2076_v56 }
0x2461   :  { %5627 = vmatpush3.bf16.msra.mxu1 %v6798_v12  ;;  %5254 = vmatprep.mubr.msk.f32.mxu1 %vm6292_vm1, %v6293_v25 }
0x2462   :  { %5628 = vmatprep.subr.bf16.mxu1 %v6291_v11 }
0x2465   :  { %5630 = vmatpush3.bf16.msra.mxu1 %v6803_v21 }
0x2466   :  { %5637 = vmatprep.subr.bf16.mxu1 %v6291_v11 }
0x2533   :  { %v2150_v57 = vpop.f32.mrb[26].mxu1 }
0x2534   :  { %v2154_v31 = vadd.f32 %v2150_v57, %v6673_v38  ;;  %v5234_v58 = vpop.f32.mrb[27].mxu1 }
0x2536   :  { %5895 = vtanh.f32 %v2154_v31  ;;  %v4698_v60 = vmul.f32 -1.442695, %v2154_v31 }
0x2538   :  { %5897 = vpow2.f32 %v4698_v60 }
0x2540   :  { %v5896_v59 = vpop.eup %5895 }
0x2541   :  { %2164 = vrot.lane.b32.xlu0 %v5896_v59, %s6294_s3 }
0x2542   :  { %v5898_v61 = vpop.eup %5897 }
0x2543   :  { %v2158_v28 = vadd.f32 1.0, %v5898_v61 }
0x2545   :  { %5899 = vrcp.f32 %v2158_v28 }
0x254f   :  { %v5900_v62 = vpop.eup %5899 }
0x2550   :  { %v2162_v10 = vmul.f32 %v5900_v62, %v2067_v53 }
0x25b3   :  { %v2165_v0 = vpop.permute.xlu0 %2164 }
0x25b4   :  { %v2167_v1 = vmul.f32 %v5900_v62, %v2165_v0 }
0x25b6   :  { %2169 = vrot.lane.b32.xlu1 %v2167_v1, %s6295_s20 }
0x2628   :  { %v2170_v63 = vpop.permute.xlu1 %2169 }
0x2629   :  { %v2172_v41 = vadd.f32 %v2170_v63, %v2162_v10 }
0x262b   :  { %5901 = vtanh.f32 %v2172_v41 }
0x2635   :  { %v5902_v38 = vpop.eup %5901 }
0x2636   :  { %2175 = vrot.lane.b32.xlu0 %v5902_v38, %s6294_s3 }
0x26a8   :  { %v2176_v2 = vpop.permute.xlu0 %2175 }
0x26a9   :  { %v2178_v16 = vmul.f32 %v5900_v62, %v2176_v2 }
0x26ab   :  { %2180 = vrot.lane.b32.xlu1 %v2178_v16, %s6295_s20 }
0x271d   :  { %v2181_v4 = vpop.permute.xlu1 %2180 }
0x271e   :  { %2184 = vst.msk [vmem:[#allocation4 + $0x40] sm:$0xff] %vm177_vm0, %v2181_v4  ;;  %5244 = vmatmul.mubr.msk.f32.vlgmr.msra.gmra.mrb[28].mxu0 %vm177_vm0, %v2181_v4 }
0x271f   :  { %5633 = vmatpush3.bf16.msra.mxu0 %v6798_v12  ;;  %5265 = vmatprep.mubr.msk.f32.mxu0 %vm6292_vm1, %v6293_v25 }
0x2720   :  { %5634 = vmatprep.subr.bf16.mxu0 %v6291_v11 }
0x2723   :  { %5636 = vmatpush3.bf16.msra.mxu0 %v6803_v21 }
0x2724   :  { %5643 = vmatprep.subr.bf16.mxu0 %v6291_v11 }
0x27f1   :  { %v2255_v5 = vpop.f32.mrb[28].mxu0 }
0x27f2   :  { %v2259_v43 = vadd.f32 %v2255_v5, %v6664_v27  ;;  %v5245_v6 = vpop.f32.mrb[29].mxu0 }
0x27f4   :  { %5903 = vtanh.f32 %v2259_v43  ;;  %v4700_v8 = vmul.f32 -1.442695, %v2259_v43 }
0x27f6   :  { %5905 = vpow2.f32 %v4700_v8 }
0x27fe   :  { %v5904_v7 = vpop.eup %5903 }
0x27ff   :  { %2269 = vrot.lane.b32.xlu0 %v5904_v7, %s6294_s3 }
0x2800   :  { %v5906_v37 = vpop.eup %5905 }
0x2801   :  { %v2263_v14 = vadd.f32 1.0, %v5906_v37 }
0x2803   :  { %5907 = vrcp.f32 %v2263_v14 }
0x280d   :  { %v5908_v17 = vpop.eup %5907 }
0x280e   :  { %v2267_v33 = vmul.f32 %v5908_v17, %v2172_v41 }
0x2871   :  { %v2270_v19 = vpop.permute.xlu0 %2269 }
0x2872   :  { %v2272_v47 = vmul.f32 %v5908_v17, %v2270_v19 }
0x2874   :  { %2274 = vrot.lane.b32.xlu1 %v2272_v47, %s6295_s20 }
0x28e6   :  { %v2275_v23 = vpop.permute.xlu1 %2274 }
0x28e7   :  { %v2277_v46 = vadd.f32 %v2275_v23, %v2267_v33 }
0x28e9   :  { %5909 = vtanh.f32 %v2277_v46 }
0x28f3   :  { %v5910_v27 = vpop.eup %5909 }
0x28f4   :  { %2280 = vrot.lane.b32.xlu0 %v5910_v27, %s6294_s3 }
0x2966   :  { %v2281_v26 = vpop.permute.xlu0 %2280 }
0x2967   :  { %v2283_v39 = vmul.f32 %v5908_v17, %v2281_v26 }
0x2969   :  { %2285 = vrot.lane.b32.xlu1 %v2283_v39, %s6295_s20 }
0x29db   :  { %v2286_v29 = vpop.permute.xlu1 %2285 }
0x29dc   :  { %2289 = vst.msk [vmem:[#allocation4 + $0x38] sm:$0xff] %vm177_vm0, %v2286_v29  ;;  %5255 = vmatmul.mubr.msk.f32.vlgmr.msra.gmra.mrb[28].mxu1 %vm177_vm0, %v2286_v29 }
0x29dd   :  { %5639 = vmatpush3.bf16.msra.mxu1 %v6798_v12  ;;  %5276 = vmatprep.mubr.msk.f32.mxu1 %vm6292_vm1, %v6293_v25 }
0x29de   :  { %5640 = vmatprep.subr.bf16.mxu1 %v6291_v11 }
0x29e1   :  { %5642 = vmatpush3.bf16.msra.mxu1 %v6803_v21 }
0x29e2   :  { %5649 = vmatprep.subr.bf16.mxu1 %v6291_v11 }
0x2aaf   :  { %v2360_v32 = vpop.f32.mrb[28].mxu1 }
0x2ab0   :  { %v2364_v36 = vadd.f32 %v2360_v32, %v6667_v30  ;;  %v5256_v40 = vpop.f32.mrb[29].mxu1 }
0x2ab2   :  { %5911 = vtanh.f32 %v2364_v36  ;;  %v4702_v48 = vmul.f32 -1.442695, %v2364_v36 }
0x2ab4   :  { %5913 = vpow2.f32 %v4702_v48 }
0x2abc   :  { %v5912_v44 = vpop.eup %5911 }
0x2abd   :  { %2374 = vrot.lane.b32.xlu0 %v5912_v44, %s6294_s3 }
0x2abe   :  { %v5914_v50 = vpop.eup %5913 }
0x2abf   :  { %v2368_v49 = vadd.f32 1.0, %v5914_v50 }
0x2ac1   :  { %5915 = vrcp.f32 %v2368_v49 }
0x2acb   :  { %v5916_v51 = vpop.eup %5915 }
0x2acc   :  { %v2372_v9 = vmul.f32 %v5916_v51, %v2277_v46 }
0x2b2f   :  { %v2375_v35 = vpop.permute.xlu0 %2374 }
0x2b30   :  { %v2377_v52 = vmul.f32 %v5916_v51, %v2375_v35 }
0x2b32   :  { %2379 = vrot.lane.b32.xlu1 %v2377_v52, %s6295_s20 }
0x2ba4   :  { %v2380_v42 = vpop.permute.xlu1 %2379 }
0x2ba5   :  { %v2382_v53 = vadd.f32 %v2380_v42, %v2372_v9 }
0x2ba7   :  { %5917 = vtanh.f32 %v2382_v53 }
0x2bb1   :  { %v5918_v30 = vpop.eup %5917 }
0x2bb2   :  { %2385 = vrot.lane.b32.xlu0 %v5918_v30, %s6294_s3 }
0x2c24   :  { %v2386_v34 = vpop.permute.xlu0 %2385 }
0x2c25   :  { %v2388_v54 = vmul.f32 %v5916_v51, %v2386_v34 }
0x2c27   :  { %2390 = vrot.lane.b32.xlu1 %v2388_v54, %s6295_s20 }
0x2c99   :  { %v2391_v55 = vpop.permute.xlu1 %2390 }
0x2c9a   :  { %2394 = vst.msk [vmem:[#allocation4 + $0x30] sm:$0xff] %vm177_vm0, %v2391_v55  ;;  %5266 = vmatmul.mubr.msk.f32.vlgmr.msra.gmra.mrb[30].mxu0 %vm177_vm0, %v2391_v55 }
0x2c9b   :  { %5645 = vmatpush3.bf16.msra.mxu0 %v6798_v12  ;;  %5287 = vmatprep.mubr.msk.f32.mxu0 %vm6292_vm1, %v6293_v25 }
0x2c9c   :  { %5646 = vmatprep.subr.bf16.mxu0 %v6291_v11 }
0x2c9f   :  { %5648 = vmatpush3.bf16.msra.mxu0 %v6803_v21 }
0x2ca0   :  { %5655 = vmatprep.subr.bf16.mxu0 %v6291_v11 }
0x2d6d   :  { %v2465_v56 = vpop.f32.mrb[30].mxu0 }
0x2d6e   :  { %v2469_v57 = vadd.f32 %v2465_v56, %v6658_v22  ;;  %v5267_v31 = vpop.f32.mrb[31].mxu0 }
0x2d70   :  { %5919 = vtanh.f32 %v2469_v57  ;;  %v4704_v59 = vmul.f32 -1.442695, %v2469_v57 }
0x2d72   :  { %5921 = vpow2.f32 %v4704_v59 }
0x2d7a   :  { %v5920_v58 = vpop.eup %5919 }
0x2d7b   :  { %2479 = vrot.lane.b32.xlu0 %v5920_v58, %s6294_s3 }
0x2d7c   :  { %v5922_v60 = vpop.eup %5921 }
0x2d7d   :  { %v2473_v61 = vadd.f32 1.0, %v5922_v60 }
0x2d7f   :  { %5923 = vrcp.f32 %v2473_v61 }
0x2d89   :  { %v5924_v28 = vpop.eup %5923 }
0x2d8a   :  { %v2477_v1 = vmul.f32 %v5924_v28, %v2382_v53 }
0x2ded   :  { %v2480_v62 = vpop.permute.xlu0 %2479 }
0x2dee   :  { %v2482_v0 = vmul.f32 %v5924_v28, %v2480_v62 }
0x2df0   :  { %2484 = vrot.lane.b32.xlu1 %v2482_v0, %s6295_s20 }
0x2e62   :  { %v2485_v10 = vpop.permute.xlu1 %2484 }
0x2e63   :  { %v2487_v63 = vadd.f32 %v2485_v10, %v2477_v1 }
0x2e65   :  { %5925 = vtanh.f32 %v2487_v63 }
0x2e6f   :  { %v5926_v22 = vpop.eup %5925 }
0x2e70   :  { %2490 = vrot.lane.b32.xlu0 %v5926_v22, %s6294_s3 }
0x2ee2   :  { %v2491_v41 = vpop.permute.xlu0 %2490 }
0x2ee3   :  { %v2493_v38 = vmul.f32 %v5924_v28, %v2491_v41 }
0x2ee5   :  { %2495 = vrot.lane.b32.xlu1 %v2493_v38, %s6295_s20 }
0x2f57   :  { %v2496_v2 = vpop.permute.xlu1 %2495 }
0x2f58   :  { %2499 = vst.msk [vmem:[#allocation4 + $0x28] sm:$0xff] %vm177_vm0, %v2496_v2  ;;  %5277 = vmatmul.mubr.msk.f32.vlgmr.msra.gmra.mrb[30].mxu1 %vm177_vm0, %v2496_v2 }
0x2f59   :  { %5651 = vmatpush3.bf16.msra.mxu1 %v6798_v12  ;;  %5298 = vmatprep.mubr.msk.f32.mxu1 %vm6292_vm1, %v6293_v25 }
0x2f5a   :  { %5652 = vmatprep.subr.bf16.mxu1 %v6291_v11 }
0x2f5d   :  { %5654 = vmatpush3.bf16.msra.mxu1 %v6803_v21 }
0x2f5e   :  { %5661 = vmatprep.subr.bf16.mxu1 %v6291_v11 }
0x302b   :  { %v2570_v16 = vpop.f32.mrb[30].mxu1 }
0x302c   :  { %v2574_v4 = vadd.f32 %v2570_v16, %v6661_v24  ;;  %v5278_v5 = vpop.f32.mrb[31].mxu1 }
0x302e   :  { %5927 = vtanh.f32 %v2574_v4  ;;  %v4706_v6 = vmul.f32 -1.442695, %v2574_v4 }
0x3030   :  { %5929 = vpow2.f32 %v4706_v6 }
0x3038   :  { %v5928_v43 = vpop.eup %5927 }
0x3039   :  { %2584 = vrot.lane.b32.xlu0 %v5928_v43, %s6294_s3 }
0x303a   :  { %v5930_v7 = vpop.eup %5929 }
0x303b   :  { %v2578_v8 = vadd.f32 1.0, %v5930_v7 }
0x303d   :  { %5931 = vrcp.f32 %v2578_v8 }
0x3047   :  { %v5932_v37 = vpop.eup %5931 }
0x3048   :  { %v2582_v19 = vmul.f32 %v5932_v37, %v2487_v63 }
0x30ab   :  { %v2585_v14 = vpop.permute.xlu0 %2584 }
0x30ac   :  { %v2587_v17 = vmul.f32 %v5932_v37, %v2585_v14 }
0x30ae   :  { %2589 = vrot.lane.b32.xlu1 %v2587_v17, %s6295_s20  ;;  %v4691_v17 = vmul.f32 -1.442695, %v6848_v3 }
0x3120   :  { %v2590_v47 = vpop.permute.xlu1 %2589 }
0x3121   :  { %v2592_v33 = vadd.f32 %v2590_v47, %v2582_v19 }
0x3123   :  { %5933 = vtanh.f32 %v2592_v33 }
0x312d   :  { %v5934_v24 = vpop.eup %5933 }
0x312e   :  { %2595 = vrot.lane.b32.xlu0 %v5934_v24, %s6294_s3 }
0x31a0   :  { %v2596_v23 = vpop.permute.xlu0 %2595 }
0x31a1   :  { %v2598_v46 = vmul.f32 %v5932_v37, %v2596_v23 }
0x31a3   :  { %2600 = vrot.lane.b32.xlu1 %v2598_v46, %s6295_s20 }
0x3215   :  { %v2601_v27 = vpop.permute.xlu1 %2600 }
0x3216   :  { %2604 = vst.msk [vmem:[#allocation4 + $0x20] sm:$0xff] %vm177_vm0, %v2601_v27  ;;  %5288 = vmatmul.mubr.msk.f32.vlgmr.msra.gmra.mrb[32].mxu0 %vm177_vm0, %v2601_v27 }
0x3217   :  { %5657 = vmatpush3.bf16.msra.mxu0 %v6798_v12  ;;  %5309 = vmatprep.mubr.msk.f32.mxu0 %vm6292_vm1, %v6293_v25 }
0x3218   :  { %5658 = vmatprep.subr.bf16.mxu0 %v6291_v11 }
0x321b   :  { %5660 = vmatpush3.bf16.msra.mxu0 %v6803_v21 }
0x32e9   :  { %v2675_v26 = vpop.f32.mrb[32].mxu0 }
0x32ea   :  { %v2679_v39 = vadd.f32 %v2675_v26, %v6652_v18  ;;  %v5289_v29 = vpop.f32.mrb[33].mxu0 }
0x32ec   :  { %5935 = vtanh.f32 %v2679_v39  ;;  %v4708_v36 = vmul.f32 -1.442695, %v2679_v39 }
0x32ee   :  { %5937 = vpow2.f32 %v4708_v36 }
0x32f6   :  { %v5936_v32 = vpop.eup %5935 }
0x32f7   :  { %2689 = vrot.lane.b32.xlu0 %v5936_v32, %s6294_s3 }
0x32f8   :  { %v5938_v40 = vpop.eup %5937 }
0x32f9   :  { %v2683_v44 = vadd.f32 1.0, %v5938_v40 }
0x32fb   :  { %5939 = vrcp.f32 %v2683_v44 }
0x3305   :  { %v5940_v48 = vpop.eup %5939 }
0x3306   :  { %v2687_v51 = vmul.f32 %v5940_v48, %v2592_v33 }
0x3369   :  { %v2690_v50 = vpop.permute.xlu0 %2689 }
0x336a   :  { %v2692_v49 = vmul.f32 %v5940_v48, %v2690_v50 }
0x336c   :  { %2694 = vrot.lane.b32.xlu1 %v2692_v49, %s6295_s20 }
0x33de   :  { %v2695_v35 = vpop.permute.xlu1 %2694 }
0x33df   :  { %v2697_v52 = vadd.f32 %v2695_v35, %v2687_v51 }
0x33e1   :  { %5941 = vtanh.f32 %v2697_v52 }
0x33eb   :  { %v5942_v18 = vpop.eup %5941 }
0x33ec   :  { %2700 = vrot.lane.b32.xlu0 %v5942_v18, %s6294_s3 }
0x345e   :  { %v2701_v9 = vpop.permute.xlu0 %2700 }
0x345f   :  { %v2703_v42 = vmul.f32 %v5940_v48, %v2701_v9 }
0x3461   :  { %2705 = vrot.lane.b32.xlu1 %v2703_v42, %s6295_s20 }
0x34d3   :  { %v2706_v53 = vpop.permute.xlu1 %2705 }
0x34d4   :  { %2709 = vst.msk [vmem:[#allocation4 + $0x18] sm:$0xff] %vm177_vm0, %v2706_v53  ;;  %5299 = vmatmul.mubr.msk.f32.vlgmr.msra.gmra.mrb[32].mxu1 %vm177_vm0, %v2706_v53 }
0x34d5   :  { %5663 = vmatpush3.bf16.msra.mxu1 %v6798_v12  ;;  %5320 = vmatprep.mubr.msk.f32.mxu1 %vm6292_vm1, %v6293_v25 }
0x34d6   :  { %5664 = vmatprep.subr.bf16.mxu1 %v6291_v11 }
0x34d9   :  { %5666 = vmatpush3.bf16.msra.mxu1 %v6803_v21 }
0x34da   :  { %5683 = vmatprep.subr.bf16.mxu1 %v6291_v11 }
0x35a7   :  { %v2780_v30 = vpop.f32.mrb[32].mxu1 }
0x35a8   :  { %v2784_v34 = vadd.f32 %v2780_v30, %v6655_v20  ;;  %v5300_v54 = vpop.f32.mrb[33].mxu1  ;;  %v3051_v30 = vld [vmem:[#allocation17 + $0x20] sm:$0xff] }
0x35aa   :  { %5943 = vtanh.f32 %v2784_v34  ;;  %v4710_v56 = vmul.f32 -1.442695, %v2784_v34  ;;  %v3052_v34 = vld [vmem:[#allocation17 + $0x28] sm:$0xff] }
0x35ab   :  { %v5667_v54 = vpack.c.bf16 %v3052_v34, %v3051_v30 }
0x35ac   :  { %5945 = vpow2.f32 %v4710_v56  ;;  %v3054_v56 = vld [vmem:[#allocation17 + $0x38] sm:$0xff] }
0x35ad   :  { %5668 = vmatprep.subr.bf16.mxu0 %v5667_v54 }
0x35b4   :  { %v5944_v55 = vpop.eup %5943 }
0x35b5   :  { %2794 = vrot.lane.b32.xlu0 %v5944_v55, %s6294_s3  ;;  %v3053_v55 = vld [vmem:[#allocation17 + $0x30] sm:$0xff] }
0x35b6   :  { %v5946_v12 = vpop.eup %5945 }
0x35b7   :  { %v2788_v57 = vadd.f32 1.0, %v5946_v12  ;;  %v5671_v12 = vpack.c.bf16 %v3054_v56, %v3053_v55 }
0x35b9   :  { %5947 = vrcp.f32 %v2788_v57  ;;  %v3047_v57 = vld [vmem:[#allocation17] sm:$0xff] }
0x35c3   :  { %v5948_v31 = vpop.eup %5947 }
0x35c4   :  { %v2792_v21 = vmul.f32 %v5948_v31, %v2697_v52 }
0x3627   :  { %v2795_v58 = vpop.permute.xlu0 %2794 }
0x3628   :  { %v2797_v59 = vmul.f32 %v5948_v31, %v2795_v58 }
0x362a   :  { %2799 = vrot.lane.b32.xlu1 %v2797_v59, %s6295_s20 }
0x369c   :  { %v2800_v60 = vpop.permute.xlu1 %2799 }
0x369d   :  { %v2802_v61 = vadd.f32 %v2800_v60, %v2792_v21  ;;  %v3408_v60 = vld [vmem:[%s7209_s11] sm:$0xff] }
0x369f   :  { %5949 = vtanh.f32 %v2802_v61 }
0x36a9   :  { %v5950_v20 = vpop.eup %5949 }
0x36aa   :  { %2805 = vrot.lane.b32.xlu0 %v5950_v20, %s6294_s3 }
0x371c   :  { %v2806_v28 = vpop.permute.xlu0 %2805 }
0x371d   :  { %v2808_v62 = vmul.f32 %v5948_v31, %v2806_v28  ;;  %v3048_v31 = vld [vmem:[#allocation17 + $0x8] sm:$0xff]  ;;  %v3410_v28 = vld [vmem:[%s7209_s11 + $0x10] sm:$0xff] }
0x371e   :  { %v5675_v59 = vpack.c.bf16 %v3048_v31, %v3047_v57 }
0x371f   :  { %2810 = vrot.lane.b32.xlu1 %v2808_v62, %s6295_s20  ;;  %v3411_v62 = vld [vmem:[%s7209_s11 + $0x18] sm:$0xff] }
0x3791   :  { %v2811_v0 = vpop.permute.xlu1 %2810 }
0x3792   :  { %2814 = vst.msk [vmem:[#allocation4 + $0x10] sm:$0xff] %vm177_vm0, %v2811_v0  ;;  %5310 = vmatmul.mubr.msk.f32.vlgmr.msra.gmra.mrb[34].mxu0 %vm177_vm0, %v2811_v0  ;;  %v6998_v0 = vpack.c.bf16 %v3411_v62, %v3410_v28 }
0x3793   :  { %5670 = vmatpush3.bf16.msra.mxu0 %v5667_v54 }
0x3794   :  { %5672 = vmatprep.subr.bf16.mxu0 %v5671_v12 }
0x3797   :  { %5674 = vmatpush3.bf16.msra.mxu0 %v5671_v12 }
0x3798   :  { %5676 = vmatprep.subr.bf16.mxu0 %v5675_v59 }
0x3865   :  { %v2885_v1 = vpop.f32.mrb[34].mxu0 }
0x3866   :  { %v2889_v10 = vadd.f32 %v2885_v1, %v6646_v13  ;;  %v5311_v63 = vpop.f32.mrb[35].mxu0 }
0x3867   :  { %v3050_v63 = vld [vmem:[#allocation17 + $0x18] sm:$0xff] }
0x3868   :  { %5951 = vtanh.f32 %v2889_v10  ;;  %v4712_v41 = vmul.f32 -1.442695, %v2889_v10  ;;  %v3049_v10 = vld [vmem:[#allocation17 + $0x10] sm:$0xff] }
0x386a   :  { %5953 = vpow2.f32 %v4712_v41  ;;  %v5679_v41 = vpack.c.bf16 %v3050_v63, %v3049_v10 }
0x3872   :  { %v5952_v22 = vpop.eup %5951 }
0x3873   :  { %2899 = vrot.lane.b32.xlu0 %v5952_v22, %s6294_s3 }
0x3874   :  { %v5954_v38 = vpop.eup %5953 }
0x3875   :  { %v2893_v2 = vadd.f32 1.0, %v5954_v38 }
0x3877   :  { %5955 = vrcp.f32 %v2893_v2  ;;  %v3037_v2 = vld [vmem:[#allocation4 + $0x10] sm:$0xff] }
0x3881   :  { %v5956_v16 = vpop.eup %5955 }
0x3882   :  { %v2897_v43 = vmul.f32 %v5956_v16, %v2802_v61  ;;  %v3409_v61 = vld [vmem:[%s7209_s11 + $0x8] sm:$0xff] }
0x3883   :  { %v6988_v20 = vpack.c.bf16 %v3409_v61, %v3408_v60 }
0x38e5   :  { %v2900_v4 = vpop.permute.xlu0 %2899 }
0x38e6   :  { %v2902_v5 = vmul.f32 %v5956_v16, %v2900_v4  ;;  %v3039_v4 = vld [vmem:[#allocation4 + $0x20] sm:$0xff] }
0x38e8   :  { %2904 = vrot.lane.b32.xlu1 %v2902_v5, %s6295_s20  ;;  %v3040_v5 = vld [vmem:[#allocation4 + $0x28] sm:$0xff] }
0x395a   :  { %v2905_v6 = vpop.permute.xlu1 %2904 }
0x395b   :  { %v2907_v7 = vadd.f32 %v2905_v6, %v2897_v43  ;;  %v3041_v43 = vld [vmem:[#allocation4 + $0x30] sm:$0xff]  ;;  %v3042_v6 = vld [vmem:[#allocation4 + $0x38] sm:$0xff] }
0x395d   :  { %5957 = vtanh.f32 %v2907_v7 }
0x395e   :  { %5959 = vtanh.f32 %v6848_v3 }
0x395f   :  { %5961 = vpow2.f32 %v4691_v17  ;;  %v3024_v17 = vld [vmem:[#allocation3 + $0x8] sm:$0xff] }
0x3967   :  { %v5958_v13 = vpop.eup %5957 }
0x3968   :  { %2910 = vrot.lane.b32.xlu0 %v5958_v13, %s6294_s3  ;;  %v5960_v14 = vpop.eup %5959  ;;  %v3044_v13 = vld [vmem:[#allocation4 + $0x48] sm:$0xff] }
0x3969   :  { %v5962_v19 = vpop.eup %5961 }
0x396a   :  { %v1736_v47 = vadd.f32 1.0, %v5962_v19  ;;  %v3025_v19 = vld [vmem:[#allocation3 + $0x10] sm:$0xff] }
0x396c   :  { %5963 = vrcp.f32 %v1736_v47  ;;  %v3026_v47 = vld [vmem:[#allocation3 + $0x18] sm:$0xff] }
0x3976   :  { %v5964_v24 = vpop.eup %5963 }
0x3977   :  { %v1740_v27 = vmul.f32 %v5964_v24, %v6824_v45 }
0x39da   :  { %v2911_v8 = vpop.permute.xlu0 %2910 }
0x39db   :  { %v2913_v37 = vmul.f32 %v5956_v16, %v2911_v8  ;;  %v3038_v16 = vld [vmem:[#allocation4 + $0x18] sm:$0xff]  ;;  %v3045_v8 = vld [vmem:[#allocation4 + $0x50] sm:$0xff] }
0x39dd   :  { %2915 = vrot.lane.b32.xlu1 %v2913_v37, %s6295_s20  ;;  %v3046_v37 = vld [vmem:[#allocation4 + $0x58] sm:$0xff] }
0x39e1   :  { %1742 = vrot.lane.b32.xlu1 %v5960_v14, %s6294_s3  ;;  %v3023_v14 = vld [vmem:[#allocation3] sm:$0xff] }
0x3a4f   :  { %v2916_v33 = vpop.permute.xlu1 %2915 }
0x3a50   :  { %2919 = vst.msk [vmem:[#allocation4 + $0x8] sm:$0xff] %vm177_vm0, %v2916_v33  ;;  %5321 = vmatmul.mubr.msk.f32.vlgmr.msra.gmra.mrb[34].mxu1 %vm177_vm0, %v2916_v33  ;;  %v3027_v33 = vld [vmem:[#allocation3 + $0x20] sm:$0xff] }
0x3a51   :  { %5383 = vmatprep.mubr.msk.f32.mxu1 %vm6292_vm1, %v6293_v25  ;;  %5685 = vmatpush3.bf16.msra.mxu1 %v6988_v20 }
0x3a52   :  { %5686 = vmatprep.subr.bf16.mxu1 %v6291_v11 }
0x3a53   :  { %v1743_v23 = vpop.permute.xlu1 %1742 }
0x3a54   :  { %v1745_v46 = vmul.f32 %v5964_v24, %v1743_v23  ;;  %v3029_v23 = vld [vmem:[#allocation3 + $0x30] sm:$0xff] }
0x3a55   :  { %5688 = vmatpush3.bf16.msra.mxu1 %v6998_v0 }
0x3a56   :  { %1747 = vrot.lane.b32.xlu1 %v1745_v46, %s6295_s20  ;;  %5689 = vmatprep.subr.bf16.mxu1 %v6291_v11  ;;  %v3030_v46 = vld [vmem:[#allocation3 + $0x38] sm:$0xff] }
0x3a57   :  { %v3036_v38 = vld [vmem:[#allocation4 + $0x8] sm:$0xff] }
0x3a58   :  { %5384 = vmatmul.mubr.f32.vlgmr.msra.gmra.mrb[36].mxu1 %v6293_v25 }
0x3a59   :  { %5691 = vmatpush3.bf16.msra.mxu1 %v6988_v20  ;;  %5394 = vmatprep.mubr.msk.f32.mxu1 %vm6292_vm1, %v6293_v25 }
0x3a5a   :  { %5692 = vmatprep.subr.bf16.mxu1 %v6291_v11 }
0x3a5d   :  { %5694 = vmatpush3.bf16.msra.mxu1 %v6998_v0 }
0x3a5e   :  { %5695 = vmatprep.subr.bf16.mxu1 %v6291_v11 }
0x3ac8   :  { %v1748_v3 = vpop.permute.xlu1 %1747 }
0x3ac9   :  { %v1750_v26 = vadd.f32 %v1748_v3, %v1740_v27  ;;  %v3031_v27 = vld [vmem:[#allocation3 + $0x40] sm:$0xff]  ;;  %v3032_v3 = vld [vmem:[#allocation3 + $0x48] sm:$0xff] }
0x3acb   :  { %5965 = vtanh.f32 %v1750_v26  ;;  %v3033_v26 = vld [vmem:[#allocation3 + $0x50] sm:$0xff] }
0x3ad5   :  { %v5966_v39 = vpop.eup %5965 }
0x3ad6   :  { %1753 = vrot.lane.b32.xlu1 %v5966_v39, %s6294_s3 }
0x3b23   :  { %v2989_v29 = vpop.f32.mrb[34].mxu1 }
0x3b24   :  { %v2993_v32 = vadd.f32 %v2989_v29, %v6649_v15  ;;  %v5322_v36 = vpop.f32.mrb[35].mxu1 }
0x3b25   :  { %v4739_v36 = vld [vmem:[%s7210_s12] ss:$0 sm:$0xff]  ;;  %s6296_s12 = smov [#allocation19]  }
0x3b26   :  { %5967 = vtanh.f32 %v2993_v32  ;;  %v4714_v50 = vmul.f32 -1.442695, %v2993_v32  ;;  %s4630_s5 = sshll.u32 %s6296_s12, 4  ;;  %s4631_s5 = int_to_ptr.vmem [resolvable:$true] %s4630_s5 }
0x3b27   :  { %s6247_s26 = scalar_lea.vmem %s4631_s5, 128  ;;  %p6252_p9 = scmp.lt.s32.totalorder %s4631_s5, %s4631_s5 }
0x3b28   :  { %5969 = vpow2.f32 %v4714_v50  ;;  %p6248_p8 = scmp.ne.s32.totalorder %s4631_s5, %s6247_s26  ;;  %p6253_p10 = scmp.lt.s32.totalorder %s6247_s26, %s6247_s26 }
0x3b2a   :  { %p6254_p11 = por %p6253_p10, %p6252_p9 }
0x3b2b   :  { %v3479_v29 = vpop.f32.mrb[36].mxu1 }
0x3b2c   :  { %v5385_v32 = vpop.f32.mrb[37].mxu1  ;;  %p6255_p12 = pnand %p6254_p11, %p6248_p8 }
0x3b30   :  { %v5968_v40 = vpop.eup %5967 }
0x3b31   :  { %3003 = vrot.lane.b32.xlu0 %v5968_v40, %s6294_s3 }
0x3b32   :  { %v5970_v45 = vpop.eup %5969 }
0x3b33   :  { %v2997_v49 = vadd.f32 1.0, %v5970_v45 }
0x3b35   :  { %5971 = vrcp.f32 %v2997_v49 }
0x3b3f   :  { %v5972_v51 = vpop.eup %5971 }
0x3b40   :  { %v3001_v18 = vmul.f32 %v5972_v51, %v2907_v7  ;;  %v3043_v7 = vld [vmem:[#allocation4 + $0x40] sm:$0xff] }
0x3b48   :  { %v1754_v44 = vpop.permute.xlu1 %1753 }
0x3b49   :  { %v1756_v48 = vmul.f32 %v5964_v24, %v1754_v44  ;;  %v3028_v24 = vld [vmem:[#allocation3 + $0x28] sm:$0xff] }
0x3b4b   :  { %1758 = vrot.lane.b32.xlu1 %v1756_v48, %s6295_s20 }
0x3ba3   :  { %v3004_v35 = vpop.permute.xlu0 %3003 }
0x3ba4   :  { %v3006_v52 = vmul.f32 %v5972_v51, %v3004_v35 }
0x3ba6   :  { %3008 = vrot.lane.b32.xlu0 %v3006_v52, %s6295_s20 }
0x3bbd   :  { %v1759_v15 = vpop.permute.xlu1 %1758 }
0x3bbe   :  { %1762 = vst.msk [vmem:[#allocation3 + $0x58] sm:$0xff] %vm177_vm0, %v1759_v15 }
0x3bc5   :  { %v3034_v39 = vld [vmem:[#allocation3 + $0x58] sm:$0xff] }
0x3c18   :  { %v3009_v9 = vpop.permute.xlu0 %3008 }
0x3c19   :  { %v3011_v42 = vadd.f32 %v3009_v9, %v3001_v18 }
0x3c1b   :  { %5973 = vtanh.f32 %v3011_v42 }
0x3c25   :  { %v5974_v53 = vpop.eup %5973 }
0x3c26   :  { %3014 = vrot.lane.b32.xlu0 %v5974_v53, %s6294_s3 }
0x3c98   :  { %v3015_v58 = vpop.permute.xlu0 %3014 }
0x3c99   :  { %v3017_v21 = vmul.f32 %v5972_v51, %v3015_v58 }
0x3c9b   :  { %3019 = vrot.lane.b32.xlu0 %v3017_v21, %s6295_s20 }
0x3d0d   :  { %v3020_v1 = vpop.permute.xlu0 %3019 }
0x3d0e   :  { %3022 = vst.msk [vmem:[#allocation4] sm:$0xff] %vm177_vm0, %v3020_v1 }
0x3d15   :  { %v3035_v22 = vld [vmem:[#allocation4] sm:$0xff] }
0x3d16   :  { %5331 = vmatprep.mubr.msk.f32.mxu0 %vm177_vm0, %v3035_v22 }
0x3d17   :  { %5332 = vmatmul.mubr.msk.f32.vlgmr.msra.gmra.mrb[36].mxu0 %vm177_vm0, %v3036_v38 }
0x3d18   :  { %5334 = vmatprep.mubr.msk.f32.mxu0 %vm177_vm0, %v3037_v2  ;;  %5678 = vmatpush3.bf16.msra.mxu0 %v5675_v59 }
0x3d19   :  { %5680 = vmatprep.subr.bf16.mxu0 %v5679_v41 }
0x3d1b   :  { %5335 = vmatmul.mubr.msk.f32.gmra.mrb[38].mxu0 %vm177_vm0, %v3038_v16 }
0x3d1c   :  { %5337 = vmatprep.mubr.msk.f32.mxu0 %vm177_vm0, %v3039_v4  ;;  %5682 = vmatpush3.bf16.msra.mxu0 %v5679_v41 }
0x3d1d   :  { %5719 = vmatprep.subr.bf16.mxu0 %v6291_v11 }
0x3d1f   :  { %5338 = vmatmul.mubr.msk.f32.gmra.mrb[40].mxu0 %vm177_vm0, %v3040_v5 }
0x3d20   :  { %5340 = vmatprep.mubr.msk.f32.mxu0 %vm177_vm0, %v3041_v43 }
0x3d23   :  { %5341 = vmatmul.mubr.msk.f32.gmra.mrb[42].mxu0 %vm177_vm0, %v3042_v6 }
0x3d24   :  { %5343 = vmatprep.mubr.msk.f32.mxu0 %vm177_vm0, %v3043_v7 }
0x3d27   :  { %5344 = vmatmul.mubr.msk.f32.gmra.mrb[44].mxu0 %vm177_vm0, %v3044_v13 }
0x3d28   :  { %5346 = vmatprep.mubr.msk.f32.mxu0 %vm177_vm0, %v3045_v8 }
0x3d2b   :  { %5347 = vmatmul.mubr.msk.f32.gmra.mrb[46].mxu0 %vm177_vm0, %v3046_v37 }
0x3d2c   :  { %5357 = vmatprep.mubr.msk.f32.mxu0 %vm177_vm0, %v3023_v14 }
0x3d2f   :  { %5358 = vmatmul.mubr.msk.f32.vlgmr.msra.gmra.mrb[36].mxu0 %vm177_vm0, %v3024_v17 }
0x3d30   :  { %5360 = vmatprep.mubr.msk.f32.mxu0 %vm177_vm0, %v3025_v19  ;;  %5721 = vmatpush3.bf16.msra.mxu0 %v6988_v20 }
0x3d31   :  { %5722 = vmatprep.subr.bf16.mxu0 %v6291_v11 }
0x3d33   :  { %5361 = vmatmul.mubr.msk.f32.gmra.mrb[38].mxu0 %vm177_vm0, %v3026_v47 }
0x3d34   :  { %5363 = vmatprep.mubr.msk.f32.mxu0 %vm177_vm0, %v3027_v33  ;;  %5724 = vmatpush3.bf16.msra.mxu0 %v6998_v0 }
0x3d35   :  { %5731 = vmatprep.subr.bf16.mxu0 %v6291_v11 }
0x3d37   :  { %5364 = vmatmul.mubr.msk.f32.gmra.mrb[40].mxu0 %vm177_vm0, %v3028_v24 }
0x3d38   :  { %5366 = vmatprep.mubr.msk.f32.mxu0 %vm177_vm0, %v3029_v23 }
0x3d3b   :  { %5367 = vmatmul.mubr.msk.f32.gmra.mrb[42].mxu0 %vm177_vm0, %v3030_v46 }
0x3d3c   :  { %5369 = vmatprep.mubr.msk.f32.mxu0 %vm177_vm0, %v3031_v27 }
0x3d3f   :  { %5370 = vmatmul.mubr.msk.f32.gmra.mrb[44].mxu0 %vm177_vm0, %v3032_v3 }
0x3d40   :  { %5372 = vmatprep.mubr.msk.f32.mxu0 %vm177_vm0, %v3033_v26 }
0x3d43   :  { %5373 = vmatmul.mubr.msk.f32.gmra.mrb[46].mxu0 %vm177_vm0, %v3034_v39 }
0x3d44   :  { %5449 = vmatprep.mubr.msk.f32.mxu0 %vm6292_vm1, %v6293_v25 }
0x3e02   :  { %v5359_v40 = vpop.f32.mrb[36].mxu0 }
0x3e03   :  { %v7044_v44 = vadd.f32 %v5359_v40, %v4739_v36  ;;  %v3318_v48 = vpop.f32.mrb[37].mxu0 }
0x3e04   :  { %v7046_v50 = vadd.f32 %v4739_v36, %v3318_v48 }
0x3e06   :  { %v5362_v45 = vpop.f32.mrb[38].mxu0 }
0x3e07   :  { %v7048_v49 = vadd.f32 %v5362_v45, %v4739_v36  ;;  %v3328_v51 = vpop.f32.mrb[39].mxu0 }
0x3e08   :  { %v7050_v35 = vadd.f32 %v4739_v36, %v3328_v51 }
0x3e0a   :  { %v5365_v52 = vpop.f32.mrb[40].mxu0 }
0x3e0b   :  { %v7052_v15 = vadd.f32 %v5365_v52, %v4739_v36  ;;  %v3338_v18 = vpop.f32.mrb[41].mxu0 }
0x3e0c   :  { %v7054_v9 = vadd.f32 %v4739_v36, %v3338_v18 }
0x3e0e   :  { %v5368_v42 = vpop.f32.mrb[42].mxu0 }
0x3e0f   :  { %v7056_v53 = vadd.f32 %v5368_v42, %v4739_v36  ;;  %v3348_v30 = vpop.f32.mrb[43].mxu0 }
0x3e10   :  { %v7058_v34 = vadd.f32 %v4739_v36, %v3348_v30 }
0x3e12   :  { %v5371_v54 = vpop.f32.mrb[44].mxu0 }
0x3e13   :  { %v7060_v55 = vadd.f32 %v5371_v54, %v4739_v36  ;;  %v3358_v56 = vpop.f32.mrb[45].mxu0 }
0x3e14   :  { %v7062_v12 = vadd.f32 %v4739_v36, %v3358_v56 }
0x3e16   :  { %v5374_v57 = vpop.f32.mrb[46].mxu0 }
0x3e17   :  { %v3395_v31 = vadd.f32 %v5374_v57, %v4739_v36  ;;  %v3368_v58 = vpop.f32.mrb[47].mxu0 }
0x3e18   :  { %v3394_v59 = vadd.f32 %v4739_v36, %v3368_v58 }
0x3e19   :  { %v3483_v21 = vadd.f32 %v3479_v29, %v3395_v31 }
0x3e1b   :  { %5975 = vtanh.f32 %v3483_v21  ;;  %v4740_v61 = vmul.f32 -1.442695, %v3483_v21 }
0x3e1d   :  { %5977 = vpow2.f32 %v4740_v61 }
0x3e25   :  { %v5976_v60 = vpop.eup %5975 }
0x3e26   :  { %3493 = vrot.lane.b32.xlu0 %v5976_v60, %s6294_s3 }
0x3e27   :  { %v5978_v28 = vpop.eup %5977 }
0x3e28   :  { %v3487_v62 = vadd.f32 1.0, %v5978_v28 }
0x3e2a   :  { %5979 = vrcp.f32 %v3487_v62 }
0x3e34   :  { %v5980_v1 = vpop.eup %5979 }
0x3e35   :  { %v3491_v22 = vmul.f32 0.0, %v5980_v1 }
0x3e98   :  { %v3494_v10 = vpop.permute.xlu0 %3493 }
0x3e99   :  { %v3496_v63 = vmul.f32 %v5980_v1, %v3494_v10 }
0x3e9b   :  { %3498 = vrot.lane.b32.xlu1 %v3496_v63, %s6295_s20 }
0x3f0d   :  { %v3499_v41 = vpop.permute.xlu1 %3498 }
0x3f0e   :  { %v3501_v38 = vadd.f32 %v3499_v41, %v3491_v22 }
0x3f10   :  { %5981 = vtanh.f32 %v3501_v38 }
0x3f1a   :  { %v5982_v2 = vpop.eup %5981 }
0x3f1b   :  { %3504 = vrot.lane.b32.xlu0 %v5982_v2, %s6294_s3 }
0x3f8d   :  { %v3505_v16 = vpop.permute.xlu0 %3504 }
0x3f8e   :  { %v3507_v4 = vmul.f32 %v5980_v1, %v3505_v16 }
0x3f90   :  { %3510 = vrot.lane.b32.xlu1 %v3507_v4, %s6295_s20 }
0x4002   :  { %v3511_v5 = vpop.permute.xlu1 %3510 }
0x4003   :  { %5395 = vmatmul.mubr.msk.f32.vlgmr.msra.gmra.mrb[38].mxu1 %vm177_vm0, %v3511_v5 }
0x4004   :  { %5697 = vmatpush3.bf16.msra.mxu1 %v6988_v20  ;;  %5405 = vmatprep.mubr.msk.f32.mxu1 %vm6292_vm1, %v6293_v25 }
0x4005   :  { %5698 = vmatprep.subr.bf16.mxu1 %v6291_v11 }
0x4008   :  { %5700 = vmatpush3.bf16.msra.mxu1 %v6998_v0 }
0x4009   :  { %5701 = vmatprep.subr.bf16.mxu1 %v6291_v11 }
0x40d6   :  { %v3580_v43 = vpop.f32.mrb[38].mxu1 }
0x40d7   :  { %v3584_v6 = vadd.f32 %v3580_v43, %v3394_v59  ;;  %v5396_v7 = vpop.f32.mrb[39].mxu1 }
0x40d9   :  { %5983 = vtanh.f32 %v3584_v6  ;;  %v4742_v8 = vmul.f32 -1.442695, %v3584_v6 }
0x40db   :  { %5985 = vpow2.f32 %v4742_v8 }
0x40e3   :  { %v5984_v13 = vpop.eup %5983 }
0x40e4   :  { %3594 = vrot.lane.b32.xlu0 %v5984_v13, %s6294_s3 }
0x40e5   :  { %v5986_v37 = vpop.eup %5985 }
0x40e6   :  { %v3588_v14 = vadd.f32 1.0, %v5986_v37 }
0x40e8   :  { %5987 = vrcp.f32 %v3588_v14 }
0x40f2   :  { %v5988_v17 = vpop.eup %5987 }
0x40f3   :  { %v3592_v33 = vmul.f32 %v5988_v17, %v3501_v38 }
0x4156   :  { %v3595_v19 = vpop.permute.xlu0 %3594 }
0x4157   :  { %v3597_v47 = vmul.f32 %v5988_v17, %v3595_v19 }
0x4159   :  { %3599 = vrot.lane.b32.xlu1 %v3597_v47, %s6295_s20 }
0x41cb   :  { %v3600_v24 = vpop.permute.xlu1 %3599 }
0x41cc   :  { %v3602_v23 = vadd.f32 %v3600_v24, %v3592_v33 }
0x41ce   :  { %5989 = vtanh.f32 %v3602_v23 }
0x41d8   :  { %v5990_v46 = vpop.eup %5989 }
0x41d9   :  { %3605 = vrot.lane.b32.xlu0 %v5990_v46, %s6294_s3 }
0x424b   :  { %v3606_v27 = vpop.permute.xlu0 %3605 }
0x424c   :  { %v3608_v3 = vmul.f32 %v5988_v17, %v3606_v27 }
0x424e   :  { %3611 = vrot.lane.b32.xlu1 %v3608_v3, %s6295_s20 }
0x42c0   :  { %v3612_v26 = vpop.permute.xlu1 %3611 }
0x42c1   :  { %5406 = vmatmul.mubr.msk.f32.vlgmr.msra.gmra.mrb[40].mxu1 %vm177_vm0, %v3612_v26 }
0x42c2   :  { %5703 = vmatpush3.bf16.msra.mxu1 %v6988_v20  ;;  %5416 = vmatprep.mubr.msk.f32.mxu1 %vm6292_vm1, %v6293_v25 }
0x42c3   :  { %5704 = vmatprep.subr.bf16.mxu1 %v6291_v11 }
0x42c6   :  { %5706 = vmatpush3.bf16.msra.mxu1 %v6998_v0 }
0x42c7   :  { %5707 = vmatprep.subr.bf16.mxu1 %v6291_v11 }
0x4394   :  { %v3681_v39 = vpop.f32.mrb[40].mxu1 }
0x4395   :  { %v3685_v29 = vadd.f32 %v3681_v39, %v7060_v55  ;;  %v5407_v32 = vpop.f32.mrb[41].mxu1 }
0x4397   :  { %5991 = vtanh.f32 %v3685_v29  ;;  %v4744_v40 = vmul.f32 -1.442695, %v3685_v29 }
0x4399   :  { %5993 = vpow2.f32 %v4744_v40 }
0x43a1   :  { %v5992_v36 = vpop.eup %5991 }
0x43a2   :  { %3695 = vrot.lane.b32.xlu0 %v5992_v36, %s6294_s3 }
0x43a3   :  { %v5994_v48 = vpop.eup %5993 }
0x43a4   :  { %v3689_v45 = vadd.f32 1.0, %v5994_v48 }
0x43a6   :  { %5995 = vrcp.f32 %v3689_v45 }
0x43b0   :  { %v5996_v51 = vpop.eup %5995 }
0x43b1   :  { %v3693_v42 = vmul.f32 %v5996_v51, %v3602_v23 }
0x4414   :  { %v3696_v52 = vpop.permute.xlu0 %3695 }
0x4415   :  { %v3698_v18 = vmul.f32 %v5996_v51, %v3696_v52 }
0x4417   :  { %3700 = vrot.lane.b32.xlu1 %v3698_v18, %s6295_s20 }
0x4489   :  { %v3701_v30 = vpop.permute.xlu1 %3700 }
0x448a   :  { %v3703_v54 = vadd.f32 %v3701_v30, %v3693_v42 }
0x448c   :  { %5997 = vtanh.f32 %v3703_v54 }
0x4496   :  { %v5998_v55 = vpop.eup %5997 }
0x4497   :  { %3706 = vrot.lane.b32.xlu0 %v5998_v55, %s6294_s3 }
0x4509   :  { %v3707_v56 = vpop.permute.xlu0 %3706 }
0x450a   :  { %v3709_v57 = vmul.f32 %v5996_v51, %v3707_v56 }
0x450c   :  { %3712 = vrot.lane.b32.xlu1 %v3709_v57, %s6295_s20 }
0x457e   :  { %v3713_v31 = vpop.permute.xlu1 %3712 }
0x457f   :  { %5417 = vmatmul.mubr.msk.f32.vlgmr.msra.gmra.mrb[42].mxu1 %vm177_vm0, %v3713_v31 }
0x4580   :  { %5709 = vmatpush3.bf16.msra.mxu1 %v6988_v20  ;;  %5427 = vmatprep.mubr.msk.f32.mxu1 %vm6292_vm1, %v6293_v25 }
0x4581   :  { %5710 = vmatprep.subr.bf16.mxu1 %v6291_v11 }
0x4584   :  { %5712 = vmatpush3.bf16.msra.mxu1 %v6998_v0 }
0x4585   :  { %5713 = vmatprep.subr.bf16.mxu1 %v6291_v11 }
0x4652   :  { %v3782_v58 = vpop.f32.mrb[42].mxu1 }
0x4653   :  { %v3786_v59 = vadd.f32 %v3782_v58, %v7062_v12  ;;  %v5418_v21 = vpop.f32.mrb[43].mxu1 }
0x4655   :  { %5999 = vtanh.f32 %v3786_v59  ;;  %v4746_v61 = vmul.f32 -1.442695, %v3786_v59 }
0x4657   :  { %6001 = vpow2.f32 %v4746_v61 }
0x465f   :  { %v6000_v60 = vpop.eup %5999 }
0x4660   :  { %3796 = vrot.lane.b32.xlu0 %v6000_v60, %s6294_s3 }
0x4661   :  { %v6002_v28 = vpop.eup %6001 }
0x4662   :  { %v3790_v62 = vadd.f32 1.0, %v6002_v28 }
0x4664   :  { %6003 = vrcp.f32 %v3790_v62 }
0x466e   :  { %v6004_v1 = vpop.eup %6003 }
0x466f   :  { %v3794_v22 = vmul.f32 %v6004_v1, %v3703_v54 }
0x46d2   :  { %v3797_v10 = vpop.permute.xlu0 %3796 }
0x46d3   :  { %v3799_v63 = vmul.f32 %v6004_v1, %v3797_v10 }
0x46d5   :  { %3801 = vrot.lane.b32.xlu1 %v3799_v63, %s6295_s20 }
0x4747   :  { %v3802_v41 = vpop.permute.xlu1 %3801 }
0x4748   :  { %v3804_v38 = vadd.f32 %v3802_v41, %v3794_v22 }
0x474a   :  { %6005 = vtanh.f32 %v3804_v38 }
0x4754   :  { %v6006_v12 = vpop.eup %6005 }
0x4755   :  { %3807 = vrot.lane.b32.xlu0 %v6006_v12, %s6294_s3 }
0x47c7   :  { %v3808_v2 = vpop.permute.xlu0 %3807 }
0x47c8   :  { %v3810_v16 = vmul.f32 %v6004_v1, %v3808_v2 }
0x47ca   :  { %3813 = vrot.lane.b32.xlu1 %v3810_v16, %s6295_s20 }
0x483c   :  { %v3814_v4 = vpop.permute.xlu1 %3813 }
0x483d   :  { %5428 = vmatmul.mubr.msk.f32.vlgmr.msra.gmra.mrb[44].mxu1 %vm177_vm0, %v3814_v4 }
0x483e   :  { %5715 = vmatpush3.bf16.msra.mxu1 %v6988_v20  ;;  %5438 = vmatprep.mubr.msk.f32.mxu1 %vm6292_vm1, %v6293_v25 }
0x483f   :  { %5716 = vmatprep.subr.bf16.mxu1 %v6291_v11 }
0x4842   :  { %5718 = vmatpush3.bf16.msra.mxu1 %v6998_v0 }
0x4843   :  { %5725 = vmatprep.subr.bf16.mxu1 %v6291_v11 }
0x4910   :  { %v3883_v5 = vpop.f32.mrb[44].mxu1 }
0x4911   :  { %v3887_v43 = vadd.f32 %v3883_v5, %v7056_v53  ;;  %v5429_v6 = vpop.f32.mrb[45].mxu1 }
0x4913   :  { %6007 = vtanh.f32 %v3887_v43  ;;  %v4748_v13 = vmul.f32 -1.442695, %v3887_v43 }
0x4915   :  { %6009 = vpow2.f32 %v4748_v13 }
0x491d   :  { %v6008_v7 = vpop.eup %6007 }
0x491e   :  { %3897 = vrot.lane.b32.xlu0 %v6008_v7, %s6294_s3 }
0x491f   :  { %v6010_v8 = vpop.eup %6009 }
0x4920   :  { %v3891_v37 = vadd.f32 1.0, %v6010_v8 }
0x4922   :  { %6011 = vrcp.f32 %v3891_v37 }
0x492c   :  { %v6012_v14 = vpop.eup %6011 }
0x492d   :  { %v3895_v47 = vmul.f32 %v6012_v14, %v3804_v38 }
0x4990   :  { %v3898_v17 = vpop.permute.xlu0 %3897 }
0x4991   :  { %v3900_v19 = vmul.f32 %v6012_v14, %v3898_v17 }
0x4993   :  { %3902 = vrot.lane.b32.xlu1 %v3900_v19, %s6295_s20 }
0x4a05   :  { %v3903_v33 = vpop.permute.xlu1 %3902 }
0x4a06   :  { %v3905_v24 = vadd.f32 %v3903_v33, %v3895_v47 }
0x4a08   :  { %6013 = vtanh.f32 %v3905_v24 }
0x4a12   :  { %v6014_v53 = vpop.eup %6013 }
0x4a13   :  { %3908 = vrot.lane.b32.xlu0 %v6014_v53, %s6294_s3 }
0x4a85   :  { %v3909_v23 = vpop.permute.xlu0 %3908 }
0x4a86   :  { %v3911_v46 = vmul.f32 %v6012_v14, %v3909_v23 }
0x4a88   :  { %3914 = vrot.lane.b32.xlu1 %v3911_v46, %s6295_s20 }
0x4afa   :  { %v3915_v27 = vpop.permute.xlu1 %3914 }
0x4afb   :  { %5439 = vmatmul.mubr.msk.f32.vlgmr.msra.gmra.mrb[46].mxu1 %vm177_vm0, %v3915_v27 }
0x4afc   :  { %5727 = vmatpush3.bf16.msra.mxu1 %v6988_v20  ;;  %5460 = vmatprep.mubr.msk.f32.mxu1 %vm6292_vm1, %v6293_v25 }
0x4afd   :  { %5728 = vmatprep.subr.bf16.mxu1 %v6291_v11 }
0x4b00   :  { %5730 = vmatpush3.bf16.msra.mxu1 %v6998_v0 }
0x4b01   :  { %5737 = vmatprep.subr.bf16.mxu1 %v6291_v11 }
0x4bce   :  { %v3984_v3 = vpop.f32.mrb[46].mxu1 }
0x4bcf   :  { %v3988_v26 = vadd.f32 %v3984_v3, %v7058_v34  ;;  %v5440_v39 = vpop.f32.mrb[47].mxu1 }
0x4bd1   :  { %6015 = vtanh.f32 %v3988_v26  ;;  %v4750_v32 = vmul.f32 -1.442695, %v3988_v26 }
0x4bd3   :  { %6017 = vpow2.f32 %v4750_v32 }
0x4bdb   :  { %v6016_v29 = vpop.eup %6015 }
0x4bdc   :  { %3998 = vrot.lane.b32.xlu0 %v6016_v29, %s6294_s3 }
0x4bdd   :  { %v6018_v36 = vpop.eup %6017 }
0x4bde   :  { %v3992_v40 = vadd.f32 1.0, %v6018_v36 }
0x4be0   :  { %6019 = vrcp.f32 %v3992_v40 }
0x4bea   :  { %v6020_v48 = vpop.eup %6019 }
0x4beb   :  { %v3996_v52 = vmul.f32 %v6020_v48, %v3905_v24 }
0x4c4e   :  { %v3999_v45 = vpop.permute.xlu0 %3998 }
0x4c4f   :  { %v4001_v51 = vmul.f32 %v6020_v48, %v3999_v45 }
0x4c51   :  { %4003 = vrot.lane.b32.xlu1 %v4001_v51, %s6295_s20 }
0x4cc3   :  { %v4004_v18 = vpop.permute.xlu1 %4003 }
0x4cc4   :  { %v4006_v42 = vadd.f32 %v4004_v18, %v3996_v52 }
0x4cc6   :  { %6021 = vtanh.f32 %v4006_v42 }
0x4cd0   :  { %v6022_v34 = vpop.eup %6021 }
0x4cd1   :  { %4009 = vrot.lane.b32.xlu0 %v6022_v34, %s6294_s3 }
0x4d43   :  { %v4010_v30 = vpop.permute.xlu0 %4009 }
0x4d44   :  { %v4012_v54 = vmul.f32 %v6020_v48, %v4010_v30 }
0x4d46   :  { %4015 = vrot.lane.b32.xlu1 %v4012_v54, %s6295_s20 }
0x4db8   :  { %v4016_v55 = vpop.permute.xlu1 %4015 }
0x4db9   :  { %5450 = vmatmul.mubr.msk.f32.vlgmr.msra.gmra.mrb[48].mxu0 %vm177_vm0, %v4016_v55 }
0x4dba   :  { %5733 = vmatpush3.bf16.msra.mxu0 %v6988_v20  ;;  %5471 = vmatprep.mubr.msk.f32.mxu0 %vm6292_vm1, %v6293_v25 }
0x4dbb   :  { %5734 = vmatprep.subr.bf16.mxu0 %v6291_v11 }
0x4dbe   :  { %5736 = vmatpush3.bf16.msra.mxu0 %v6998_v0 }
0x4dbf   :  { %5743 = vmatprep.subr.bf16.mxu0 %v6291_v11 }
0x4e8c   :  { %v4085_v56 = vpop.f32.mrb[48].mxu0 }
0x4e8d   :  { %v4089_v57 = vadd.f32 %v4085_v56, %v7052_v15  ;;  %v5451_v31 = vpop.f32.mrb[49].mxu0 }
0x4e8f   :  { %6023 = vtanh.f32 %v4089_v57  ;;  %v4752_v59 = vmul.f32 -1.442695, %v4089_v57 }
0x4e91   :  { %6025 = vpow2.f32 %v4752_v59 }
0x4e99   :  { %v6024_v58 = vpop.eup %6023 }
0x4e9a   :  { %4099 = vrot.lane.b32.xlu0 %v6024_v58, %s6294_s3 }
0x4e9b   :  { %v6026_v21 = vpop.eup %6025 }
0x4e9c   :  { %v4093_v60 = vadd.f32 1.0, %v6026_v21 }
0x4e9e   :  { %6027 = vrcp.f32 %v4093_v60 }
0x4ea8   :  { %v6028_v61 = vpop.eup %6027 }
0x4ea9   :  { %v4097_v1 = vmul.f32 %v6028_v61, %v4006_v42 }
0x4f0c   :  { %v4100_v28 = vpop.permute.xlu0 %4099 }
0x4f0d   :  { %v4102_v62 = vmul.f32 %v6028_v61, %v4100_v28 }
0x4f0f   :  { %4104 = vrot.lane.b32.xlu1 %v4102_v62, %s6295_s20 }
0x4f81   :  { %v4105_v10 = vpop.permute.xlu1 %4104 }
0x4f82   :  { %v4107_v63 = vadd.f32 %v4105_v10, %v4097_v1 }
0x4f84   :  { %6029 = vtanh.f32 %v4107_v63 }
0x4f8e   :  { %v6030_v15 = vpop.eup %6029 }
0x4f8f   :  { %4110 = vrot.lane.b32.xlu0 %v6030_v15, %s6294_s3 }
0x5001   :  { %v4111_v22 = vpop.permute.xlu0 %4110 }
0x5002   :  { %v4113_v41 = vmul.f32 %v6028_v61, %v4111_v22 }
0x5004   :  { %4116 = vrot.lane.b32.xlu1 %v4113_v41, %s6295_s20 }
0x5076   :  { %v4117_v38 = vpop.permute.xlu1 %4116 }
0x5077   :  { %5461 = vmatmul.mubr.msk.f32.vlgmr.msra.gmra.mrb[48].mxu1 %vm177_vm0, %v4117_v38 }
0x5078   :  { %5739 = vmatpush3.bf16.msra.mxu1 %v6988_v20  ;;  %5482 = vmatprep.mubr.msk.f32.mxu1 %vm6292_vm1, %v6293_v25 }
0x5079   :  { %5740 = vmatprep.subr.bf16.mxu1 %v6291_v11 }
0x507c   :  { %5742 = vmatpush3.bf16.msra.mxu1 %v6998_v0 }
0x507d   :  { %5749 = vmatprep.subr.bf16.mxu1 %v6291_v11 }
0x514a   :  { %v4186_v12 = vpop.f32.mrb[48].mxu1 }
0x514b   :  { %v4190_v2 = vadd.f32 %v4186_v12, %v7054_v9  ;;  %v5462_v16 = vpop.f32.mrb[49].mxu1 }
0x514d   :  { %6031 = vtanh.f32 %v4190_v2  ;;  %v4754_v5 = vmul.f32 -1.442695, %v4190_v2 }
0x514f   :  { %6033 = vpow2.f32 %v4754_v5 }
0x5157   :  { %v6032_v4 = vpop.eup %6031 }
0x5158   :  { %4200 = vrot.lane.b32.xlu0 %v6032_v4, %s6294_s3 }
0x5159   :  { %v6034_v43 = vpop.eup %6033 }
0x515a   :  { %v4194_v6 = vadd.f32 1.0, %v6034_v43 }
0x515c   :  { %6035 = vrcp.f32 %v4194_v6 }
0x5166   :  { %v6036_v7 = vpop.eup %6035 }
0x5167   :  { %v4198_v37 = vmul.f32 %v6036_v7, %v4107_v63 }
0x51ca   :  { %v4201_v13 = vpop.permute.xlu0 %4200 }
0x51cb   :  { %v4203_v8 = vmul.f32 %v6036_v7, %v4201_v13 }
0x51cd   :  { %4205 = vrot.lane.b32.xlu1 %v4203_v8, %s6295_s20 }
0x523f   :  { %v4206_v14 = vpop.permute.xlu1 %4205 }
0x5240   :  { %v4208_v17 = vadd.f32 %v4206_v14, %v4198_v37 }
0x5242   :  { %6037 = vtanh.f32 %v4208_v17 }
0x524c   :  { %v6038_v9 = vpop.eup %6037 }
0x524d   :  { %4211 = vrot.lane.b32.xlu0 %v6038_v9, %s6294_s3 }
0x52bf   :  { %v4212_v19 = vpop.permute.xlu0 %4211 }
0x52c0   :  { %v4214_v47 = vmul.f32 %v6036_v7, %v4212_v19 }
0x52c2   :  { %4217 = vrot.lane.b32.xlu1 %v4214_v47, %s6295_s20 }
0x5334   :  { %v4218_v33 = vpop.permute.xlu1 %4217 }
0x5335   :  { %5472 = vmatmul.mubr.msk.f32.vlgmr.msra.gmra.mrb[50].mxu0 %vm177_vm0, %v4218_v33 }
0x5336   :  { %5745 = vmatpush3.bf16.msra.mxu0 %v6988_v20  ;;  %5493 = vmatprep.mubr.msk.f32.mxu0 %vm6292_vm1, %v6293_v25 }
0x5337   :  { %5746 = vmatprep.subr.bf16.mxu0 %v6291_v11 }
0x533a   :  { %5748 = vmatpush3.bf16.msra.mxu0 %v6998_v0 }
0x5408   :  { %v4287_v24 = vpop.f32.mrb[50].mxu0 }
0x5409   :  { %v4291_v53 = vadd.f32 %v4287_v24, %v7048_v49  ;;  %v5473_v23 = vpop.f32.mrb[51].mxu0 }
0x540b   :  { %6039 = vtanh.f32 %v4291_v53  ;;  %v4756_v27 = vmul.f32 -1.442695, %v4291_v53 }
0x540d   :  { %6041 = vpow2.f32 %v4756_v27 }
0x5415   :  { %v6040_v46 = vpop.eup %6039 }
0x5416   :  { %4301 = vrot.lane.b32.xlu0 %v6040_v46, %s6294_s3 }
0x5417   :  { %v6042_v3 = vpop.eup %6041 }
0x5418   :  { %v4295_v26 = vadd.f32 1.0, %v6042_v3 }
0x541a   :  { %6043 = vrcp.f32 %v4295_v26 }
0x5424   :  { %v6044_v39 = vpop.eup %6043 }
0x5425   :  { %v4299_v36 = vmul.f32 %v6044_v39, %v4208_v17 }
0x5488   :  { %v4302_v29 = vpop.permute.xlu0 %4301 }
0x5489   :  { %v4304_v32 = vmul.f32 %v6044_v39, %v4302_v29 }
0x548b   :  { %4306 = vrot.lane.b32.xlu1 %v4304_v32, %s6295_s20 }
0x54fd   :  { %v4307_v40 = vpop.permute.xlu1 %4306 }
0x54fe   :  { %v4309_v48 = vadd.f32 %v4307_v40, %v4299_v36 }
0x5500   :  { %6045 = vtanh.f32 %v4309_v48 }
0x550a   :  { %v6046_v49 = vpop.eup %6045 }
0x550b   :  { %4312 = vrot.lane.b32.xlu0 %v6046_v49, %s6294_s3 }
0x557d   :  { %v4313_v45 = vpop.permute.xlu0 %4312 }
0x557e   :  { %v4315_v51 = vmul.f32 %v6044_v39, %v4313_v45 }
0x5580   :  { %4318 = vrot.lane.b32.xlu1 %v4315_v51, %s6295_s20 }
0x55f2   :  { %v4319_v52 = vpop.permute.xlu1 %4318 }
0x55f3   :  { %5483 = vmatmul.mubr.msk.f32.vlgmr.msra.gmra.mrb[50].mxu1 %vm177_vm0, %v4319_v52 }
0x55f4   :  { %5751 = vmatpush3.bf16.msra.mxu1 %v6988_v20  ;;  %5504 = vmatprep.mubr.msk.f32.mxu1 %vm6292_vm1, %v6293_v25 }
0x55f5   :  { %5752 = vmatprep.subr.bf16.mxu1 %v6291_v11 }
0x55f8   :  { %5754 = vmatpush3.bf16.msra.mxu1 %v6998_v0 }
0x56c6   :  { %v4388_v18 = vpop.f32.mrb[50].mxu1 }
0x56c7   :  { %v4392_v42 = vadd.f32 %v4388_v18, %v7050_v35  ;;  %v5484_v34 = vpop.f32.mrb[51].mxu1 }
0x56c9   :  { %6047 = vtanh.f32 %v4392_v42  ;;  %v4758_v54 = vmul.f32 -1.442695, %v4392_v42 }
0x56cb   :  { %6049 = vpow2.f32 %v4758_v54 }
0x56d3   :  { %v6048_v30 = vpop.eup %6047 }
0x56d4   :  { %4402 = vrot.lane.b32.xlu0 %v6048_v30, %s6294_s3 }
0x56d5   :  { %v6050_v55 = vpop.eup %6049 }
0x56d6   :  { %v4396_v56 = vadd.f32 1.0, %v6050_v55 }
0x56d8   :  { %6051 = vrcp.f32 %v4396_v56 }
0x56e2   :  { %v6052_v20 = vpop.eup %6051 }
0x56e3   :  { %v4400_v11 = vmul.f32 %v6052_v20, %v4309_v48 }
0x5746   :  { %v4403_v57 = vpop.permute.xlu0 %4402 }
0x5747   :  { %v4405_v25 = vmul.f32 %v6052_v20, %v4403_v57 }
0x5749   :  { %4407 = vrot.lane.b32.xlu1 %v4405_v25, %s6295_s20 }
0x57bb   :  { %v4408_v0 = vpop.permute.xlu1 %4407 }
0x57bc   :  { %v4410_v31 = vadd.f32 %v4408_v0, %v4400_v11 }
0x57be   :  { %6053 = vtanh.f32 %v4410_v31 }
0x57c8   :  { %v6054_v35 = vpop.eup %6053 }
0x57c9   :  { %4413 = vrot.lane.b32.xlu0 %v6054_v35, %s6294_s3 }
0x583b   :  { %v4414_v58 = vpop.permute.xlu0 %4413 }
0x583c   :  { %v4416_v59 = vmul.f32 %v6052_v20, %v4414_v58 }
0x583e   :  { %4419 = vrot.lane.b32.xlu1 %v4416_v59, %s6295_s20 }
0x58b0   :  { %v4420_v21 = vpop.permute.xlu1 %4419 }
0x58b1   :  { %5494 = vmatmul.mubr.msk.f32.vlgmr.msra.gmra.mrb[52].mxu0 %vm177_vm0, %v4420_v21 }
0x5984   :  { %v4489_v60 = vpop.f32.mrb[52].mxu0 }
0x5985   :  { %v4493_v61 = vadd.f32 %v4489_v60, %v7044_v44  ;;  %v5495_v28 = vpop.f32.mrb[53].mxu0 }
0x5987   :  { %6055 = vtanh.f32 %v4493_v61  ;;  %v4760_v1 = vmul.f32 -1.442695, %v4493_v61 }
0x5989   :  { %6057 = vpow2.f32 %v4760_v1 }
0x5991   :  { %v6056_v62 = vpop.eup %6055 }
0x5992   :  { %4503 = vrot.lane.b32.xlu0 %v6056_v62, %s6294_s3 }
0x5993   :  { %v6058_v10 = vpop.eup %6057 }
0x5994   :  { %v4497_v63 = vadd.f32 1.0, %v6058_v10 }
0x5996   :  { %6059 = vrcp.f32 %v4497_v63 }
0x59a0   :  { %v6060_v15 = vpop.eup %6059 }
0x59a1   :  { %v4501_v38 = vmul.f32 %v6060_v15, %v4410_v31 }
0x5a04   :  { %v4504_v22 = vpop.permute.xlu0 %4503 }
0x5a05   :  { %v4506_v41 = vmul.f32 %v6060_v15, %v4504_v22 }
0x5a07   :  { %4508 = vrot.lane.b32.xlu1 %v4506_v41, %s6295_s20 }
0x5a79   :  { %v4509_v12 = vpop.permute.xlu1 %4508 }
0x5a7a   :  { %v4511_v2 = vadd.f32 %v4509_v12, %v4501_v38 }
0x5a7c   :  { %6061 = vtanh.f32 %v4511_v2 }
0x5a86   :  { %v6062_v44 = vpop.eup %6061 }
0x5a87   :  { %4514 = vrot.lane.b32.xlu0 %v6062_v44, %s6294_s3 }
0x5af9   :  { %v4515_v16 = vpop.permute.xlu0 %4514 }
0x5afa   :  { %v4517_v4 = vmul.f32 %v6060_v15, %v4515_v16 }
0x5afc   :  { %4520 = vrot.lane.b32.xlu1 %v4517_v4, %s6295_s20 }
0x5b6e   :  { %v4521_v5 = vpop.permute.xlu1 %4520 }
0x5b6f   :  { %5505 = vmatmul.mubr.msk.f32.vlgmr.msra.gmra.mrb[52].mxu1 %vm177_vm0, %v4521_v5 }
0x5c42   :  { %v4590_v43 = vpop.f32.mrb[52].mxu1 }
0x5c43   :  { %v4594_v6 = vadd.f32 %v4590_v43, %v7046_v50  ;;  %v5506_v7 = vpop.f32.mrb[53].mxu1 }
0x5c45   :  { %6063 = vtanh.f32 %v4594_v6  ;;  %v4762_v8 = vmul.f32 -1.442695, %v4594_v6 }
0x5c47   :  { %6065 = vpow2.f32 %v4762_v8 }
0x5c4f   :  { %v6064_v13 = vpop.eup %6063 }
0x5c50   :  { %4604 = vrot.lane.b32.xlu0 %v6064_v13, %s6294_s3 }
0x5c51   :  { %v6066_v37 = vpop.eup %6065 }
0x5c52   :  { %v4598_v14 = vadd.f32 1.0, %v6066_v37 }
0x5c54   :  { %6067 = vrcp.f32 %v4598_v14 }
0x5c5e   :  { %v6068_v17 = vpop.eup %6067 }
0x5c5f   :  { %v4602_v47 = vmul.f32 %v6068_v17, %v4511_v2 }
0x5cc2   :  { %v4605_v9 = vpop.permute.xlu0 %4604 }
0x5cc3   :  { %v4607_v19 = vmul.f32 %v6068_v17, %v4605_v9 }
0x5cc5   :  { %4609 = vrot.lane.b32.xlu1 %v4607_v19, %s6295_s20 }
0x5d37   :  { %v4610_v33 = vpop.permute.xlu1 %4609 }
0x5d38   :  { %v4612_v24 = vadd.f32 %v4610_v33, %v4602_v47 }
0x5d3a   :  { %6069 = vtanh.f32 %v4612_v24 }
0x5d44   :  { %v6070_v50 = vpop.eup %6069 }
0x5d45   :  { %4615 = vrot.lane.b32.xlu0 %v6070_v50, %s6294_s3 }
0x5db7   :  { %v4616_v53 = vpop.permute.xlu0 %4615 }
0x5db8   :  { %v4618_v23 = vmul.f32 %v6068_v17, %v4616_v53 }
0x5dba   :  { %4620 = vrot.lane.b32.xlu1 %v4618_v23, %s6295_s20 }
0x5e2c   :  { %v4621_v46 = vpop.permute.xlu1 %4620 }
0x5e2d   :  { %4623 = vst.msk [vmem:[#allocation19] sm:$0xff] %vm177_vm0, %v4621_v46 }
0x5e2e   :  { %6258 = shalt.err (!%p6255_p12)
}
0x5e2f   :  { %s6259_s22 = scalar_lea.hbm %s7211_s13, 128 }
0x5e30   :  { %p6260_p13 = scmp.ne.s32.totalorder %s7211_s13, %s6259_s22  ;;  %p6263_p0 = scmp.lt.u32.totalorder %s6259_s22, %s7211_s13 }
0x5e32   :  { %p6265_p1 = pnand %p6263_p0, %p6260_p13 }
0x5e34   :  { %6268 = shalt.err (!%p6265_p1)
}
0x5e35   :  { %4633 = dma.vmem_to_hbm [thread:$0]  %s4631_s5, 128, %s7211_s13, [#allocation7]  }
0x5e36   :  { %6279 = dma.done.wait [#allocation7], 128  }
0x5e37   :  { %6280 = vsyncadd [#allocation7], 4294967168 }
0x5e38   :  { %4637 = vsyncpa [#allocation6], 1 }
0x5e39   :  { %4638 = vsyncpa [#allocation9], 1 }
0x5e3a   :  { %4639 = vsyncpa [#allocation12], 1 }
0x5e3b   :  { %4640 = vsyncpa [#allocation15], 1 }
0x5e3c   :  { %4641 = vsyncpa [#allocation18], 1 }
0x5e3d   :  { %4642 = vsyncpa [#allocation7], 1 }

</bundles_post_ra>
